<compile_context>
chip_gen: v7x
topology: tpu7x:2x2x1
jax: 0.10.0
libtpu: 0.0.40
codegen_flags: <defaults>
</compile_context>

<pallas_src>
import numpy as np

import jax
import jax.numpy as jnp
from jax.experimental import pallas as pl
from jax.experimental.pallas import tpu as pltpu


# ----------------------------------------------------------------------------
# Fused kernel: [2x nearest upsample + concat + pad] -> conv3x3+BN+ReLU
#               -> conv3x3+BN+ReLU,  one batch element per grid step.
# ----------------------------------------------------------------------------
def _make_decoder_kernel(H, W, Cin, Cskip, Cout):
    H2, W2 = 2 * H, 2 * W
    C1 = Cin + Cskip
    has_skip = Cskip > 0

    def kernel(*refs):
        if has_skip:
            (x_ref, skip_ref, up_ref, w1_ref, s1_ref, b1_ref,
             w2_ref, s2_ref, b2_ref,
             out_ref, pad1_ref, mid_ref, p1_ref, p2_ref) = refs
        else:
            (x_ref, up_ref, w1_ref, s1_ref, b1_ref,
             w2_ref, s2_ref, b2_ref,
             out_ref, pad1_ref, mid_ref, p1_ref, p2_ref) = refs
            skip_ref = None

        f32 = jnp.float32

        # ---- stage 0: fused 2x-nearest upsample + channel concat + zero halo,
        #      entirely in VMEM (upsampled/concatenated tensor never hits HBM).
        pad1_ref[...] = jnp.zeros_like(pad1_ref)
        mid_ref[...] = jnp.zeros_like(mid_ref)

        x_flat = x_ref[0].reshape(H * W, Cin).astype(f32)               # (H*W, Cin)
        # one-hot upsample operator applied on the MXU (exact copy per row)
        xu = jnp.dot(up_ref[...], x_flat, preferred_element_type=f32)   # (H2*W2, Cin)
        pad1_ref[1:H2 + 1, 1:W2 + 1, 0:Cin] = xu.reshape(H2, W2, Cin)
        if has_skip:
            pad1_ref[1:H2 + 1, 1:W2 + 1, Cin:C1] = skip_ref[0].astype(f32)

        # ---- stage 1: conv1 (3x3, pad=1, no bias) as ONE im2col matmul,
        #      bf16 operands / f32 accumulate, folded-BN + ReLU in f32.
        for dy in range(3):
            for dx in range(3):
                t = dy * 3 + dx
                p1_ref[:, t * C1:(t + 1) * C1] = (
                    pad1_ref[dy:dy + H2, dx:dx + W2, :].reshape(H2 * W2, C1))
        y1 = jnp.dot(p1_ref[...].astype(jnp.bfloat16), w1_ref[...],
                     preferred_element_type=f32)                        # (H2*W2, Cout)
        y1 = jnp.maximum(y1 * s1_ref[...] + b1_ref[...], 0.0)
        # intermediate activation stays resident in VMEM, pre-padded for conv2
        mid_ref[1:H2 + 1, 1:W2 + 1, :] = y1.reshape(H2, W2, Cout)

        # ---- stage 2: conv2 (3x3, pad=1, no bias) + folded-BN + ReLU.
        for dy in range(3):
            for dx in range(3):
                t = dy * 3 + dx
                p2_ref[:, t * Cout:(t + 1) * Cout] = (
                    mid_ref[dy:dy + H2, dx:dx + W2, :].reshape(H2 * W2, Cout))
        y2 = jnp.dot(p2_ref[...].astype(jnp.bfloat16), w2_ref[...],
                     preferred_element_type=f32)
        y2 = jnp.maximum(y2 * s2_ref[...] + b2_ref[...], 0.0)

        # TODO(synk): with Cout < 128 this store is lane-masked; a lane-dense
        # (Cout, H2*W2) output layout would need an in-kernel transpose.
        out_ref[0] = y2.reshape(H2, W2, Cout).astype(out_ref.dtype)

    return kernel


def _decoder_block_pallas(x_nhwc, skip_nhwc, w1_hwio, s1, b1, w2_hwio, s2, b2):
    """Fused DecoderBlock body. x: (N,H,W,Cin) NHWC, skip: (N,2H,2W,Cskip) or None."""
    N, H, W, Cin = x_nhwc.shape
    Cout = w1_hwio.shape[-1]
    H2, W2 = 2 * H, 2 * W
    Cskip = 0 if skip_nhwc is None else skip_nhwc.shape[-1]
    C1 = Cin + Cskip
    assert w1_hwio.shape == (3, 3, C1, Cout), w1_hwio.shape
    assert w2_hwio.shape == (3, 3, Cout, Cout), w2_hwio.shape

    # One-hot 2x-nearest-upsample operator (output pixel -> source pixel),
    # a trace-time numpy constant consumed by the MXU inside the kernel.
    # TODO(synk): for large spatial sizes replace this O((H*W)^2) one-hot
    # matmul with a strided VMEM copy; at these decoder-block sizes it is tiny.
    src = (np.arange(H2)[:, None] // 2) * W + (np.arange(W2)[None, :] // 2)
    up_mat = (src.reshape(H2 * W2, 1) == np.arange(H * W)[None, :])
    up_mat = jnp.asarray(up_mat.astype(np.float32))                 # (H2*W2, H*W)

    # im2col weights: rows ordered (tap = dy*3+dx, then input channel)
    w1 = w1_hwio.reshape(9 * C1, Cout).astype(jnp.bfloat16)
    w2 = w2_hwio.reshape(9 * Cout, Cout).astype(jnp.bfloat16)
    s1 = s1.reshape(1, Cout).astype(jnp.float32)
    b1 = b1.reshape(1, Cout).astype(jnp.float32)
    s2 = s2.reshape(1, Cout).astype(jnp.float32)
    b2 = b2.reshape(1, Cout).astype(jnp.float32)

    in_specs = [pl.BlockSpec((1, H, W, Cin), lambda n: (n, 0, 0, 0))]
    args = [x_nhwc]
    if skip_nhwc is not None:
        in_specs.append(pl.BlockSpec((1, H2, W2, Cskip), lambda n: (n, 0, 0, 0)))
        args.append(skip_nhwc)
    in_specs += [
        pl.BlockSpec((H2 * W2, H * W), lambda n: (0, 0)),
        pl.BlockSpec((9 * C1, Cout), lambda n: (0, 0)),
        pl.BlockSpec((1, Cout), lambda n: (0, 0)),
        pl.BlockSpec((1, Cout), lambda n: (0, 0)),
        pl.BlockSpec((9 * Cout, Cout), lambda n: (0, 0)),
        pl.BlockSpec((1, Cout), lambda n: (0, 0)),
        pl.BlockSpec((1, Cout), lambda n: (0, 0)),
    ]
    args += [up_mat, w1, s1, b1, w2, s2, b2]

    kernel = _make_decoder_kernel(H, W, Cin, Cskip, Cout)

    return pl.pallas_call(
        kernel,
        out_shape=jax.ShapeDtypeStruct((N, H2, W2, Cout), x_nhwc.dtype),
        grid_spec=pltpu.PrefetchScalarGridSpec(
            num_scalar_prefetch=0,
            grid=(N,),
            in_specs=in_specs,
            out_specs=pl.BlockSpec((1, H2, W2, Cout), lambda n: (n, 0, 0, 0)),
            scratch_shapes=[
                pltpu.VMEM((H2 + 2, W2 + 2, C1), jnp.float32),    # padded upsample+concat
                pltpu.VMEM((H2 + 2, W2 + 2, Cout), jnp.float32),  # padded conv1 output
                pltpu.VMEM((H2 * W2, 9 * C1), jnp.float32),       # im2col for conv1
                pltpu.VMEM((H2 * W2, 9 * Cout), jnp.float32),     # im2col for conv2
            ],
        ),
        compiler_params=pltpu.CompilerParams(
            # batch axis is independent -> shard across TensorCores (megacore/v7x)
            dimension_semantics=("parallel",),
            # NOTE: tiles here are far below the scoped-VMEM default; for
            # realistic decoder sizes, tile spatially (2-row halo) and raise
            # vmem_limit_bytes with headroom (esp. v7x's 64 MiB VMEM).
        ),
    )(*args)


# ----------------------------------------------------------------------------
# Parameter construction (matching module __init__ shapes; BN folded, bf16 W)
# ----------------------------------------------------------------------------
def make_params(in_channels, skip_channels, out_channels, key):
    c1_in = in_channels + skip_channels
    k1, k2, k3, k4 = jax.random.split(key, 4)
    eps = 1e-5

    def bn_fold(c, k):
        kg, kb, km, kv = jax.random.split(k, 4)
        gamma = 1.0 + 0.2 * jax.random.normal(kg, (c,), jnp.float32)
        beta = 0.1 * jax.random.normal(kb, (c,), jnp.float32)
        mean = 0.1 * jax.random.normal(km, (c,), jnp.float32)
        var = 1.0 + 0.2 * jax.random.uniform(kv, (c,), jnp.float32)
        scale = gamma / jnp.sqrt(var + eps)
        bias = beta - mean * scale
        return scale, bias

    # Conv2dReLU uses bias=False with BatchNorm; weights kept HWIO, stored bf16
    w1 = (0.1 * jax.random.normal(k1, (3, 3, c1_in, out_channels), jnp.float32)
          ).astype(jnp.bfloat16)
    w2 = (0.1 * jax.random.normal(k2, (3, 3, out_channels, out_channels),
                                  jnp.float32)).astype(jnp.bfloat16)
    s1, b1 = bn_fold(out_channels, k3)
    s2, b2 = bn_fold(out_channels, k4)
    return dict(w1=w1, scale1=s1, bias1=b1, w2=w2, scale2=s2, bias2=b2)


# ----------------------------------------------------------------------------
# DecoderBlock forward (NCHW in / NCHW out, mirroring the PyTorch module)
# ----------------------------------------------------------------------------
@jax.jit
def decoder_block_forward(x_nchw, skip_nchw, params):
    # NCHW -> NHWC only on the small low-res x and the skip; the upsampled /
    # concatenated / padded activation is built inside the kernel in VMEM.
    x = jnp.transpose(x_nchw, (0, 2, 3, 1))
    skip = None if skip_nchw is None else jnp.transpose(skip_nchw, (0, 2, 3, 1))
    out = _decoder_block_pallas(
        x, skip,
        params["w1"], params["scale1"], params["bias1"],
        params["w2"], params["scale2"], params["bias2"])
    # attention1/attention2 are Identity for attention_type=None
    return jnp.transpose(out, (0, 3, 1, 2))  # back to NCHW


# ----------------------------------------------------------------------------
# Pure-JAX reference (mirrors the kernel's bf16 MXU casts, f32 accumulation)
# ----------------------------------------------------------------------------
def _ref_conv_bn_relu(x_nhwc, w_hwio_bf16, scale, bias):
    y = jax.lax.conv_general_dilated(
        x_nhwc.astype(jnp.bfloat16), w_hwio_bf16,
        window_strides=(1, 1), padding="SAME",
        dimension_numbers=("NHWC", "HWIO", "NHWC"),
        preferred_element_type=jnp.float32)
    return jnp.maximum(y * scale + bias, 0.0)


def _ref_forward(x_nchw, skip_nchw, params):
    x = jnp.repeat(jnp.repeat(x_nchw, 2, axis=2), 2, axis=3)
    if skip_nchw is not None:
        x = jnp.concatenate([x, skip_nchw], axis=1)
    x = jnp.transpose(x, (0, 2, 3, 1))
    x = _ref_conv_bn_relu(x, params["w1"], params["scale1"], params["bias1"])
    x = _ref_conv_bn_relu(x, params["w2"], params["scale2"], params["bias2"])
    return jnp.transpose(x, (0, 3, 1, 2))


if __name__ == "__main__":
    key = jax.random.PRNGKey(0)
    k_x, k_skip, k_p, k_p2 = jax.random.split(key, 4)

    # in_channels=8, skip_channels=4, out_channels=8
    N, Cin, Cskip, Cout = 2, 8, 4, 8
    H = W = 8  # pre-upsample spatial; skip is at 2H x 2W

    x = jax.random.normal(k_x, (N, Cin, H, W), jnp.float32)            # NCHW
    skip = jax.random.normal(k_skip, (N, Cskip, 2 * H, 2 * W), jnp.float32)
    params = make_params(Cin, Cskip, Cout, k_p)

    out = jax.block_until_ready(decoder_block_forward(x, skip, params))
    assert out.shape == (N, Cout, 2 * H, 2 * W), out.shape
    ref = jax.block_until_ready(_ref_forward(x, skip, params))
    err = float(jnp.max(jnp.abs(out - ref)))
    assert err < 5e-2, err

    # no-skip UNet++ node (skip=None path)
    params_ns = make_params(Cin, 0, Cout, k_p2)
    out_ns = jax.block_until_ready(decoder_block_forward(x, None, params_ns))
    ref_ns = jax.block_until_ready(_ref_forward(x, None, params_ns))
    assert out_ns.shape == (N, Cout, 2 * H, 2 * W), out_ns.shape
    err_ns = float(jnp.max(jnp.abs(out_ns - ref_ns)))
    assert err_ns < 5e-2, err_ns

    # TODO(synk): BatchNorm is implemented in inference mode (running-stat
    # affine fold); training-mode batch statistics are not computed in-kernel.
    print("KERNEL_OK")
</pallas_src>

<mosaic_0001>
module attributes {stable_mosaic.version = 11 : i64} {
  func.func @kernel(%arg0: i32, %arg1: memref<1x8x8x8xf32, #tpu.memory_space<vmem>>, %arg2: memref<1x16x16x4xf32, #tpu.memory_space<vmem>>, %arg3: memref<256x64xf32, #tpu.memory_space<vmem>>, %arg4: memref<108x8xbf16, #tpu.memory_space<vmem>>, %arg5: memref<1x8xf32, #tpu.memory_space<vmem>>, %arg6: memref<1x8xf32, #tpu.memory_space<vmem>>, %arg7: memref<72x8xbf16, #tpu.memory_space<vmem>>, %arg8: memref<1x8xf32, #tpu.memory_space<vmem>>, %arg9: memref<1x8xf32, #tpu.memory_space<vmem>>, %arg10: memref<1x16x16x8xf32, #tpu.memory_space<vmem>>, %arg11: memref<18x18x12xf32, #tpu.memory_space<vmem>>, %arg12: memref<18x18x8xf32, #tpu.memory_space<vmem>>, %arg13: memref<256x108xf32, #tpu.memory_space<vmem>>, %arg14: memref<256x72xf32, #tpu.memory_space<vmem>>) attributes {dimension_semantics = [#tpu.dimension_semantics<parallel>], iteration_bounds = array<i64: 2>, scalar_prefetch = 0 : i64, scratch_operands = 4 : i64, tpu.core_type = #tpu.core_type<tc>, window_params = [{transform_indices = @transform_0, window_bounds = array<i64: 1, 8, 8, 8>}, {transform_indices = @transform_1, window_bounds = array<i64: 1, 16, 16, 4>}, {pipeline_mode = #tpu.pipeline_mode<synchronous>, transform_indices = @transform_2, window_bounds = array<i64: 256, 64>}, {pipeline_mode = #tpu.pipeline_mode<synchronous>, transform_indices = @transform_3, window_bounds = array<i64: 108, 8>}, {pipeline_mode = #tpu.pipeline_mode<synchronous>, transform_indices = @transform_4, window_bounds = array<i64: 1, 8>}, {pipeline_mode = #tpu.pipeline_mode<synchronous>, transform_indices = @transform_5, window_bounds = array<i64: 1, 8>}, {pipeline_mode = #tpu.pipeline_mode<synchronous>, transform_indices = @transform_6, window_bounds = array<i64: 72, 8>}, {pipeline_mode = #tpu.pipeline_mode<synchronous>, transform_indices = @transform_7, window_bounds = array<i64: 1, 8>}, {pipeline_mode = #tpu.pipeline_mode<synchronous>, transform_indices = @transform_8, window_bounds = array<i64: 1, 8>}, {transform_indices = @transform_9, window_bounds = array<i64: 1, 16, 16, 8>}]} {
    %cst = arith.constant 0.000000e+00 : f32
    %0 = vector.broadcast %cst : f32 to vector<18x18x12xf32>
    %c0 = arith.constant 0 : index
    %c0_0 = arith.constant 0 : index
    %c0_1 = arith.constant 0 : index
    %1 = vector.load %arg11[%c0, %c0_0, %c0_1] : memref<18x18x12xf32, #tpu.memory_space<vmem>>, vector<18x18x12xf32>
    tpu.vector_store %arg11[%c0, %c0_0, %c0_1], %0 {strides = array<i32>} : memref<18x18x12xf32, #tpu.memory_space<vmem>>, vector<18x18x12xf32>,
    %cst_2 = arith.constant 0.000000e+00 : f32
    %2 = vector.broadcast %cst_2 : f32 to vector<18x18x8xf32>
    %c0_3 = arith.constant 0 : index
    %c0_4 = arith.constant 0 : index
    %c0_5 = arith.constant 0 : index
    %3 = vector.load %arg12[%c0_3, %c0_4, %c0_5] : memref<18x18x8xf32, #tpu.memory_space<vmem>>, vector<18x18x8xf32>
    tpu.vector_store %arg12[%c0_3, %c0_4, %c0_5], %2 {strides = array<i32>} : memref<18x18x8xf32, #tpu.memory_space<vmem>>, vector<18x18x8xf32>,
    %c0_6 = arith.constant 0 : index
    %c0_7 = arith.constant 0 : index
    %c0_8 = arith.constant 0 : index
    %c0_9 = arith.constant 0 : index
    %4 = vector.load %arg1[%c0_6, %c0_7, %c0_8, %c0_9] : memref<1x8x8x8xf32, #tpu.memory_space<vmem>>, vector<1x8x8x8xf32>
    %5 = vector.shape_cast %4 : vector<1x8x8x8xf32> to vector<8x8x8xf32>
    %6 = vector.shape_cast %5 : vector<8x8x8xf32> to vector<64x8xf32>
    %c0_10 = arith.constant 0 : index
    %c0_11 = arith.constant 0 : index
    %7 = vector.load %arg3[%c0_10, %c0_11] : memref<256x64xf32, #tpu.memory_space<vmem>>, vector<256x64xf32>
    %cst_12 = arith.constant dense<0.000000e+00> : vector<256x8xf32>
    %8 = tpu.matmul %7, %6, %cst_12 {dimension_numbers = #tpu.dot_dimension_numbers<[1], [0], [0], [1], [0, 0, 1, 1], [], []>} : vector<256x64xf32>, vector<64x8xf32>, vector<256x8xf32> -> vector<256x8xf32>
    %9 = vector.shape_cast %8 : vector<256x8xf32> to vector<16x16x8xf32>
    %c1 = arith.constant 1 : index
    %c1_13 = arith.constant 1 : index
    %c0_14 = arith.constant 0 : index
    %10 = vector.load %arg11[%c1, %c1_13, %c0_14] : memref<18x18x12xf32, #tpu.memory_space<vmem>>, vector<16x16x8xf32>
    tpu.vector_store %arg11[%c1, %c1_13, %c0_14], %9 {strides = array<i32>} : memref<18x18x12xf32, #tpu.memory_space<vmem>>, vector<16x16x8xf32>,
    %c0_15 = arith.constant 0 : index
    %c0_16 = arith.constant 0 : index
    %c0_17 = arith.constant 0 : index
    %c0_18 = arith.constant 0 : index
    %11 = vector.load %arg2[%c0_15, %c0_16, %c0_17, %c0_18] : memref<1x16x16x4xf32, #tpu.memory_space<vmem>>, vector<1x16x16x4xf32>
    %12 = vector.shape_cast %11 : vector<1x16x16x4xf32> to vector<16x16x4xf32>
    %c1_19 = arith.constant 1 : index
    %c1_20 = arith.constant 1 : index
    %c8 = arith.constant 8 : index
    %13 = vector.load %arg11[%c1_19, %c1_20, %c8] : memref<18x18x12xf32, #tpu.memory_space<vmem>>, vector<16x16x4xf32>
    tpu.vector_store %arg11[%c1_19, %c1_20, %c8], %12 {strides = array<i32>} : memref<18x18x12xf32, #tpu.memory_space<vmem>>, vector<16x16x4xf32>,
    %c0_21 = arith.constant 0 : index
    %c0_22 = arith.constant 0 : index
    %c0_23 = arith.constant 0 : index
    %14 = vector.load %arg11[%c0_21, %c0_22, %c0_23] : memref<18x18x12xf32, #tpu.memory_space<vmem>>, vector<16x16x12xf32>
    %15 = vector.shape_cast %14 : vector<16x16x12xf32> to vector<256x12xf32>
    %c0_24 = arith.constant 0 : index
    %c0_25 = arith.constant 0 : index
    %16 = vector.load %arg13[%c0_24, %c0_25] : memref<256x108xf32, #tpu.memory_space<vmem>>, vector<256x12xf32>
    tpu.vector_store %arg13[%c0_24, %c0_25], %15 {strides = array<i32>} : memref<256x108xf32, #tpu.memory_space<vmem>>, vector<256x12xf32>,
    %c0_26 = arith.constant 0 : index
    %c1_27 = arith.constant 1 : index
    %c0_28 = arith.constant 0 : index
    %17 = vector.load %arg11[%c0_26, %c1_27, %c0_28] : memref<18x18x12xf32, #tpu.memory_space<vmem>>, vector<16x16x12xf32>
    %18 = vector.shape_cast %17 : vector<16x16x12xf32> to vector<256x12xf32>
    %c0_29 = arith.constant 0 : index
    %c12 = arith.constant 12 : index
    %19 = vector.load %arg13[%c0_29, %c12] : memref<256x108xf32, #tpu.memory_space<vmem>>, vector<256x12xf32>
    tpu.vector_store %arg13[%c0_29, %c12], %18 {strides = array<i32>} : memref<256x108xf32, #tpu.memory_space<vmem>>, vector<256x12xf32>,
    %c0_30 = arith.constant 0 : index
    %c2 = arith.constant 2 : index
    %c0_31 = arith.constant 0 : index
    %20 = vector.load %arg11[%c0_30, %c2, %c0_31] : memref<18x18x12xf32, #tpu.memory_space<vmem>>, vector<16x16x12xf32>
    %21 = vector.shape_cast %20 : vector<16x16x12xf32> to vector<256x12xf32>
    %c0_32 = arith.constant 0 : index
    %c24 = arith.constant 24 : index
    %22 = vector.load %arg13[%c0_32, %c24] : memref<256x108xf32, #tpu.memory_space<vmem>>, vector<256x12xf32>
    tpu.vector_store %arg13[%c0_32, %c24], %21 {strides = array<i32>} : memref<256x108xf32, #tpu.memory_space<vmem>>, vector<256x12xf32>,
    %c1_33 = arith.constant 1 : index
    %c0_34 = arith.constant 0 : index
    %c0_35 = arith.constant 0 : index
    %23 = vector.load %arg11[%c1_33, %c0_34, %c0_35] : memref<18x18x12xf32, #tpu.memory_space<vmem>>, vector<16x16x12xf32>
    %24 = vector.shape_cast %23 : vector<16x16x12xf32> to vector<256x12xf32>
    %c0_36 = arith.constant 0 : index
    %c36 = arith.constant 36 : index
    %25 = vector.load %arg13[%c0_36, %c36] : memref<256x108xf32, #tpu.memory_space<vmem>>, vector<256x12xf32>
    tpu.vector_store %arg13[%c0_36, %c36], %24 {strides = array<i32>} : memref<256x108xf32, #tpu.memory_space<vmem>>, vector<256x12xf32>,
    %c1_37 = arith.constant 1 : index
    %c1_38 = arith.constant 1 : index
    %c0_39 = arith.constant 0 : index
    %26 = vector.load %arg11[%c1_37, %c1_38, %c0_39] : memref<18x18x12xf32, #tpu.memory_space<vmem>>, vector<16x16x12xf32>
    %27 = vector.shape_cast %26 : vector<16x16x12xf32> to vector<256x12xf32>
    %c0_40 = arith.constant 0 : index
    %c48 = arith.constant 48 : index
    %28 = vector.load %arg13[%c0_40, %c48] : memref<256x108xf32, #tpu.memory_space<vmem>>, vector<256x12xf32>
    tpu.vector_store %arg13[%c0_40, %c48], %27 {strides = array<i32>} : memref<256x108xf32, #tpu.memory_space<vmem>>, vector<256x12xf32>,
    %c1_41 = arith.constant 1 : index
    %c2_42 = arith.constant 2 : index
    %c0_43 = arith.constant 0 : index
    %29 = vector.load %arg11[%c1_41, %c2_42, %c0_43] : memref<18x18x12xf32, #tpu.memory_space<vmem>>, vector<16x16x12xf32>
    %30 = vector.shape_cast %29 : vector<16x16x12xf32> to vector<256x12xf32>
    %c0_44 = arith.constant 0 : index
    %c60 = arith.constant 60 : index
    %31 = vector.load %arg13[%c0_44, %c60] : memref<256x108xf32, #tpu.memory_space<vmem>>, vector<256x12xf32>
    tpu.vector_store %arg13[%c0_44, %c60], %30 {strides = array<i32>} : memref<256x108xf32, #tpu.memory_space<vmem>>, vector<256x12xf32>,
    %c2_45 = arith.constant 2 : index
    %c0_46 = arith.constant 0 : index
    %c0_47 = arith.constant 0 : index
    %32 = vector.load %arg11[%c2_45, %c0_46, %c0_47] : memref<18x18x12xf32, #tpu.memory_space<vmem>>, vector<16x16x12xf32>
    %33 = vector.shape_cast %32 : vector<16x16x12xf32> to vector<256x12xf32>
    %c0_48 = arith.constant 0 : index
    %c72 = arith.constant 72 : index
    %34 = vector.load %arg13[%c0_48, %c72] : memref<256x108xf32, #tpu.memory_space<vmem>>, vector<256x12xf32>
    tpu.vector_store %arg13[%c0_48, %c72], %33 {strides = array<i32>} : memref<256x108xf32, #tpu.memory_space<vmem>>, vector<256x12xf32>,
    %c2_49 = arith.constant 2 : index
    %c1_50 = arith.constant 1 : index
    %c0_51 = arith.constant 0 : index
    %35 = vector.load %arg11[%c2_49, %c1_50, %c0_51] : memref<18x18x12xf32, #tpu.memory_space<vmem>>, vector<16x16x12xf32>
    %36 = vector.shape_cast %35 : vector<16x16x12xf32> to vector<256x12xf32>
    %c0_52 = arith.constant 0 : index
    %c84 = arith.constant 84 : index
    %37 = vector.load %arg13[%c0_52, %c84] : memref<256x108xf32, #tpu.memory_space<vmem>>, vector<256x12xf32>
    tpu.vector_store %arg13[%c0_52, %c84], %36 {strides = array<i32>} : memref<256x108xf32, #tpu.memory_space<vmem>>, vector<256x12xf32>,
    %c2_53 = arith.constant 2 : index
    %c2_54 = arith.constant 2 : index
    %c0_55 = arith.constant 0 : index
    %38 = vector.load %arg11[%c2_53, %c2_54, %c0_55] : memref<18x18x12xf32, #tpu.memory_space<vmem>>, vector<16x16x12xf32>
    %39 = vector.shape_cast %38 : vector<16x16x12xf32> to vector<256x12xf32>
    %c0_56 = arith.constant 0 : index
    %c96 = arith.constant 96 : index
    %40 = vector.load %arg13[%c0_56, %c96] : memref<256x108xf32, #tpu.memory_space<vmem>>, vector<256x12xf32>
    tpu.vector_store %arg13[%c0_56, %c96], %39 {strides = array<i32>} : memref<256x108xf32, #tpu.memory_space<vmem>>, vector<256x12xf32>,
    %c0_57 = arith.constant 0 : index
    %c0_58 = arith.constant 0 : index
    %41 = vector.load %arg13[%c0_57, %c0_58] : memref<256x108xf32, #tpu.memory_space<vmem>>, vector<256x108xf32>
    %42 = arith.truncf %41 : vector<256x108xf32> to vector<256x108xbf16>
    %c0_59 = arith.constant 0 : index
    %c0_60 = arith.constant 0 : index
    %43 = vector.load %arg4[%c0_59, %c0_60] : memref<108x8xbf16, #tpu.memory_space<vmem>>, vector<108x8xbf16>
    %cst_61 = arith.constant dense<0.000000e+00> : vector<256x8xf32>
    %44 = tpu.matmul %42, %43, %cst_61 {dimension_numbers = #tpu.dot_dimension_numbers<[1], [0], [0], [1], [0, 0, 1, 1], [], []>} : vector<256x108xbf16>, vector<108x8xbf16>, vector<256x8xf32> -> vector<256x8xf32>
    %c0_62 = arith.constant 0 : index
    %c0_63 = arith.constant 0 : index
    %45 = vector.load %arg5[%c0_62, %c0_63] : memref<1x8xf32, #tpu.memory_space<vmem>>, vector<1x8xf32>
    %46 = vector.broadcast %45 : vector<1x8xf32> to vector<256x8xf32>
    %47 = arith.mulf %44, %46 : vector<256x8xf32>
    %c0_64 = arith.constant 0 : index
    %c0_65 = arith.constant 0 : index
    %48 = vector.load %arg6[%c0_64, %c0_65] : memref<1x8xf32, #tpu.memory_space<vmem>>, vector<1x8xf32>
    %49 = vector.broadcast %48 : vector<1x8xf32> to vector<256x8xf32>
    %50 = arith.addf %47, %49 : vector<256x8xf32>
    %cst_66 = arith.constant 0.000000e+00 : f32
    %51 = vector.broadcast %cst_66 : f32 to vector<256x8xf32>
    %52 = arith.maximumf %50, %51 : vector<256x8xf32>
    %53 = vector.shape_cast %52 : vector<256x8xf32> to vector<16x16x8xf32>
    %c1_67 = arith.constant 1 : index
    %c1_68 = arith.constant 1 : index
    %c0_69 = arith.constant 0 : index
    %54 = vector.load %arg12[%c1_67, %c1_68, %c0_69] : memref<18x18x8xf32, #tpu.memory_space<vmem>>, vector<16x16x8xf32>
    tpu.vector_store %arg12[%c1_67, %c1_68, %c0_69], %53 {strides = array<i32>} : memref<18x18x8xf32, #tpu.memory_space<vmem>>, vector<16x16x8xf32>,
    %c0_70 = arith.constant 0 : index
    %c0_71 = arith.constant 0 : index
    %c0_72 = arith.constant 0 : index
    %55 = vector.load %arg12[%c0_70, %c0_71, %c0_72] : memref<18x18x8xf32, #tpu.memory_space<vmem>>, vector<16x16x8xf32>
    %56 = vector.shape_cast %55 : vector<16x16x8xf32> to vector<256x8xf32>
    %c0_73 = arith.constant 0 : index
    %c0_74 = arith.constant 0 : index
    %57 = vector.load %arg14[%c0_73, %c0_74] : memref<256x72xf32, #tpu.memory_space<vmem>>, vector<256x8xf32>
    tpu.vector_store %arg14[%c0_73, %c0_74], %56 {strides = array<i32>} : memref<256x72xf32, #tpu.memory_space<vmem>>, vector<256x8xf32>,
    %c0_75 = arith.constant 0 : index
    %c1_76 = arith.constant 1 : index
    %c0_77 = arith.constant 0 : index
    %58 = vector.load %arg12[%c0_75, %c1_76, %c0_77] : memref<18x18x8xf32, #tpu.memory_space<vmem>>, vector<16x16x8xf32>
    %59 = vector.shape_cast %58 : vector<16x16x8xf32> to vector<256x8xf32>
    %c0_78 = arith.constant 0 : index
    %c8_79 = arith.constant 8 : index
    %60 = vector.load %arg14[%c0_78, %c8_79] : memref<256x72xf32, #tpu.memory_space<vmem>>, vector<256x8xf32>
    tpu.vector_store %arg14[%c0_78, %c8_79], %59 {strides = array<i32>} : memref<256x72xf32, #tpu.memory_space<vmem>>, vector<256x8xf32>,
    %c0_80 = arith.constant 0 : index
    %c2_81 = arith.constant 2 : index
    %c0_82 = arith.constant 0 : index
    %61 = vector.load %arg12[%c0_80, %c2_81, %c0_82] : memref<18x18x8xf32, #tpu.memory_space<vmem>>, vector<16x16x8xf32>
    %62 = vector.shape_cast %61 : vector<16x16x8xf32> to vector<256x8xf32>
    %c0_83 = arith.constant 0 : index
    %c16 = arith.constant 16 : index
    %63 = vector.load %arg14[%c0_83, %c16] : memref<256x72xf32, #tpu.memory_space<vmem>>, vector<256x8xf32>
    tpu.vector_store %arg14[%c0_83, %c16], %62 {strides = array<i32>} : memref<256x72xf32, #tpu.memory_space<vmem>>, vector<256x8xf32>,
    %c1_84 = arith.constant 1 : index
    %c0_85 = arith.constant 0 : index
    %c0_86 = arith.constant 0 : index
    %64 = vector.load %arg12[%c1_84, %c0_85, %c0_86] : memref<18x18x8xf32, #tpu.memory_space<vmem>>, vector<16x16x8xf32>
    %65 = vector.shape_cast %64 : vector<16x16x8xf32> to vector<256x8xf32>
    %c0_87 = arith.constant 0 : index
    %c24_88 = arith.constant 24 : index
    %66 = vector.load %arg14[%c0_87, %c24_88] : memref<256x72xf32, #tpu.memory_space<vmem>>, vector<256x8xf32>
    tpu.vector_store %arg14[%c0_87, %c24_88], %65 {strides = array<i32>} : memref<256x72xf32, #tpu.memory_space<vmem>>, vector<256x8xf32>,
    %c1_89 = arith.constant 1 : index
    %c1_90 = arith.constant 1 : index
    %c0_91 = arith.constant 0 : index
    %67 = vector.load %arg12[%c1_89, %c1_90, %c0_91] : memref<18x18x8xf32, #tpu.memory_space<vmem>>, vector<16x16x8xf32>
    %68 = vector.shape_cast %67 : vector<16x16x8xf32> to vector<256x8xf32>
    %c0_92 = arith.constant 0 : index
    %c32 = arith.constant 32 : index
    %69 = vector.load %arg14[%c0_92, %c32] : memref<256x72xf32, #tpu.memory_space<vmem>>, vector<256x8xf32>
    tpu.vector_store %arg14[%c0_92, %c32], %68 {strides = array<i32>} : memref<256x72xf32, #tpu.memory_space<vmem>>, vector<256x8xf32>,
    %c1_93 = arith.constant 1 : index
    %c2_94 = arith.constant 2 : index
    %c0_95 = arith.constant 0 : index
    %70 = vector.load %arg12[%c1_93, %c2_94, %c0_95] : memref<18x18x8xf32, #tpu.memory_space<vmem>>, vector<16x16x8xf32>
    %71 = vector.shape_cast %70 : vector<16x16x8xf32> to vector<256x8xf32>
    %c0_96 = arith.constant 0 : index
    %c40 = arith.constant 40 : index
    %72 = vector.load %arg14[%c0_96, %c40] : memref<256x72xf32, #tpu.memory_space<vmem>>, vector<256x8xf32>
    tpu.vector_store %arg14[%c0_96, %c40], %71 {strides = array<i32>} : memref<256x72xf32, #tpu.memory_space<vmem>>, vector<256x8xf32>,
    %c2_97 = arith.constant 2 : index
    %c0_98 = arith.constant 0 : index
    %c0_99 = arith.constant 0 : index
    %73 = vector.load %arg12[%c2_97, %c0_98, %c0_99] : memref<18x18x8xf32, #tpu.memory_space<vmem>>, vector<16x16x8xf32>
    %74 = vector.shape_cast %73 : vector<16x16x8xf32> to vector<256x8xf32>
    %c0_100 = arith.constant 0 : index
    %c48_101 = arith.constant 48 : index
    %75 = vector.load %arg14[%c0_100, %c48_101] : memref<256x72xf32, #tpu.memory_space<vmem>>, vector<256x8xf32>
    tpu.vector_store %arg14[%c0_100, %c48_101], %74 {strides = array<i32>} : memref<256x72xf32, #tpu.memory_space<vmem>>, vector<256x8xf32>,
    %c2_102 = arith.constant 2 : index
    %c1_103 = arith.constant 1 : index
    %c0_104 = arith.constant 0 : index
    %76 = vector.load %arg12[%c2_102, %c1_103, %c0_104] : memref<18x18x8xf32, #tpu.memory_space<vmem>>, vector<16x16x8xf32>
    %77 = vector.shape_cast %76 : vector<16x16x8xf32> to vector<256x8xf32>
    %c0_105 = arith.constant 0 : index
    %c56 = arith.constant 56 : index
    %78 = vector.load %arg14[%c0_105, %c56] : memref<256x72xf32, #tpu.memory_space<vmem>>, vector<256x8xf32>
    tpu.vector_store %arg14[%c0_105, %c56], %77 {strides = array<i32>} : memref<256x72xf32, #tpu.memory_space<vmem>>, vector<256x8xf32>,
    %c2_106 = arith.constant 2 : index
    %c2_107 = arith.constant 2 : index
    %c0_108 = arith.constant 0 : index
    %79 = vector.load %arg12[%c2_106, %c2_107, %c0_108] : memref<18x18x8xf32, #tpu.memory_space<vmem>>, vector<16x16x8xf32>
    %80 = vector.shape_cast %79 : vector<16x16x8xf32> to vector<256x8xf32>
    %c0_109 = arith.constant 0 : index
    %c64 = arith.constant 64 : index
    %81 = vector.load %arg14[%c0_109, %c64] : memref<256x72xf32, #tpu.memory_space<vmem>>, vector<256x8xf32>
    tpu.vector_store %arg14[%c0_109, %c64], %80 {strides = array<i32>} : memref<256x72xf32, #tpu.memory_space<vmem>>, vector<256x8xf32>,
    %c0_110 = arith.constant 0 : index
    %c0_111 = arith.constant 0 : index
    %82 = vector.load %arg14[%c0_110, %c0_111] : memref<256x72xf32, #tpu.memory_space<vmem>>, vector<256x72xf32>
    %83 = arith.truncf %82 : vector<256x72xf32> to vector<256x72xbf16>
    %c0_112 = arith.constant 0 : index
    %c0_113 = arith.constant 0 : index
    %84 = vector.load %arg7[%c0_112, %c0_113] : memref<72x8xbf16, #tpu.memory_space<vmem>>, vector<72x8xbf16>
    %cst_114 = arith.constant dense<0.000000e+00> : vector<256x8xf32>
    %85 = tpu.matmul %83, %84, %cst_114 {dimension_numbers = #tpu.dot_dimension_numbers<[1], [0], [0], [1], [0, 0, 1, 1], [], []>} : vector<256x72xbf16>, vector<72x8xbf16>, vector<256x8xf32> -> vector<256x8xf32>
    %c0_115 = arith.constant 0 : index
    %c0_116 = arith.constant 0 : index
    %86 = vector.load %arg8[%c0_115, %c0_116] : memref<1x8xf32, #tpu.memory_space<vmem>>, vector<1x8xf32>
    %87 = vector.broadcast %86 : vector<1x8xf32> to vector<256x8xf32>
    %88 = arith.mulf %85, %87 : vector<256x8xf32>
    %c0_117 = arith.constant 0 : index
    %c0_118 = arith.constant 0 : index
    %89 = vector.load %arg9[%c0_117, %c0_118] : memref<1x8xf32, #tpu.memory_space<vmem>>, vector<1x8xf32>
    %90 = vector.broadcast %89 : vector<1x8xf32> to vector<256x8xf32>
    %91 = arith.addf %88, %90 : vector<256x8xf32>
    %cst_119 = arith.constant 0.000000e+00 : f32
    %92 = vector.broadcast %cst_119 : f32 to vector<256x8xf32>
    %93 = arith.maximumf %91, %92 : vector<256x8xf32>
    %94 = vector.shape_cast %93 : vector<256x8xf32> to vector<16x16x8xf32>
    %c0_120 = arith.constant 0 : index
    %c0_121 = arith.constant 0 : index
    %c0_122 = arith.constant 0 : index
    %c0_123 = arith.constant 0 : index
    %95 = vector.load %arg10[%c0_120, %c0_121, %c0_122, %c0_123] : memref<1x16x16x8xf32, #tpu.memory_space<vmem>>, vector<1x16x16x8xf32>
    %96 = vector.shape_cast %95 : vector<1x16x16x8xf32> to vector<16x16x8xf32>
    %97 = vector.shape_cast %94 : vector<16x16x8xf32> to vector<1x16x16x8xf32>
    tpu.vector_store %arg10[%c0_120, %c0_121, %c0_122, %c0_123], %97 {strides = array<i32>} : memref<1x16x16x8xf32, #tpu.memory_space<vmem>>, vector<1x16x16x8xf32>,
    return
  }
  func.func @transform_0(%arg0: i32) -> (i32, i32, i32, i32) {
    %c0_i32 = arith.constant 0 : i32
    %c0_i32_0 = arith.constant 0 : i32
    %c0_i32_1 = arith.constant 0 : i32
    %c0_i32_2 = arith.constant 0 : i32
    return %arg0, %c0_i32, %c0_i32_0, %c0_i32_1 : i32, i32, i32, i32
  }
  func.func @transform_1(%arg0: i32) -> (i32, i32, i32, i32) {
    %c0_i32 = arith.constant 0 : i32
    %c0_i32_0 = arith.constant 0 : i32
    %c0_i32_1 = arith.constant 0 : i32
    %c0_i32_2 = arith.constant 0 : i32
    return %arg0, %c0_i32, %c0_i32_0, %c0_i32_1 : i32, i32, i32, i32
  }
  func.func @transform_2(%arg0: i32) -> (i32, i32) {
    %c0_i32 = arith.constant 0 : i32
    %c0_i32_0 = arith.constant 0 : i32
    %c0_i32_1 = arith.constant 0 : i32
    return %c0_i32, %c0_i32_0 : i32, i32
  }
  func.func @transform_3(%arg0: i32) -> (i32, i32) {
    %c0_i32 = arith.constant 0 : i32
    %c0_i32_0 = arith.constant 0 : i32
    %c0_i32_1 = arith.constant 0 : i32
    return %c0_i32, %c0_i32_0 : i32, i32
  }
  func.func @transform_4(%arg0: i32) -> (i32, i32) {
    %c0_i32 = arith.constant 0 : i32
    %c0_i32_0 = arith.constant 0 : i32
    %c0_i32_1 = arith.constant 0 : i32
    return %c0_i32, %c0_i32_0 : i32, i32
  }
  func.func @transform_5(%arg0: i32) -> (i32, i32) {
    %c0_i32 = arith.constant 0 : i32
    %c0_i32_0 = arith.constant 0 : i32
    %c0_i32_1 = arith.constant 0 : i32
    return %c0_i32, %c0_i32_0 : i32, i32
  }
  func.func @transform_6(%arg0: i32) -> (i32, i32) {
    %c0_i32 = arith.constant 0 : i32
    %c0_i32_0 = arith.constant 0 : i32
    %c0_i32_1 = arith.constant 0 : i32
    return %c0_i32, %c0_i32_0 : i32, i32
  }
  func.func @transform_7(%arg0: i32) -> (i32, i32) {
    %c0_i32 = arith.constant 0 : i32
    %c0_i32_0 = arith.constant 0 : i32
    %c0_i32_1 = arith.constant 0 : i32
    return %c0_i32, %c0_i32_0 : i32, i32
  }
  func.func @transform_8(%arg0: i32) -> (i32, i32) {
    %c0_i32 = arith.constant 0 : i32
    %c0_i32_0 = arith.constant 0 : i32
    %c0_i32_1 = arith.constant 0 : i32
    return %c0_i32, %c0_i32_0 : i32, i32
  }
  func.func @transform_9(%arg0: i32) -> (i32, i32, i32, i32) {
    %c0_i32 = arith.constant 0 : i32
    %c0_i32_0 = arith.constant 0 : i32
    %c0_i32_1 = arith.constant 0 : i32
    %c0_i32_2 = arith.constant 0 : i32
    return %arg0, %c0_i32, %c0_i32_0, %c0_i32_1 : i32, i32, i32, i32
  }
}

</mosaic_0001>

<bundles_post_ra>
// kernel: decoder_block_forward.1
= control target key start
LH: loop header
LB: loop body
LE: loop exit
PB: predicated region body
PF: predicated region fallthrough
CT: control target
= control target key end

     0   :  { %s5705_s30 = smov 0   ;;  %s8339_s0 = inlined_call_operand.vmem [shape: f32[2,8,8,8], index: 0, kind: input, shape index: {}]   ;;  %s8340_s1 = inlined_call_operand.vmem [shape: f32[2,16,16,4], index: 1, kind: input, shape index: {}]   ;;  %s8341_s2 = inlined_call_operand.vmem [shape: f32[256,64], index: 2, kind: input, shape index: {}]   ;;  %s8342_s3 = inlined_call_operand.vmem [shape: bf16[108,8], index: 3, kind: input, shape index: {}]   ;;  %s8343_s4 = inlined_call_operand.vmem [shape: f32[1,8], index: 4, kind: input, shape index: {}]   ;;  %s8344_s5 = inlined_call_operand.vmem [shape: f32[1,8], index: 5, kind: input, shape index: {}]   ;;  %s8345_s6 = inlined_call_operand.vmem [shape: bf16[72,8], index: 6, kind: input, shape index: {}]   ;;  %s8346_s7 = inlined_call_operand.vmem [shape: f32[1,8], index: 7, kind: input, shape index: {}]   ;;  %s8347_s8 = inlined_call_operand.vmem [shape: f32[1,8], index: 8, kind: input, shape index: {}]   ;;  %s8348_s9 = inlined_call_operand.vmem [shape: f32[2,16,16,8], index: 9, kind: output, shape index: {}]  }
   0x1 LB: > { %s5239_s10 = sadd.s32 4294967295, %s5638_s30   ;;  %p5243_p0 = scmp.ge.s32.totalorder %s5638_s30, 1  ;;  %s5638_s30 = sphi %s5705_s30, %s19_s30  }
   0x2   : > { %p297_p1 = scmp.lt.s32.totalorder %s5638_s30, 3 }
   0x4   : > { %p298_p2 = pnand %p5243_p0, %p297_p1 }
   0x6   : > { %301 = sbr.rel (%p298_p2) target bundleno = 1882 (0x75a), region = 56 }
   0xd   : > { %p338_p3 = scmp.lt.s32.totalorder %s5239_s10, 1  ;;  %v474_v0 = vld [vmem:[%s8341_s2] sm:$0xff]  ;;  %vm506_vm0 = vcmask 523264   ;;  %s5640_s23 = smov 8   ;;  %v5756_v22 = vld [vmem:[%s8341_s2 + $0x8] sm:$0xff]  ;;  %vm354_vm1 = vcmask 97280  }
   0xe   : > { %v490_v1 = vld [vmem:[%s8341_s2 + $0x80] sm:$0xff]  ;;  %5435 = vmatprep.mubr.msk.f32.mxu0 %vm506_vm0, %v474_v0  ;;  %v5761_v23 = vld [vmem:[%s8341_s2 + $0x88] sm:$0xff]  ;;  %vm357_vm2 = vcmask 91136   ;;  %v5766_v24 = vld [vmem:[%s8341_s2 + $0x10] sm:$0xff]  ;;  %v8349_v26 = vmov 0.0   ;;  %vm410_vm3 = vcmask 64512  }
   0xf   : > { %5459 = vmatprep.mubr.msk.f32.mxu1 %vm506_vm0, %v490_v1  ;;  %s8374_s10 = smov (!%p338_p3, %s5239_s10), 1  ;;  %v5771_v25 = vld [vmem:[%s8341_s2 + $0x90] sm:$0xff]  ;;  %360 = vst.msk [vmem:[#allocation2 + $0x20] sm:$0xff] %vm354_vm1, %v8349_v26  ;;  %355 = vst.msk [vmem:[#allocation2] sm:$0xff] %vm354_vm1, %v8349_v26  ;;  %v477_v27 = vld [vmem:[%s8341_s2 + $0x18] sm:$0xff]  ;;  %s5642_s18 = smov 12  }
  0x10   : > { %s5332_s15 = sshll.u32 %s8374_s10, 6  ;;  %s5333_s16 = sshll.u32 %s8374_s10, 8  ;;  %361 = vst.msk [vmem:[#allocation2 + $0x28] sm:$0x3] %vm357_vm2, %v8349_v26  ;;  %358 = vst.msk [vmem:[#allocation2 + $0x10] sm:$0x3] %vm357_vm2, %v8349_v26 }
  0x11   : > { %s342_s19 = scalar_lea.vmem %s8339_s0, %s5332_s15  ;;  %s5733_s22 = scalar_lea.vmem %s8340_s1, %s5333_s16  ;;  %356 = vst.msk [vmem:[#allocation2 + $0x8] sm:$0xff] %vm354_vm1, %v8349_v26  ;;  %359 = vst.msk [vmem:[#allocation2 + $0x18] sm:$0xff] %vm354_vm1, %v8349_v26  ;;  %v493_v28 = vld [vmem:[%s8341_s2 + $0x98] sm:$0xff]  ;;  %v478_v30 = vld [vmem:[%s8341_s2 + $0x20] sm:$0xff]  ;;  %vm1278_vm4 = vcmask 195680   ;;  %vm1471_vm5 = vcmask 294080  }
  0x12   : > { %v466_v2 = vld [vmem:[%s342_s19] sm:$0xff]  ;;  %v467_v3 = vld [vmem:[%s342_s19 + $0x8] sm:$0xff]  ;;  %v468_v4 = vld [vmem:[%s342_s19 + $0x10] sm:$0xff]  ;;  %362 = vst.msk [vmem:[#allocation2 + $0x30] sm:$0xff] %vm354_vm1, %v8349_v26  ;;  %vm1021_vm6 = vcmask 97344   ;;  %s5645_s20 = smov 36   ;;  %s8163_s13 = scalar_lea.vmem %s8348_s9, %s5333_s16 }
  0x13   : > { %v5571_v5 = vpack.c.bf16 %v467_v3, %v466_v2  ;;  %v469_v6 = vld [vmem:[%s342_s19 + $0x18] sm:$0xff]  ;;  %v470_v8 = vld [vmem:[%s342_s19 + $0x20] sm:$0xff]  ;;  %v471_v9 = vld [vmem:[%s342_s19 + $0x28] sm:$0xff]  ;;  %363 = vst.msk [vmem:[#allocation2 + $0x38] sm:$0xff] %vm354_vm1, %v8349_v26  ;;  %vm1664_vm7 = vcmask 392480   ;;  %vm1857_vm8 = vcmask 490880  }
  0x14   : > { %v5575_v7 = vpack.c.bf16 %v469_v6, %v468_v4  ;;  %v863_v10 = vld [vmem:[%s5733_s22 + $0x10] sm:$0xff]  ;;  %v861_v11 = vld [vmem:[%s5733_s22] sm:$0xff]  ;;  %v5579_v12 = vpack.c.bf16 %v471_v9, %v470_v8  ;;  %v473_v14 = vld [vmem:[%s342_s19 + $0x38] sm:$0xff]  ;;  %364 = vst.msk [vmem:[#allocation2 + $0x40] sm:$0x3] %vm357_vm2, %v8349_v26  ;;  %s5646_s21 = smov 60  }
  0x15   : > { %5572 = vmatprep.subr.bf16.mxu0 %v5571_v5  ;;  %5587 = vmatprep.subr.bf16.mxu1 %v5571_v5  ;;  %v472_v13 = vld [vmem:[%s342_s19 + $0x30] sm:$0xff]  ;;  %v864_v15 = vld [vmem:[%s5733_s22 + $0x18] sm:$0xff]  ;;  %v862_v16 = vld [vmem:[%s5733_s22 + $0x8] sm:$0xff]  ;;  %365 = vst.msk [vmem:[#allocation2 + $0x48] sm:$0xff] %vm354_vm1, %v8349_v26  ;;  %s5643_s19 = smov 24   ;;  %s5647_s24 = smov 72  }
  0x16   : > { %5574 = vmatpush3.bf16.msra.mxu0 %v5571_v5  ;;  %5591 = vmatpush3.bf16.msra.mxu1 %v5571_v5  ;;  %v5583_v17 = vpack.c.bf16 %v473_v14, %v472_v13  ;;  %v866_v18 = vld [vmem:[%s5733_s22 + $0x28] sm:$0xff]  ;;  %v865_v19 = vld [vmem:[%s5733_s22 + $0x20] sm:$0xff]  ;;  %v5748_v20 = vld [vmem:[%s5733_s22 + $0x38] sm:$0xff]  ;;  %366 = vst.msk [vmem:[#allocation2 + $0x50] sm:$0xff] %vm354_vm1, %v8349_v26  ;;  %s5648_s14 = smov 84   ;;  %vm2050_vm9 = vcmask 589280  }
  0x17   : > { %5576 = vmatprep.subr.bf16.mxu0 %v5575_v7  ;;  %5588 = vmatprep.subr.bf16.mxu1 %v5575_v7  ;;  %v5751_v21 = vld [vmem:[%s5733_s22 + $0x30] sm:$0xff]  ;;  %367 = vst.msk [vmem:[#allocation2 + $0x58] sm:$0x3] %vm357_vm2, %v8349_v26  ;;  %370 = vst.msk [vmem:[#allocation2 + $0x70] sm:$0x3] %vm357_vm2, %v8349_v26  ;;  %v870_v29 = vld [vmem:[%s5733_s22 + $0x48] sm:$0xff] }
  0x18   : > { %929 = vrot.lane.b32.xlu1 %v863_v10, %s5640_s23  ;;  %925 = vrot.lane.b32.xlu0 %v861_v11, %s5640_s23  ;;  %368 = vst.msk [vmem:[#allocation2 + $0x60] sm:$0xff] %vm354_vm1, %v8349_v26  ;;  %369 = vst.msk [vmem:[#allocation2 + $0x68] sm:$0xff] %vm354_vm1, %v8349_v26  ;;  %v494_v31 = vld [vmem:[%s8341_s2 + $0xa0] sm:$0xff]  ;;  %v872_v33 = vld [vmem:[%s5733_s22 + $0x58] sm:$0xff]  ;;  %vm2815_vm10 = vcmask 1045504   ;;  %vm2244_vm11 = vcmask 687680  }
  0x19   : > { %371 = vst.msk [vmem:[#allocation2 + $0x78] sm:$0xff] %vm354_vm1, %v8349_v26  ;;  %372 = vst.msk [vmem:[#allocation2 + $0x80] sm:$0xff] %vm354_vm1, %v8349_v26  ;;  %v869_v32 = vld [vmem:[%s5733_s22 + $0x40] sm:$0xff]  ;;  %v871_v34 = vld [vmem:[%s5733_s22 + $0x50] sm:$0xff]  ;;  %vm2437_vm12 = vcmask 786080   ;;  %vm2630_vm13 = vcmask 884480  }
  0x1a   : > { %5578 = vmatpush3.bf16.msra.mxu0 %v5575_v7  ;;  %5592 = vmatpush3.bf16.msra.mxu1 %v5575_v7  ;;  %373 = vst.msk [vmem:[#allocation2 + $0x88] sm:$0x3] %vm357_vm2, %v8349_v26  ;;  %376 = vst.msk [vmem:[#allocation2 + $0xa0] sm:$0x3] %vm357_vm2, %v8349_v26  ;;  %v479_v35 = vld [vmem:[%s8341_s2 + $0x28] sm:$0xff]  ;;  %v480_v37 = vld [vmem:[%s8341_s2 + $0x30] sm:$0xff] }
  0x1b   : > { %5580 = vmatprep.subr.bf16.mxu0 %v5579_v12  ;;  %5589 = vmatprep.subr.bf16.mxu1 %v5579_v12  ;;  %374 = vst.msk [vmem:[#allocation2 + $0x90] sm:$0xff] %vm354_vm1, %v8349_v26  ;;  %375 = vst.msk [vmem:[#allocation2 + $0x98] sm:$0xff] %vm354_vm1, %v8349_v26  ;;  %v495_v36 = vld [vmem:[%s8341_s2 + $0xa8] sm:$0xff]  ;;  %v496_v38 = vld [vmem:[%s8341_s2 + $0xb0] sm:$0xff]  ;;  %vm2766_vm14 = vcmask 883712   ;;  %vm413_vm15 = vcmask 58368  }
  0x1c   : > { %931 = vrot.lane.b32.xlu1 %v864_v15, %s5640_s23  ;;  %927 = vrot.lane.b32.xlu0 %v862_v16, %s5640_s23  ;;  %377 = vst.msk [vmem:[#allocation2 + $0xa8] sm:$0xff] %vm354_vm1, %v8349_v26  ;;  %378 = vst.msk [vmem:[#allocation2 + $0xb0] sm:$0xff] %vm354_vm1, %v8349_v26  ;;  %v874_v39 = vld [vmem:[%s5733_s22 + $0x68] sm:$0xff]  ;;  %v873_v40 = vld [vmem:[%s5733_s22 + $0x60] sm:$0xff]  ;;  %s5652_s12 = smov 40   ;;  %s5654_s28 = smov 64  }
  0x1d   : > { %379 = vst.msk [vmem:[#allocation2 + $0xb8] sm:$0x3] %vm357_vm2, %v8349_v26  ;;  %382 = vst.msk [vmem:[#allocation2 + $0xd0] sm:$0x3] %vm357_vm2, %v8349_v26  ;;  %v481_v41 = vld [vmem:[%s8341_s2 + $0x38] sm:$0xff]  ;;  %v482_v43 = vld [vmem:[%s8341_s2 + $0x40] sm:$0xff] }
  0x1e   : > { %5582 = vmatpush3.bf16.msra.mxu0 %v5579_v12  ;;  %5593 = vmatpush3.bf16.msra.mxu1 %v5579_v12  ;;  %380 = vst.msk [vmem:[#allocation2 + $0xc0] sm:$0xff] %vm354_vm1, %v8349_v26  ;;  %381 = vst.msk [vmem:[#allocation2 + $0xc8] sm:$0xff] %vm354_vm1, %v8349_v26  ;;  %v497_v42 = vld [vmem:[%s8341_s2 + $0xb8] sm:$0xff]  ;;  %v498_v44 = vld [vmem:[%s8341_s2 + $0xc0] sm:$0xff] }
  0x1f   : > { %5584 = vmatprep.subr.bf16.mxu0 %v5583_v17  ;;  %5590 = vmatprep.subr.bf16.mxu1 %v5583_v17  ;;  %383 = vst.msk [vmem:[#allocation2 + $0xd8] sm:$0xff] %vm354_vm1, %v8349_v26  ;;  %384 = vst.msk [vmem:[#allocation2 + $0xe0] sm:$0xff] %vm354_vm1, %v8349_v26  ;;  %v876_v45 = vld [vmem:[%s5733_s22 + $0x78] sm:$0xff]  ;;  %v875_v46 = vld [vmem:[%s5733_s22 + $0x70] sm:$0xff] }
  0x20   : > { %935 = vrot.lane.b32.xlu1 %v866_v18, %s5640_s23  ;;  %933 = vrot.lane.b32.xlu0 %v865_v19, %s5640_s23  ;;  %385 = vst.msk [vmem:[#allocation2 + $0xe8] sm:$0x3] %vm357_vm2, %v8349_v26  ;;  %388 = vst.msk [vmem:[#allocation2 + $0x100] sm:$0x3] %vm357_vm2, %v8349_v26  ;;  %v483_v47 = vld [vmem:[%s8341_s2 + $0x48] sm:$0xff]  ;;  %v484_v49 = vld [vmem:[%s8341_s2 + $0x50] sm:$0xff] }
  0x21   : > { %386 = vst.msk [vmem:[#allocation2 + $0xf0] sm:$0xff] %vm354_vm1, %v8349_v26  ;;  %387 = vst.msk [vmem:[#allocation2 + $0xf8] sm:$0xff] %vm354_vm1, %v8349_v26  ;;  %v499_v48 = vld [vmem:[%s8341_s2 + $0xc8] sm:$0xff]  ;;  %v500_v50 = vld [vmem:[%s8341_s2 + $0xd0] sm:$0xff] }
  0x22   : > { %5586 = vmatpush3.bf16.msra.mxu0 %v5583_v17  ;;  %5594 = vmatpush3.bf16.msra.mxu1 %v5583_v17  ;;  %389 = vst.msk [vmem:[#allocation2 + $0x108] sm:$0xff] %vm354_vm1, %v8349_v26  ;;  %390 = vst.msk [vmem:[#allocation2 + $0x110] sm:$0xff] %vm354_vm1, %v8349_v26  ;;  %v878_v51 = vld [vmem:[%s5733_s22 + $0x88] sm:$0xff]  ;;  %v877_v52 = vld [vmem:[%s5733_s22 + $0x80] sm:$0xff] }
  0x23   : > { %391 = vst.msk [vmem:[#allocation2 + $0x118] sm:$0x3] %vm357_vm2, %v8349_v26  ;;  %394 = vst.msk [vmem:[#allocation2 + $0x130] sm:$0x3] %vm357_vm2, %v8349_v26  ;;  %v485_v53 = vld [vmem:[%s8341_s2 + $0x58] sm:$0xff]  ;;  %v486_v55 = vld [vmem:[%s8341_s2 + $0x60] sm:$0xff] }
  0x24   : > { %392 = vst.msk [vmem:[#allocation2 + $0x120] sm:$0xff] %vm354_vm1, %v8349_v26  ;;  %393 = vst.msk [vmem:[#allocation2 + $0x128] sm:$0xff] %vm354_vm1, %v8349_v26  ;;  %939 = vrot.lane.b32.xlu1 %v5748_v20, %s5640_s23  ;;  %937 = vrot.lane.b32.xlu0 %v5751_v21, %s5640_s23  ;;  %v501_v54 = vld [vmem:[%s8341_s2 + $0xd8] sm:$0xff]  ;;  %v502_v56 = vld [vmem:[%s8341_s2 + $0xe0] sm:$0xff] }
  0x25   : > { %395 = vst.msk [vmem:[#allocation2 + $0x138] sm:$0xff] %vm354_vm1, %v8349_v26  ;;  %396 = vst.msk [vmem:[#allocation2 + $0x140] sm:$0xff] %vm354_vm1, %v8349_v26  ;;  %5436 = vmatmul.mubr.msk.f32.vlgmr.msra.gmra.mrb[0].mxu0 %vm506_vm0, %v5756_v22  ;;  %5460 = vmatmul.mubr.msk.f32.vlgmr.msra.gmra.mrb[0].mxu1 %vm506_vm0, %v5761_v23  ;;  %v880_v57 = vld [vmem:[%s5733_s22 + $0x98] sm:$0xff]  ;;  %v879_v58 = vld [vmem:[%s5733_s22 + $0x90] sm:$0xff] }
  0x26   : > { %397 = vst.msk [vmem:[#allocation2 + $0x148] sm:$0x3] %vm357_vm2, %v8349_v26  ;;  %400 = vst.msk [vmem:[#allocation2 + $0x160] sm:$0x3] %vm357_vm2, %v8349_v26  ;;  %5438 = vmatprep.mubr.msk.f32.mxu0 %vm506_vm0, %v5766_v24  ;;  %5462 = vmatprep.mubr.msk.f32.mxu1 %vm506_vm0, %v5771_v25  ;;  %v487_v59 = vld [vmem:[%s8341_s2 + $0x68] sm:$0xff]  ;;  %v488_v61 = vld [vmem:[%s8341_s2 + $0x70] sm:$0xff] }
  0x27   : > { %398 = vst.msk [vmem:[#allocation2 + $0x150] sm:$0xff] %vm354_vm1, %v8349_v26  ;;  %399 = vst.msk [vmem:[#allocation2 + $0x158] sm:$0xff] %vm354_vm1, %v8349_v26  ;;  %v503_v60 = vld [vmem:[%s8341_s2 + $0xe8] sm:$0xff]  ;;  %v504_v62 = vld [vmem:[%s8341_s2 + $0xf0] sm:$0xff] }
  0x28   : > { %401 = vst.msk [vmem:[#allocation2 + $0x168] sm:$0xff] %vm354_vm1, %v8349_v26  ;;  %402 = vst.msk [vmem:[#allocation2 + $0x170] sm:$0xff] %vm354_vm1, %v8349_v26  ;;  %943 = vrot.lane.b32.xlu1 %v870_v29, %s5640_s23  ;;  %941 = vrot.lane.b32.xlu0 %v869_v32, %s5640_s23  ;;  %v882_v63 = vld [vmem:[%s5733_s22 + $0xa8] sm:$0xff]  ;;  %v881_v0 = vld [vmem:[%s5733_s22 + $0xa0] sm:$0xff] }
  0x29   : > { %403 = vst.msk [vmem:[#allocation2 + $0x178] sm:$0x3] %vm357_vm2, %v8349_v26  ;;  %406 = vst.msk [vmem:[#allocation2 + $0x190] sm:$0x3] %vm357_vm2, %v8349_v26  ;;  %5439 = vmatmul.mubr.msk.f32.gmra.mrb[2].mxu0 %vm506_vm0, %v477_v27  ;;  %5463 = vmatmul.mubr.msk.f32.gmra.mrb[2].mxu1 %vm506_vm0, %v493_v28  ;;  %v489_v1 = vld [vmem:[%s8341_s2 + $0x78] sm:$0xff]  ;;  %v883_v4 = vld [vmem:[%s5733_s22 + $0xb0] sm:$0xff] }
  0x2a   : > { %404 = vst.msk [vmem:[#allocation2 + $0x180] sm:$0xff] %vm354_vm1, %v8349_v26  ;;  %405 = vst.msk [vmem:[#allocation2 + $0x188] sm:$0xff] %vm354_vm1, %v8349_v26  ;;  %5441 = vmatprep.mubr.msk.f32.mxu0 %vm506_vm0, %v478_v30  ;;  %5465 = vmatprep.mubr.msk.f32.mxu1 %vm506_vm0, %v494_v31  ;;  %v505_v2 = vld [vmem:[%s8341_s2 + $0xf8] sm:$0xff]  ;;  %v886_v5 = vld [vmem:[%s5733_s22 + $0xc8] sm:$0xff] }
  0x2b   : > { %407 = vst.msk [vmem:[#allocation2 + $0x198] sm:$0xff] %vm354_vm1, %v8349_v26  ;;  %408 = vst.msk [vmem:[#allocation2 + $0x1a0] sm:$0xff] %vm354_vm1, %v8349_v26  ;;  %v884_v3 = vld [vmem:[%s5733_s22 + $0xb8] sm:$0xff]  ;;  %v885_v6 = vld [vmem:[%s5733_s22 + $0xc0] sm:$0xff] }
  0x2c   : > { %409 = vst.msk [vmem:[#allocation2 + $0x1a8] sm:$0x3] %vm357_vm2, %v8349_v26  ;;  %947 = vrot.lane.b32.xlu1 %v872_v33, %s5640_s23  ;;  %945 = vrot.lane.b32.xlu0 %v871_v34, %s5640_s23  ;;  %v888_v7 = vld [vmem:[%s5733_s22 + $0xd8] sm:$0xff]  ;;  %v887_v8 = vld [vmem:[%s5733_s22 + $0xd0] sm:$0xff]  ;;  %v1118_v14 = vld [vmem:[#allocation2 + $0x1] sm:$0xff]  ;;  %vm4865_vm2 = vcmask 1043456  }
  0x2d   : > { %411 = vst.msk [vmem:[#allocation3] sm:$0xff] %vm410_vm3, %v8349_v26  ;;  %412 = vst.msk [vmem:[#allocation3 + $0x8] sm:$0xff] %vm410_vm3, %v8349_v26  ;;  %5442 = vmatmul.mubr.msk.f32.gmra.mrb[4].mxu0 %vm506_vm0, %v479_v35  ;;  %5466 = vmatmul.mubr.msk.f32.gmra.mrb[4].mxu1 %vm506_vm0, %v495_v36  ;;  %v890_v9 = vld [vmem:[%s5733_s22 + $0xe8] sm:$0xff]  ;;  %v889_v10 = vld [vmem:[%s5733_s22 + $0xe0] sm:$0xff] }
  0x2e   : > { %415 = vst.msk [vmem:[#allocation3 + $0x18] sm:$0xff] %vm410_vm3, %v8349_v26  ;;  %416 = vst.msk [vmem:[#allocation3 + $0x20] sm:$0xff] %vm410_vm3, %v8349_v26  ;;  %5444 = vmatprep.mubr.msk.f32.mxu0 %vm506_vm0, %v480_v37  ;;  %5468 = vmatprep.mubr.msk.f32.mxu1 %vm506_vm0, %v496_v38  ;;  %v892_v11 = vld [vmem:[%s5733_s22 + $0xf8] sm:$0xff]  ;;  %v891_v12 = vld [vmem:[%s5733_s22 + $0xf0] sm:$0xff]  ;;  %s5644_s22 = smov 48  }
  0x2f   : > { %418 = vst.msk [vmem:[#allocation3 + $0x30] sm:$0xff] %vm410_vm3, %v8349_v26  ;;  %419 = vst.msk [vmem:[#allocation3 + $0x38] sm:$0xff] %vm410_vm3, %v8349_v26  ;;  %v1119_v13 = vld [vmem:[#allocation2 + $0x9] sm:$0xff] }
  0x30   : > { %421 = vst.msk [vmem:[#allocation3 + $0x48] sm:$0xff] %vm410_vm3, %v8349_v26  ;;  %422 = vst.msk [vmem:[#allocation3 + $0x50] sm:$0xff] %vm410_vm3, %v8349_v26  ;;  %951 = vrot.lane.b32.xlu1 %v874_v39, %s5640_s23  ;;  %949 = vrot.lane.b32.xlu0 %v873_v40, %s5640_s23  ;;  %v1312_v15 = vld [vmem:[#allocation2 + $0xa] sm:$0xff]  ;;  %v1311_v16 = vld [vmem:[#allocation2 + $0x2] sm:$0xff] }
  0x31   : > { %424 = vst.msk [vmem:[#allocation3 + $0x60] sm:$0xff] %vm410_vm3, %v8349_v26  ;;  %425 = vst.msk [vmem:[#allocation3 + $0x68] sm:$0xff] %vm410_vm3, %v8349_v26  ;;  %5445 = vmatmul.mubr.msk.f32.gmra.mrb[6].mxu0 %vm506_vm0, %v481_v41  ;;  %5469 = vmatmul.mubr.msk.f32.gmra.mrb[6].mxu1 %vm506_vm0, %v497_v42 }
  0x32   : > { %427 = vst.msk [vmem:[#allocation3 + $0x78] sm:$0xff] %vm410_vm3, %v8349_v26  ;;  %428 = vst.msk [vmem:[#allocation3 + $0x80] sm:$0xff] %vm410_vm3, %v8349_v26  ;;  %5447 = vmatprep.mubr.msk.f32.mxu0 %vm506_vm0, %v482_v43  ;;  %5471 = vmatprep.mubr.msk.f32.mxu1 %vm506_vm0, %v498_v44 }
  0x33   : > { %430 = vst.msk [vmem:[#allocation3 + $0x90] sm:$0xff] %vm410_vm3, %v8349_v26  ;;  %431 = vst.msk [vmem:[#allocation3 + $0x98] sm:$0xff] %vm410_vm3, %v8349_v26 }
  0x34   : > { %433 = vst.msk [vmem:[#allocation3 + $0xa8] sm:$0xff] %vm410_vm3, %v8349_v26  ;;  %434 = vst.msk [vmem:[#allocation3 + $0xb0] sm:$0xff] %vm410_vm3, %v8349_v26  ;;  %955 = vrot.lane.b32.xlu1 %v876_v45, %s5640_s23  ;;  %953 = vrot.lane.b32.xlu0 %v875_v46, %s5640_s23 }
  0x35   : > { %436 = vst.msk [vmem:[#allocation3 + $0xc0] sm:$0xff] %vm410_vm3, %v8349_v26  ;;  %437 = vst.msk [vmem:[#allocation3 + $0xc8] sm:$0xff] %vm410_vm3, %v8349_v26  ;;  %5448 = vmatmul.mubr.msk.f32.gmra.mrb[8].mxu0 %vm506_vm0, %v483_v47  ;;  %5472 = vmatmul.mubr.msk.f32.gmra.mrb[8].mxu1 %vm506_vm0, %v499_v48 }
  0x36   : > { %439 = vst.msk [vmem:[#allocation3 + $0xd8] sm:$0xff] %vm410_vm3, %v8349_v26  ;;  %440 = vst.msk [vmem:[#allocation3 + $0xe0] sm:$0xff] %vm410_vm3, %v8349_v26  ;;  %5450 = vmatprep.mubr.msk.f32.mxu0 %vm506_vm0, %v484_v49  ;;  %5474 = vmatprep.mubr.msk.f32.mxu1 %vm506_vm0, %v500_v50  ;;  %v1055_v50 = vld [vmem:[#allocation2 + $0x8] sm:$0xff] }
  0x37   : > { %442 = vst.msk [vmem:[#allocation3 + $0xf0] sm:$0xff] %vm410_vm3, %v8349_v26  ;;  %443 = vst.msk [vmem:[#allocation3 + $0xf8] sm:$0xff] %vm410_vm3, %v8349_v26 }
  0x38   : > { %445 = vst.msk [vmem:[#allocation3 + $0x108] sm:$0xff] %vm410_vm3, %v8349_v26  ;;  %446 = vst.msk [vmem:[#allocation3 + $0x110] sm:$0xff] %vm410_vm3, %v8349_v26  ;;  %959 = vrot.lane.b32.xlu1 %v878_v51, %s5640_s23  ;;  %957 = vrot.lane.b32.xlu0 %v877_v52, %s5640_s23  ;;  %v1054_v51 = vld [vmem:[#allocation2] sm:$0xff] }
  0x39   : > { %448 = vst.msk [vmem:[#allocation3 + $0x120] sm:$0xff] %vm410_vm3, %v8349_v26  ;;  %449 = vst.msk [vmem:[#allocation3 + $0x128] sm:$0xff] %vm410_vm3, %v8349_v26  ;;  %5451 = vmatmul.mubr.msk.f32.gmra.mrb[10].mxu0 %vm506_vm0, %v485_v53  ;;  %5475 = vmatmul.mubr.msk.f32.gmra.mrb[10].mxu1 %vm506_vm0, %v501_v54 }
  0x3a   : > { %451 = vst.msk [vmem:[#allocation3 + $0x138] sm:$0xff] %vm410_vm3, %v8349_v26  ;;  %452 = vst.msk [vmem:[#allocation3 + $0x140] sm:$0xff] %vm410_vm3, %v8349_v26  ;;  %5453 = vmatprep.mubr.msk.f32.mxu0 %vm506_vm0, %v486_v55  ;;  %5477 = vmatprep.mubr.msk.f32.mxu1 %vm506_vm0, %v502_v56 }
  0x3b   : > { %454 = vst.msk [vmem:[#allocation3 + $0x150] sm:$0xff] %vm410_vm3, %v8349_v26  ;;  %455 = vst.msk [vmem:[#allocation3 + $0x158] sm:$0xff] %vm410_vm3, %v8349_v26 }
  0x3c   : > { %457 = vst.msk [vmem:[#allocation3 + $0x168] sm:$0xff] %vm410_vm3, %v8349_v26  ;;  %458 = vst.msk [vmem:[#allocation3 + $0x170] sm:$0xff] %vm410_vm3, %v8349_v26  ;;  %963 = vrot.lane.b32.xlu1 %v880_v57, %s5640_s23  ;;  %961 = vrot.lane.b32.xlu0 %v879_v58, %s5640_s23 }
  0x3d   : > { %460 = vst.msk [vmem:[#allocation3 + $0x180] sm:$0xff] %vm410_vm3, %v8349_v26  ;;  %461 = vst.msk [vmem:[#allocation3 + $0x188] sm:$0xff] %vm410_vm3, %v8349_v26  ;;  %5454 = vmatmul.mubr.msk.f32.gmra.mrb[12].mxu0 %vm506_vm0, %v487_v59  ;;  %5478 = vmatmul.mubr.msk.f32.gmra.mrb[12].mxu1 %vm506_vm0, %v503_v60 }
  0x3e   : > { %463 = vst.msk [vmem:[#allocation3 + $0x198] sm:$0xff] %vm410_vm3, %v8349_v26  ;;  %464 = vst.msk [vmem:[#allocation3 + $0x1a0] sm:$0xff] %vm410_vm3, %v8349_v26  ;;  %5456 = vmatprep.mubr.msk.f32.mxu0 %vm506_vm0, %v488_v61  ;;  %5480 = vmatprep.mubr.msk.f32.mxu1 %vm506_vm0, %v504_v62 }
  0x3f   : > { %1087 = vst.msk [vmem:[#allocation4 + $0x8] sm:$0xff] %vm354_vm1, %v1055_v50  ;;  %1086 = vst.msk [vmem:[#allocation4] sm:$0xff] %vm354_vm1, %v1054_v51 }
  0x40   : > { %967 = vrot.lane.b32.xlu1 %v882_v63, %s5640_s23  ;;  %965 = vrot.lane.b32.xlu0 %v881_v0, %s5640_s23 }
  0x41   : > { %5457 = vmatmul.mubr.msk.f32.gmra.mrb[14].mxu0 %vm506_vm0, %v489_v1  ;;  %5481 = vmatmul.mubr.msk.f32.gmra.mrb[14].mxu1 %vm506_vm0, %v505_v2  ;;  %vm3347_vm0 = vcmask 130112  }
  0x44   : > { %971 = vrot.lane.b32.xlu1 %v884_v3, %s5640_s23  ;;  %969 = vrot.lane.b32.xlu0 %v883_v4, %s5640_s23 }
  0x48   : > { %975 = vrot.lane.b32.xlu1 %v886_v5, %s5640_s23  ;;  %973 = vrot.lane.b32.xlu0 %v885_v6, %s5640_s23 }
  0x4c   : > { %979 = vrot.lane.b32.xlu1 %v888_v7, %s5640_s23  ;;  %977 = vrot.lane.b32.xlu0 %v887_v8, %s5640_s23 }
  0x50   : > { %983 = vrot.lane.b32.xlu1 %v890_v9, %s5640_s23  ;;  %981 = vrot.lane.b32.xlu0 %v889_v10, %s5640_s23 }
  0x54   : > { %987 = vrot.lane.b32.xlu1 %v892_v11, %s5640_s23  ;;  %985 = vrot.lane.b32.xlu0 %v891_v12, %s5640_s23 }
  0x58   : > { %1184 = vrot.lane.b32.xlu1 %v1119_v13, %s5642_s18  ;;  %1182 = vrot.lane.b32.xlu0 %v1118_v14, %s5642_s18 }
  0x5c   : > { %1377 = vrot.lane.b32.xlu1 %v1312_v15, %s5643_s19  ;;  %1375 = vrot.lane.b32.xlu0 %v1311_v16, %s5643_s19 }
  0x8a   : > { %v6121_v17 = vpop.permute.xlu1 %929  ;;  %v926_v18 = vpop.permute.xlu0 %925 }
  0x8e   : > { %v6123_v19 = vpop.permute.xlu1 %931  ;;  %v928_v20 = vpop.permute.xlu0 %927 }
  0x92   : > { %v6125_v21 = vpop.permute.xlu1 %935  ;;  %v6127_v22 = vpop.permute.xlu0 %933 }
  0x96   : > { %v6129_v23 = vpop.permute.xlu1 %939  ;;  %v6131_v24 = vpop.permute.xlu0 %937 }
  0x9a   : > { %v6133_v25 = vpop.permute.xlu1 %943  ;;  %v6135_v27 = vpop.permute.xlu0 %941 }
  0x9e   : > { %v6137_v28 = vpop.permute.xlu1 %947  ;;  %v6139_v29 = vpop.permute.xlu0 %945 }
  0xa2   : > { %v6141_v30 = vpop.permute.xlu1 %951  ;;  %v6143_v31 = vpop.permute.xlu0 %949 }
  0xa6   : > { %v6145_v32 = vpop.permute.xlu1 %955  ;;  %v6147_v33 = vpop.permute.xlu0 %953 }
  0xaa   : > { %v960_v34 = vpop.permute.xlu1 %959  ;;  %v958_v35 = vpop.permute.xlu0 %957 }
  0xae   : > { %v964_v36 = vpop.permute.xlu1 %963  ;;  %v962_v37 = vpop.permute.xlu0 %961 }
  0xb2   : > { %v6149_v38 = vpop.permute.xlu1 %967  ;;  %v6151_v39 = vpop.permute.xlu0 %965 }
  0xb6   : > { %v6153_v40 = vpop.permute.xlu1 %971  ;;  %v6155_v41 = vpop.permute.xlu0 %969 }
  0xba   : > { %v6157_v42 = vpop.permute.xlu1 %975  ;;  %v6159_v43 = vpop.permute.xlu0 %973 }
  0xbe   : > { %v6161_v44 = vpop.permute.xlu1 %979  ;;  %v6163_v45 = vpop.permute.xlu0 %977 }
  0xc2   : > { %v6165_v46 = vpop.permute.xlu1 %983  ;;  %v6167_v47 = vpop.permute.xlu0 %981 }
  0xc6   : > { %v6169_v48 = vpop.permute.xlu1 %987  ;;  %v6171_v49 = vpop.permute.xlu0 %985 }
  0xca   : > { %v1185_v52 = vpop.permute.xlu1 %1184  ;;  %v1183_v53 = vpop.permute.xlu0 %1182 }
  0xcb   : > { %1280 = vst.msk [vmem:[#allocation4 + $0x8] sm:$0xff] %vm1278_vm4, %v1185_v52  ;;  %1279 = vst.msk [vmem:[#allocation4] sm:$0xff] %vm1278_vm4, %v1183_v53 }
  0xce   : > { %v1378_v54 = vpop.permute.xlu1 %1377  ;;  %v1376_v55 = vpop.permute.xlu0 %1375 }
  0xcf   : > { %1473 = vst.msk [vmem:[#allocation4 + $0x8] sm:$0xff] %vm1471_vm5, %v1378_v54  ;;  %1472 = vst.msk [vmem:[#allocation4] sm:$0xff] %vm1471_vm5, %v1376_v55 }
  0xf8   : > { %v5437_v56 = vpop.f32.mrb[0].mxu0  ;;  %v5461_v57 = vpop.f32.mrb[0].mxu1 }
  0xf9   : > { %830 = vst.msk [vmem:[#allocation2 + $0x21] sm:$0xff] %vm410_vm3, %v5437_v56  ;;  %v669_v58 = vpop.f32.mrb[1].mxu0  ;;  %846 = vst.msk [vmem:[#allocation2 + $0xe1] sm:$0xff] %vm410_vm3, %v5461_v57  ;;  %v749_v59 = vpop.f32.mrb[1].mxu1 }
  0xfa   : > { %1023 = vst.msk [vmem:[#allocation2 + $0x21] sm:$0xff] %vm1021_vm6, %v928_v20  ;;  %1039 = vst.msk [vmem:[#allocation2 + $0xe1] sm:$0xff] %vm1021_vm6, %v960_v34 }
  0xfb   : > { %829 = vst.msk [vmem:[#allocation2 + $0x19] sm:$0xff] %vm410_vm3, %v669_v58  ;;  %845 = vst.msk [vmem:[#allocation2 + $0xd9] sm:$0xff] %vm410_vm3, %v749_v59 }
  0xfc   : > { %1022 = vst.msk [vmem:[#allocation2 + $0x19] sm:$0xff] %vm1021_vm6, %v926_v18  ;;  %1038 = vst.msk [vmem:[#allocation2 + $0xd9] sm:$0xff] %vm1021_vm6, %v958_v35  ;;  %v5440_v60 = vpop.f32.mrb[2].mxu0  ;;  %v5464_v61 = vpop.f32.mrb[2].mxu1 }
  0xfd   : > { %832 = vst.msk [vmem:[#allocation2 + $0x39] sm:$0xff] %vm410_vm3, %v5440_v60  ;;  %v679_v62 = vpop.f32.mrb[3].mxu0  ;;  %848 = vst.msk [vmem:[#allocation2 + $0xf9] sm:$0xff] %vm410_vm3, %v5464_v61  ;;  %v759_v63 = vpop.f32.mrb[3].mxu1 }
  0xfe   : > { %1025 = vst.msk [vmem:[#allocation2 + $0x39] sm:$0xff] %vm1021_vm6, %v6123_v19  ;;  %1041 = vst.msk [vmem:[#allocation2 + $0xf9] sm:$0xff] %vm1021_vm6, %v964_v36 }
  0xff   : > { %831 = vst.msk [vmem:[#allocation2 + $0x31] sm:$0xff] %vm410_vm3, %v679_v62  ;;  %847 = vst.msk [vmem:[#allocation2 + $0xf1] sm:$0xff] %vm410_vm3, %v759_v63 }
 0x100   : > { %1024 = vst.msk [vmem:[#allocation2 + $0x31] sm:$0xff] %vm1021_vm6, %v6121_v17  ;;  %1040 = vst.msk [vmem:[#allocation2 + $0xf1] sm:$0xff] %vm1021_vm6, %v962_v37  ;;  %v5443_v0 = vpop.f32.mrb[4].mxu0  ;;  %v5467_v1 = vpop.f32.mrb[4].mxu1 }
 0x101   : > { %834 = vst.msk [vmem:[#allocation2 + $0x51] sm:$0xff] %vm410_vm3, %v5443_v0  ;;  %v689_v2 = vpop.f32.mrb[5].mxu0  ;;  %v6198_v3 = vld [vmem:[#allocation2 + $0x21] sm:$0xff]  ;;  %850 = vst.msk [vmem:[#allocation2 + $0x111] sm:$0xff] %vm410_vm3, %v5467_v1  ;;  %v769_v4 = vpop.f32.mrb[5].mxu1 }
 0x102   : > { %1027 = vst.msk [vmem:[#allocation2 + $0x51] sm:$0xff] %vm1021_vm6, %v6125_v21  ;;  %1188 = vrot.lane.b32.xlu1 %v6198_v3, %s5642_s18  ;;  %1043 = vst.msk [vmem:[#allocation2 + $0x111] sm:$0xff] %vm1021_vm6, %v6149_v38  ;;  %v6215_v6 = vld [vmem:[#allocation2 + $0xe1] sm:$0xff] }
 0x103   : > { %833 = vst.msk [vmem:[#allocation2 + $0x49] sm:$0xff] %vm410_vm3, %v689_v2  ;;  %v6206_v5 = vld [vmem:[#allocation2 + $0x19] sm:$0xff]  ;;  %849 = vst.msk [vmem:[#allocation2 + $0x109] sm:$0xff] %vm410_vm3, %v769_v4 }
 0x104   : > { %1026 = vst.msk [vmem:[#allocation2 + $0x49] sm:$0xff] %vm1021_vm6, %v6127_v22  ;;  %1186 = vrot.lane.b32.xlu0 %v6206_v5, %s5642_s18  ;;  %v6217_v7 = vld [vmem:[#allocation2 + $0xd9] sm:$0xff]  ;;  %1042 = vst.msk [vmem:[#allocation2 + $0x109] sm:$0xff] %vm1021_vm6, %v6151_v39  ;;  %v5446_v9 = vpop.f32.mrb[6].mxu0  ;;  %v5470_v13 = vpop.f32.mrb[6].mxu1 }
 0x105   : > { %v6219_v8 = vld [vmem:[#allocation2 + $0x18] sm:$0xff]  ;;  %v6223_v10 = vld [vmem:[#allocation2 + $0x20] sm:$0xff]  ;;  %836 = vst.msk [vmem:[#allocation2 + $0x69] sm:$0xff] %vm410_vm3, %v5446_v9  ;;  %v699_v14 = vpop.f32.mrb[7].mxu0  ;;  %852 = vst.msk [vmem:[#allocation2 + $0x129] sm:$0xff] %vm410_vm3, %v5470_v13  ;;  %v779_v15 = vpop.f32.mrb[7].mxu1 }
 0x106   : > { %v6225_v11 = vld [vmem:[#allocation2 + $0xd8] sm:$0xff]  ;;  %v6227_v12 = vld [vmem:[#allocation2 + $0xe0] sm:$0xff]  ;;  %1088 = vst.msk [vmem:[#allocation4 + $0x10] sm:$0xff] %vm354_vm1, %v6219_v8  ;;  %1089 = vst.msk [vmem:[#allocation4 + $0x18] sm:$0xff] %vm354_vm1, %v6223_v10  ;;  %1220 = vrot.lane.b32.xlu1 %v6215_v6, %s5642_s18 }
 0x107   : > { %1105 = vst.msk [vmem:[#allocation4 + $0x98] sm:$0xff] %vm354_vm1, %v6227_v12  ;;  %1104 = vst.msk [vmem:[#allocation4 + $0x90] sm:$0xff] %vm354_vm1, %v6225_v11  ;;  %v6251_v16 = vld [vmem:[#allocation2 + $0x30] sm:$0xff]  ;;  %v6255_v18 = vld [vmem:[#allocation2 + $0x38] sm:$0xff] }
 0x108   : > { %1029 = vst.msk [vmem:[#allocation2 + $0x69] sm:$0xff] %vm1021_vm6, %v6129_v23  ;;  %1045 = vst.msk [vmem:[#allocation2 + $0x129] sm:$0xff] %vm1021_vm6, %v6153_v40  ;;  %1218 = vrot.lane.b32.xlu0 %v6217_v7, %s5642_s18  ;;  %v5449_v17 = vpop.f32.mrb[8].mxu0  ;;  %v6257_v19 = vld [vmem:[#allocation2 + $0xf0] sm:$0xff]  ;;  %v6259_v20 = vld [vmem:[#allocation2 + $0xf8] sm:$0xff]  ;;  %v5473_v21 = vpop.f32.mrb[8].mxu1 }
 0x109   : > { %835 = vst.msk [vmem:[#allocation2 + $0x61] sm:$0xff] %vm410_vm3, %v699_v14  ;;  %851 = vst.msk [vmem:[#allocation2 + $0x121] sm:$0xff] %vm410_vm3, %v779_v15  ;;  %v709_v22 = vpop.f32.mrb[9].mxu0  ;;  %v6264_v23 = vld [vmem:[#allocation2 + $0x22] sm:$0xff]  ;;  %v6278_v34 = vld [vmem:[#allocation2 + $0x1a] sm:$0xff] }
 0x10a   : > { %1028 = vst.msk [vmem:[#allocation2 + $0x61] sm:$0xff] %vm1021_vm6, %v6131_v24  ;;  %1044 = vst.msk [vmem:[#allocation2 + $0x121] sm:$0xff] %vm1021_vm6, %v6155_v41  ;;  %v789_v24 = vpop.f32.mrb[9].mxu1  ;;  %1381 = vrot.lane.b32.xlu1 %v6264_v23, %s5643_s19  ;;  %v1330_v40 = vld [vmem:[#allocation2 + $0xe2] sm:$0xff]  ;;  %v1123_v61 = vld [vmem:[#allocation2 + $0x39] sm:$0xff] }
 0x10b   : > { %1090 = vst.msk [vmem:[#allocation4 + $0x20] sm:$0xff] %vm354_vm1, %v6251_v16  ;;  %1091 = vst.msk [vmem:[#allocation4 + $0x28] sm:$0xff] %vm354_vm1, %v6255_v18  ;;  %v6287_v35 = vld [vmem:[#allocation2 + $0x48] sm:$0xff]  ;;  %v6291_v36 = vld [vmem:[#allocation2 + $0x50] sm:$0xff] }
 0x10c   : > { %838 = vst.msk [vmem:[#allocation2 + $0x81] sm:$0xff] %vm410_vm3, %v5449_v17  ;;  %854 = vst.msk [vmem:[#allocation2 + $0x141] sm:$0xff] %vm410_vm3, %v5473_v21  ;;  %1379 = vrot.lane.b32.xlu0 %v6278_v34, %s5643_s19  ;;  %v6293_v37 = vld [vmem:[#allocation2 + $0x108] sm:$0xff]  ;;  %v6295_v38 = vld [vmem:[#allocation2 + $0x110] sm:$0xff]  ;;  %v5476_v39 = vpop.f32.mrb[10].mxu1 }
 0x10d   : > { %1107 = vst.msk [vmem:[#allocation4 + $0xa8] sm:$0xff] %vm354_vm1, %v6259_v20  ;;  %1106 = vst.msk [vmem:[#allocation4 + $0xa0] sm:$0xff] %vm354_vm1, %v6257_v19  ;;  %v799_v41 = vpop.f32.mrb[11].mxu1  ;;  %v1122_v62 = vld [vmem:[#allocation2 + $0x31] sm:$0xff]  ;;  %v6423_v0 = vld [vmem:[#allocation2 + $0xf9] sm:$0xff] }
 0x10e   : > { %1031 = vst.msk [vmem:[#allocation2 + $0x81] sm:$0xff] %vm1021_vm6, %v6133_v25  ;;  %1047 = vst.msk [vmem:[#allocation2 + $0x141] sm:$0xff] %vm1021_vm6, %v6157_v42  ;;  %v5452_v25 = vpop.f32.mrb[10].mxu0  ;;  %1413 = vrot.lane.b32.xlu1 %v1330_v40, %s5643_s19  ;;  %v1329_v42 = vld [vmem:[#allocation2 + $0xda] sm:$0xff]  ;;  %v6429_v2 = vld [vmem:[#allocation2 + $0xf1] sm:$0xff] }
 0x10f   : > { %837 = vst.msk [vmem:[#allocation2 + $0x79] sm:$0xff] %vm410_vm3, %v709_v22  ;;  %853 = vst.msk [vmem:[#allocation2 + $0x139] sm:$0xff] %vm410_vm3, %v789_v24  ;;  %v6441_v4 = vld [vmem:[#allocation2 + $0x32] sm:$0xff]  ;;  %v6471_v14 = vld [vmem:[#allocation2 + $0x4a] sm:$0xff] }
 0x110   : > { %1030 = vst.msk [vmem:[#allocation2 + $0x79] sm:$0xff] %vm1021_vm6, %v6135_v27  ;;  %1046 = vst.msk [vmem:[#allocation2 + $0x139] sm:$0xff] %vm1021_vm6, %v6159_v43  ;;  %v719_v27 = vpop.f32.mrb[11].mxu0  ;;  %1411 = vrot.lane.b32.xlu0 %v1329_v42, %s5643_s19  ;;  %v5479_v50 = vpop.f32.mrb[12].mxu1  ;;  %v1125_v9 = vld [vmem:[#allocation2 + $0x51] sm:$0xff]  ;;  %v1127_v17 = vld [vmem:[#allocation2 + $0x69] sm:$0xff] }
 0x111   : > { %1092 = vst.msk [vmem:[#allocation4 + $0x30] sm:$0xff] %vm354_vm1, %v6287_v35  ;;  %1093 = vst.msk [vmem:[#allocation4 + $0x38] sm:$0xff] %vm354_vm1, %v6291_v36  ;;  %v6319_v43 = vld [vmem:[#allocation2 + $0x60] sm:$0xff]  ;;  %v6321_v51 = vld [vmem:[#allocation2 + $0x68] sm:$0xff] }
 0x112   : > { %840 = vst.msk [vmem:[#allocation2 + $0x99] sm:$0xff] %vm410_vm3, %v5452_v25  ;;  %856 = vst.msk [vmem:[#allocation2 + $0x159] sm:$0xff] %vm410_vm3, %v5476_v39  ;;  %v6323_v52 = vld [vmem:[#allocation2 + $0x120] sm:$0xff]  ;;  %v6325_v53 = vld [vmem:[#allocation2 + $0x128] sm:$0xff]  ;;  %1763 = vrot.lane.b32.xlu1 %v6198_v3, %s5644_s22 }
 0x113   : > { %1109 = vst.msk [vmem:[#allocation4 + $0xb8] sm:$0xff] %vm354_vm1, %v6295_v38  ;;  %1108 = vst.msk [vmem:[#allocation4 + $0xb0] sm:$0xff] %vm354_vm1, %v6293_v37  ;;  %v6437_v3 = vld [vmem:[#allocation2 + $0x3a] sm:$0xff]  ;;  %v6467_v13 = vld [vmem:[#allocation2 + $0x52] sm:$0xff] }
 0x114   : > { %1033 = vst.msk [vmem:[#allocation2 + $0x99] sm:$0xff] %vm1021_vm6, %v6137_v28  ;;  %1049 = vst.msk [vmem:[#allocation2 + $0x159] sm:$0xff] %vm1021_vm6, %v6161_v44  ;;  %v5455_v28 = vpop.f32.mrb[12].mxu0  ;;  %v809_v44 = vpop.f32.mrb[13].mxu1  ;;  %1568 = vrot.lane.b32.xlu0 %v6219_v8, %s5645_s20  ;;  %v1331_v8 = vld [vmem:[#allocation2 + $0xf2] sm:$0xff]  ;;  %v6503_v21 = vld [vmem:[#allocation2 + $0x6a] sm:$0xff] }
 0x115   : > { %839 = vst.msk [vmem:[#allocation2 + $0x91] sm:$0xff] %vm410_vm3, %v719_v27  ;;  %855 = vst.msk [vmem:[#allocation2 + $0x151] sm:$0xff] %vm410_vm3, %v799_v41  ;;  %v5482_v54 = vpop.f32.mrb[14].mxu1  ;;  %v6475_v15 = vld [vmem:[#allocation2 + $0x112] sm:$0xff]  ;;  %v6507_v22 = vld [vmem:[#allocation2 + $0x62] sm:$0xff] }
 0x116   : > { %1032 = vst.msk [vmem:[#allocation2 + $0x91] sm:$0xff] %vm1021_vm6, %v6139_v29  ;;  %1048 = vst.msk [vmem:[#allocation2 + $0x151] sm:$0xff] %vm1021_vm6, %v6163_v45  ;;  %v729_v29 = vpop.f32.mrb[13].mxu0  ;;  %v819_v57 = vpop.f32.mrb[15].mxu1  ;;  %1570 = vrot.lane.b32.xlu1 %v6223_v10, %s5645_s20  ;;  %v1124_v10 = vld [vmem:[#allocation2 + $0x49] sm:$0xff]  ;;  %v1129_v25 = vld [vmem:[#allocation2 + $0x81] sm:$0xff] }
 0x117   : > { %1094 = vst.msk [vmem:[#allocation4 + $0x40] sm:$0xff] %vm354_vm1, %v6319_v43  ;;  %1095 = vst.msk [vmem:[#allocation4 + $0x48] sm:$0xff] %vm354_vm1, %v6321_v51  ;;  %v5458_v45 = vpop.f32.mrb[14].mxu0  ;;  %v6353_v55 = vld [vmem:[#allocation2 + $0x80] sm:$0xff]  ;;  %v6355_v56 = vld [vmem:[#allocation2 + $0x138] sm:$0xff] }
 0x118   : > { %842 = vst.msk [vmem:[#allocation2 + $0xb1] sm:$0xff] %vm410_vm3, %v5455_v28  ;;  %858 = vst.msk [vmem:[#allocation2 + $0x171] sm:$0xff] %vm410_vm3, %v5479_v50  ;;  %1600 = vrot.lane.b32.xlu0 %v6225_v11, %s5645_s20  ;;  %v6459_v11 = vld [vmem:[#allocation2 + $0x111] sm:$0xff]  ;;  %v6532_v39 = vld [vmem:[#allocation2 + $0x141] sm:$0xff] }
 0x119   : > { %1111 = vst.msk [vmem:[#allocation4 + $0xc8] sm:$0xff] %vm354_vm1, %v6325_v53  ;;  %1110 = vst.msk [vmem:[#allocation4 + $0xc0] sm:$0xff] %vm354_vm1, %v6323_v52  ;;  %v6511_v24 = vld [vmem:[#allocation2 + $0x12a] sm:$0xff]  ;;  %v6537_v27 = vld [vmem:[#allocation2 + $0x139] sm:$0xff] }
 0x11a   : > { %1035 = vst.msk [vmem:[#allocation2 + $0xb1] sm:$0xff] %vm1021_vm6, %v6141_v30  ;;  %1051 = vst.msk [vmem:[#allocation2 + $0x171] sm:$0xff] %vm1021_vm6, %v6165_v46  ;;  %v6351_v30 = vld [vmem:[#allocation2 + $0x78] sm:$0xff]  ;;  %v6357_v46 = vld [vmem:[#allocation2 + $0x140] sm:$0xff]  ;;  %1602 = vrot.lane.b32.xlu1 %v6227_v12, %s5645_s20 }
 0x11b   : > { %841 = vst.msk [vmem:[#allocation2 + $0xa9] sm:$0xff] %vm410_vm3, %v729_v29  ;;  %857 = vst.msk [vmem:[#allocation2 + $0x169] sm:$0xff] %vm410_vm3, %v809_v44  ;;  %v6461_v12 = vld [vmem:[#allocation2 + $0x109] sm:$0xff]  ;;  %v6547_v28 = vld [vmem:[#allocation2 + $0x7a] sm:$0xff] }
 0x11c   : > { %1034 = vst.msk [vmem:[#allocation2 + $0xa9] sm:$0xff] %vm1021_vm6, %v6143_v31  ;;  %1050 = vst.msk [vmem:[#allocation2 + $0x169] sm:$0xff] %vm1021_vm6, %v6167_v47  ;;  %v739_v31 = vpop.f32.mrb[15].mxu0  ;;  %1761 = vrot.lane.b32.xlu0 %v6206_v5, %s5644_s22  ;;  %v1332_v5 = vld [vmem:[#allocation2 + $0xfa] sm:$0xff]  ;;  %v6542_v42 = vld [vmem:[#allocation2 + $0x82] sm:$0xff] }
 0x11d   : > { %8358 = vst [vmem:[#allocation6_spill] sm:$0xff] %v6355_v56  ;;  %8359 = vst [vmem:[#allocation7_spill] sm:$0xff] %v6357_v46  ;;  %v6385_v47 = vld [vmem:[#allocation2 + $0x90] sm:$0xff]  ;;  %v6387_v58 = vld [vmem:[#allocation2 + $0x158] sm:$0xff] }
 0x11e   : > { %1096 = vst.msk [vmem:[#allocation4 + $0x50] sm:$0xff] %vm354_vm1, %v6351_v30  ;;  %1097 = vst.msk [vmem:[#allocation4 + $0x58] sm:$0xff] %vm354_vm1, %v6353_v55  ;;  %v6389_v59 = vld [vmem:[#allocation2 + $0x150] sm:$0xff]  ;;  %1192 = vrot.lane.b32.xlu1 %v1123_v61, %s5642_s18  ;;  %v6557_v29 = vld [vmem:[#allocation2 + $0x13a] sm:$0xff] }
 0x11f   : > { %844 = vst.msk [vmem:[#allocation2 + $0xc9] sm:$0xff] %vm410_vm3, %v5458_v45  ;;  %860 = vst.msk [vmem:[#allocation2 + $0x189] sm:$0xff] %vm410_vm3, %v5482_v54 }
 0x120   : > { %1113 = vst.msk [vmem:[#allocation4 + $0xd8] sm:$0xff] %vm354_vm1, %v6357_v46  ;;  %1112 = vst.msk [vmem:[#allocation4 + $0xd0] sm:$0xff] %vm354_vm1, %v6355_v56  ;;  %1190 = vrot.lane.b32.xlu0 %v1122_v62, %s5642_s18 }
 0x121   : > { %1037 = vst.msk [vmem:[#allocation2 + $0xc9] sm:$0xff] %vm1021_vm6, %v6145_v32  ;;  %1053 = vst.msk [vmem:[#allocation2 + $0x189] sm:$0xff] %vm1021_vm6, %v6169_v48  ;;  %v6383_v32 = vld [vmem:[#allocation2 + $0x98] sm:$0xff] }
 0x122   : > { %843 = vst.msk [vmem:[#allocation2 + $0xc1] sm:$0xff] %vm410_vm3, %v739_v31  ;;  %859 = vst.msk [vmem:[#allocation2 + $0x181] sm:$0xff] %vm410_vm3, %v819_v57  ;;  %1224 = vrot.lane.b32.xlu1 %v6423_v0, %s5642_s18 }
 0x123   : > { %1036 = vst.msk [vmem:[#allocation2 + $0xc1] sm:$0xff] %vm1021_vm6, %v6147_v33  ;;  %1052 = vst.msk [vmem:[#allocation2 + $0x181] sm:$0xff] %vm1021_vm6, %v6171_v49  ;;  %v6403_v33 = vld [vmem:[#allocation2 + $0xb0] sm:$0xff]  ;;  %v6405_v48 = vld [vmem:[#allocation2 + $0xa8] sm:$0xff]  ;;  %vm4119_vm6 = vcmask 392512  }
 0x124   : > { %8360 = vst [vmem:[#allocation8_spill] sm:$0xff] %v6389_v59  ;;  %1099 = vst.msk [vmem:[#allocation4 + $0x68] sm:$0xff] %vm354_vm1, %v6383_v32  ;;  %v6407_v49 = vld [vmem:[#allocation2 + $0x170] sm:$0xff]  ;;  %v6409_v60 = vld [vmem:[#allocation2 + $0x168] sm:$0xff]  ;;  %1222 = vrot.lane.b32.xlu0 %v6429_v2, %s5642_s18 }
 0x125   : > { %1098 = vst.msk [vmem:[#allocation4 + $0x60] sm:$0xff] %vm354_vm1, %v6385_v47  ;;  %1115 = vst.msk [vmem:[#allocation4 + $0xe8] sm:$0xff] %vm354_vm1, %v6387_v58 }
 0x126   : > { %1114 = vst.msk [vmem:[#allocation4 + $0xe0] sm:$0xff] %vm354_vm1, %v6389_v59  ;;  %1101 = vst.msk [vmem:[#allocation4 + $0x78] sm:$0xff] %vm354_vm1, %v6403_v33  ;;  %1385 = vrot.lane.b32.xlu1 %v6437_v3, %s5643_s19 }
 0x127   : > { %1100 = vst.msk [vmem:[#allocation4 + $0x70] sm:$0xff] %vm354_vm1, %v6405_v48  ;;  %1117 = vst.msk [vmem:[#allocation4 + $0xf8] sm:$0xff] %vm354_vm1, %v6407_v49 }
 0x128   : > { %1116 = vst.msk [vmem:[#allocation4 + $0xf0] sm:$0xff] %vm354_vm1, %v6409_v60  ;;  %1383 = vrot.lane.b32.xlu0 %v6441_v4, %s5643_s19  ;;  %v6683_v26 = vld [vmem:[#allocation2 + $0xc9] sm:$0xff] }
 0x12a   : > { %v6420_v63 = vld [vmem:[#allocation2 + $0xc8] sm:$0xff]  ;;  %v6425_v1 = vld [vmem:[#allocation2 + $0xc0] sm:$0xff]  ;;  %1417 = vrot.lane.b32.xlu1 %v1332_v5, %s5643_s19 }
 0x12b   : > { %1103 = vst.msk [vmem:[#allocation4 + $0x88] sm:$0xff] %vm354_vm1, %v6420_v63  ;;  %1102 = vst.msk [vmem:[#allocation4 + $0x80] sm:$0xff] %vm354_vm1, %v6425_v1  ;;  %vm3540_vm1 = vcmask 195712  }
 0x12c   : > { %1415 = vrot.lane.b32.xlu0 %v1331_v8, %s5643_s19  ;;  %v6580_v8 = vld [vmem:[#allocation2 + $0x99] sm:$0xff] }
 0x12e   : > { %1767 = vrot.lane.b32.xlu1 %v1123_v61, %s5644_s22 }
 0x130   : > { %1572 = vrot.lane.b32.xlu0 %v6251_v16, %s5645_s20  ;;  %v6479_v16 = vld [vmem:[#allocation2 + $0x10a] sm:$0xff] }
 0x132   : > { %1574 = vrot.lane.b32.xlu1 %v6255_v18, %s5645_s20  ;;  %v1126_v18 = vld [vmem:[#allocation2 + $0x61] sm:$0xff] }
 0x134   : > { %1604 = vrot.lane.b32.xlu0 %v6257_v19, %s5645_s20  ;;  %v6495_v19 = vld [vmem:[#allocation2 + $0x129] sm:$0xff] }
 0x136   : > { %1606 = vrot.lane.b32.xlu1 %v6259_v20, %s5645_s20  ;;  %v6497_v20 = vld [vmem:[#allocation2 + $0x121] sm:$0xff] }
 0x138   : > { %1765 = vrot.lane.b32.xlu0 %v1122_v62, %s5644_s22 }
 0x13a   : > { %1196 = vrot.lane.b32.xlu1 %v1125_v9, %s5642_s18 }
 0x13c   : > { %1194 = vrot.lane.b32.xlu0 %v1124_v10, %s5642_s18 }
 0x13e   : > { %1228 = vrot.lane.b32.xlu1 %v6459_v11, %s5642_s18 }
 0x140   : > { %1226 = vrot.lane.b32.xlu0 %v6461_v12, %s5642_s18 }
 0x142   : > { %1389 = vrot.lane.b32.xlu1 %v6467_v13, %s5643_s19 }
 0x144   : > { %1387 = vrot.lane.b32.xlu0 %v6471_v14, %s5643_s19 }
 0x146   : > { %1421 = vrot.lane.b32.xlu1 %v6475_v15, %s5643_s19 }
 0x148   : > { %1419 = vrot.lane.b32.xlu0 %v6479_v16, %s5643_s19 }
 0x14a   : > { %1771 = vrot.lane.b32.xlu1 %v1125_v9, %s5644_s22  ;;  %v6585_v9 = vld [vmem:[#allocation2 + $0x91] sm:$0xff] }
 0x14c   : > { %1576 = vrot.lane.b32.xlu0 %v6287_v35, %s5645_s20  ;;  %v6515_v35 = vld [vmem:[#allocation2 + $0x122] sm:$0xff] }
 0x14e   : > { %1578 = vrot.lane.b32.xlu1 %v6291_v36, %s5645_s20  ;;  %v1128_v36 = vld [vmem:[#allocation2 + $0x79] sm:$0xff] }
 0x150   : > { %1608 = vrot.lane.b32.xlu0 %v6293_v37, %s5645_s20 }
 0x152   : > { %1610 = vrot.lane.b32.xlu1 %v6295_v38, %s5645_s20 }
 0x154   : > { %1769 = vrot.lane.b32.xlu0 %v1124_v10, %s5644_s22 }
 0x156   : > { %1200 = vrot.lane.b32.xlu1 %v1127_v17, %s5642_s18 }
 0x158   : > { %1198 = vrot.lane.b32.xlu0 %v1126_v18, %s5642_s18 }
 0x15a   : > { %1232 = vrot.lane.b32.xlu1 %v6495_v19, %s5642_s18 }
 0x15c   : > { %1230 = vrot.lane.b32.xlu0 %v6497_v20, %s5642_s18 }
 0x15e   : > { %1393 = vrot.lane.b32.xlu1 %v6503_v21, %s5643_s19 }
 0x160   : > { %1391 = vrot.lane.b32.xlu0 %v6507_v22, %s5643_s19 }
 0x162   : > { %1425 = vrot.lane.b32.xlu1 %v6511_v24, %s5643_s19 }
 0x164   : > { %1423 = vrot.lane.b32.xlu0 %v6515_v35, %s5643_s19 }
 0x166   : > { %1775 = vrot.lane.b32.xlu1 %v1127_v17, %s5644_s22 }
 0x168   : > { %1580 = vrot.lane.b32.xlu0 %v6319_v43, %s5645_s20 }
 0x16a   : > { %1582 = vrot.lane.b32.xlu1 %v6321_v51, %s5645_s20 }
 0x16c   : > { %1612 = vrot.lane.b32.xlu0 %v6323_v52, %s5645_s20 }
 0x16e   : > { %1614 = vrot.lane.b32.xlu1 %v6325_v53, %s5645_s20  ;;  %v6552_v53 = vld [vmem:[#allocation2 + $0x142] sm:$0xff] }
 0x170   : > { %1773 = vrot.lane.b32.xlu0 %v1126_v18, %s5644_s22  ;;  %v6590_v18 = vld [vmem:[#allocation2 + $0x159] sm:$0xff] }
 0x172   : > { %1204 = vrot.lane.b32.xlu1 %v1129_v25, %s5642_s18 }
 0x174   : > { %1202 = vrot.lane.b32.xlu0 %v1128_v36, %s5642_s18  ;;  %v1189_v37 = vpop.permute.xlu1 %1188 }
 0x175   : > { %1282 = vst.msk [vmem:[#allocation4 + $0x18] sm:$0xff] %vm1278_vm4, %v1189_v37 }
 0x176   : > { %v1187_v38 = vpop.permute.xlu0 %1186  ;;  %1236 = vrot.lane.b32.xlu1 %v6532_v39, %s5642_s18 }
 0x177   : > { %1281 = vst.msk [vmem:[#allocation4 + $0x10] sm:$0xff] %vm1278_vm4, %v1187_v38  ;;  %v6600_v38 = vld [vmem:[#allocation2 + $0x9a] sm:$0xff] }
 0x178   : > { %1234 = vrot.lane.b32.xlu0 %v6537_v27, %s5642_s18  ;;  %v1221_v40 = vpop.permute.xlu1 %1220 }
 0x179   : > { %1298 = vst.msk [vmem:[#allocation4 + $0x98] sm:$0xff] %vm1278_vm4, %v1221_v40  ;;  %v6605_v40 = vld [vmem:[#allocation2 + $0x92] sm:$0xff] }
 0x17a   : > { %v1219_v41 = vpop.permute.xlu0 %1218  ;;  %1397 = vrot.lane.b32.xlu1 %v6542_v42, %s5643_s19 }
 0x17b   : > { %1297 = vst.msk [vmem:[#allocation4 + $0x90] sm:$0xff] %vm1278_vm4, %v1219_v41 }
 0x17c   : > { %1395 = vrot.lane.b32.xlu0 %v6547_v28, %s5643_s19  ;;  %v1382_v50 = vpop.permute.xlu1 %1381 }
 0x17d   : > { %1475 = vst.msk [vmem:[#allocation4 + $0x18] sm:$0xff] %vm1471_vm5, %v1382_v50 }
 0x17e   : > { %v1380_v52 = vpop.permute.xlu0 %1379  ;;  %1429 = vrot.lane.b32.xlu1 %v6552_v53, %s5643_s19 }
 0x17f   : > { %1474 = vst.msk [vmem:[#allocation4 + $0x10] sm:$0xff] %vm1471_vm5, %v1380_v52  ;;  %v6610_v52 = vld [vmem:[#allocation2 + $0x15a] sm:$0xff] }
 0x180   : > { %1427 = vrot.lane.b32.xlu0 %v6557_v29, %s5643_s19  ;;  %v1414_v44 = vpop.permute.xlu1 %1413 }
 0x181   : > { %1491 = vst.msk [vmem:[#allocation4 + $0x98] sm:$0xff] %vm1471_vm5, %v1414_v44  ;;  %v6615_v44 = vld [vmem:[#allocation2 + $0x152] sm:$0xff] }
 0x182   : > { %v1412_v45 = vpop.permute.xlu0 %1411  ;;  %1779 = vrot.lane.b32.xlu1 %v1129_v25, %s5644_s22  ;;  %v6595_v25 = vld [vmem:[#allocation2 + $0x151] sm:$0xff] }
 0x183   : > { %1490 = vst.msk [vmem:[#allocation4 + $0x90] sm:$0xff] %vm1471_vm5, %v1412_v45 }
 0x184   : > { %1584 = vrot.lane.b32.xlu0 %v6351_v30, %s5645_s20  ;;  %v1764_v54 = vpop.permute.xlu1 %1763 }
 0x186   : > { %v1569_v31 = vpop.permute.xlu0 %1568  ;;  %1586 = vrot.lane.b32.xlu1 %v6353_v55, %s5645_s20 }
 0x187   : > { %1665 = vst.msk [vmem:[#allocation4] sm:$0xff] %vm1664_vm7, %v1569_v31 }
 0x188   : > { %1616 = vrot.lane.b32.xlu0 %v6355_v56, %s5645_s20  ;;  %v1571_v57 = vpop.permute.xlu1 %1570 }
 0x189   : > { %1666 = vst.msk [vmem:[#allocation4 + $0x8] sm:$0xff] %vm1664_vm7, %v1571_v57 }
 0x18a   : > { %v6572_v61 = vpop.permute.xlu0 %1600  ;;  %1618 = vrot.lane.b32.xlu1 %v6357_v46, %s5645_s20  ;;  %1859 = vst.msk [vmem:[#allocation4 + $0x8] sm:$0xff] %vm1857_vm8, %v1764_v54  ;;  %v1534_v46 = vld [vmem:[#allocation2 + $0x180] sm:$0xff] }
 0x18c   : > { %1777 = vrot.lane.b32.xlu0 %v1128_v36, %s5644_s22  ;;  %v6578_v62 = vpop.permute.xlu1 %1602 }
 0x18e   : > { %v1762_v5 = vpop.permute.xlu0 %1761  ;;  %1208 = vrot.lane.b32.xlu1 %v6580_v8, %s5642_s18 }
 0x18f   : > { %1858 = vst.msk [vmem:[#allocation4] sm:$0xff] %vm1857_vm8, %v1762_v5 }
 0x190   : > { %1206 = vrot.lane.b32.xlu0 %v6585_v9, %s5642_s18  ;;  %v1193_v10 = vpop.permute.xlu1 %1192 }
 0x191   : > { %1284 = vst.msk [vmem:[#allocation4 + $0x28] sm:$0xff] %vm1278_vm4, %v1193_v10 }
 0x192   : > { %v1191_v17 = vpop.permute.xlu0 %1190  ;;  %1240 = vrot.lane.b32.xlu1 %v6590_v18, %s5642_s18 }
 0x193   : > { %1283 = vst.msk [vmem:[#allocation4 + $0x20] sm:$0xff] %vm1278_vm4, %v1191_v17  ;;  %v6631_v17 = vld [vmem:[#allocation2 + $0xb1] sm:$0xff] }
 0x194   : > { %1238 = vrot.lane.b32.xlu0 %v6595_v25, %s5642_s18  ;;  %v1225_v36 = vpop.permute.xlu1 %1224 }
 0x195   : > { %1300 = vst.msk [vmem:[#allocation4 + $0xa8] sm:$0xff] %vm1278_vm4, %v1225_v36  ;;  %v6637_v36 = vld [vmem:[#allocation2 + $0xa9] sm:$0xff] }
 0x196   : > { %v1223_v37 = vpop.permute.xlu0 %1222  ;;  %1401 = vrot.lane.b32.xlu1 %v6600_v38, %s5643_s19 }
 0x197   : > { %1299 = vst.msk [vmem:[#allocation4 + $0xa0] sm:$0xff] %vm1278_vm4, %v1223_v37 }
 0x198   : > { %1399 = vrot.lane.b32.xlu0 %v6605_v40, %s5643_s19  ;;  %v1386_v41 = vpop.permute.xlu1 %1385 }
 0x199   : > { %1477 = vst.msk [vmem:[#allocation4 + $0x28] sm:$0xff] %vm1471_vm5, %v1386_v41  ;;  %v6642_v41 = vld [vmem:[#allocation2 + $0x171] sm:$0xff] }
 0x19a   : > { %v1384_v50 = vpop.permute.xlu0 %1383  ;;  %1433 = vrot.lane.b32.xlu1 %v6610_v52, %s5643_s19 }
 0x19b   : > { %1476 = vst.msk [vmem:[#allocation4 + $0x20] sm:$0xff] %vm1471_vm5, %v1384_v50  ;;  %v6647_v50 = vld [vmem:[#allocation2 + $0x169] sm:$0xff] }
 0x19c   : > { %1431 = vrot.lane.b32.xlu0 %v6615_v44, %s5643_s19  ;;  %v1418_v45 = vpop.permute.xlu1 %1417 }
 0x19d   : > { %1493 = vst.msk [vmem:[#allocation4 + $0xa8] sm:$0xff] %vm1471_vm5, %v1418_v45 }
 0x19e   : > { %v1416_v54 = vpop.permute.xlu0 %1415  ;;  %1590 = vrot.lane.b32.xlu1 %v6383_v32, %s5645_s20 }
 0x19f   : > { %1492 = vst.msk [vmem:[#allocation4 + $0xa0] sm:$0xff] %vm1471_vm5, %v1416_v54 }
 0x1a0   : > { %1588 = vrot.lane.b32.xlu0 %v6385_v47, %s5645_s20  ;;  %v1768_v31 = vpop.permute.xlu1 %1767 }
 0x1a2   : > { %v1573_v57 = vpop.permute.xlu0 %1572  ;;  %1622 = vrot.lane.b32.xlu1 %v6387_v58, %s5645_s20 }
 0x1a3   : > { %1667 = vst.msk [vmem:[#allocation4 + $0x10] sm:$0xff] %vm1664_vm7, %v1573_v57  ;;  %v6657_v57 = vld [vmem:[#allocation2 + $0xaa] sm:$0xff] }
 0x1a4   : > { %1620 = vrot.lane.b32.xlu0 %v6389_v59, %s5645_s20  ;;  %v1575_v5 = vpop.permute.xlu1 %1574  ;;  %v6688_v59 = vld [vmem:[#allocation2 + $0xc1] sm:$0xff] }
 0x1a5   : > { %1668 = vst.msk [vmem:[#allocation4 + $0x18] sm:$0xff] %vm1664_vm7, %v1575_v5 }
 0x1a6   : > { %v1605_v10 = vpop.permute.xlu0 %1604  ;;  %1861 = vst.msk [vmem:[#allocation4 + $0x18] sm:$0xff] %vm1857_vm8, %v1768_v31  ;;  %1212 = vrot.lane.b32.xlu1 %v6631_v17, %s5642_s18  ;;  %v6652_v31 = vld [vmem:[#allocation2 + $0xb2] sm:$0xff] }
 0x1a7   : > { %1683 = vst.msk [vmem:[#allocation4 + $0x90] sm:$0xff] %vm1664_vm7, %v1605_v10 }
 0x1a8   : > { %1210 = vrot.lane.b32.xlu0 %v6637_v36, %s5642_s18  ;;  %v1607_v58 = vpop.permute.xlu1 %1606 }
 0x1a9   : > { %1684 = vst.msk [vmem:[#allocation4 + $0x98] sm:$0xff] %vm1664_vm7, %v1607_v58  ;;  %v6662_v58 = vld [vmem:[#allocation2 + $0x172] sm:$0xff] }
 0x1aa   : > { %v1766_v37 = vpop.permute.xlu0 %1765  ;;  %1244 = vrot.lane.b32.xlu1 %v6642_v41, %s5642_s18 }
 0x1ab   : > { %1860 = vst.msk [vmem:[#allocation4 + $0x10] sm:$0xff] %vm1857_vm8, %v1766_v37  ;;  %v6667_v37 = vld [vmem:[#allocation2 + $0x16a] sm:$0xff] }
 0x1ac   : > { %1242 = vrot.lane.b32.xlu0 %v6647_v50, %s5642_s18  ;;  %v1197_v45 = vpop.permute.xlu1 %1196 }
 0x1ad   : > { %1286 = vst.msk [vmem:[#allocation4 + $0x38] sm:$0xff] %vm1278_vm4, %v1197_v45 }
 0x1ae   : > { %v1195_v54 = vpop.permute.xlu0 %1194  ;;  %1405 = vrot.lane.b32.xlu1 %v6652_v31, %s5643_s19 }
 0x1af   : > { %1285 = vst.msk [vmem:[#allocation4 + $0x30] sm:$0xff] %vm1278_vm4, %v1195_v54 }
 0x1b0   : > { %1403 = vrot.lane.b32.xlu0 %v6657_v57, %s5643_s19  ;;  %v1229_v5 = vpop.permute.xlu1 %1228 }
 0x1b1   : > { %1302 = vst.msk [vmem:[#allocation4 + $0xb8] sm:$0xff] %vm1278_vm4, %v1229_v5 }
 0x1b2   : > { %v1227_v10 = vpop.permute.xlu0 %1226  ;;  %1437 = vrot.lane.b32.xlu1 %v6662_v58, %s5643_s19 }
 0x1b3   : > { %1301 = vst.msk [vmem:[#allocation4 + $0xb0] sm:$0xff] %vm1278_vm4, %v1227_v10 }
 0x1b4   : > { %1435 = vrot.lane.b32.xlu0 %v6667_v37, %s5643_s19  ;;  %v1390_v45 = vpop.permute.xlu1 %1389 }
 0x1b5   : > { %1479 = vst.msk [vmem:[#allocation4 + $0x38] sm:$0xff] %vm1471_vm5, %v1390_v45 }
 0x1b6   : > { %v1388_v54 = vpop.permute.xlu0 %1387  ;;  %1594 = vrot.lane.b32.xlu1 %v6403_v33, %s5645_s20 }
 0x1b7   : > { %1478 = vst.msk [vmem:[#allocation4 + $0x30] sm:$0xff] %vm1471_vm5, %v1388_v54 }
 0x1b8   : > { %1592 = vrot.lane.b32.xlu0 %v6405_v48, %s5645_s20  ;;  %v1422_v5 = vpop.permute.xlu1 %1421 }
 0x1b9   : > { %1495 = vst.msk [vmem:[#allocation4 + $0xb8] sm:$0xff] %vm1471_vm5, %v1422_v5 }
 0x1ba   : > { %v1420_v10 = vpop.permute.xlu0 %1419  ;;  %1626 = vrot.lane.b32.xlu1 %v6407_v49, %s5645_s20 }
 0x1bb   : > { %1494 = vst.msk [vmem:[#allocation4 + $0xb0] sm:$0xff] %vm1471_vm5, %v1420_v10  ;;  %v6693_v10 = vld [vmem:[#allocation2 + $0xca] sm:$0xff] }
 0x1bc   : > { %1624 = vrot.lane.b32.xlu0 %v6409_v60, %s5645_s20  ;;  %v1772_v45 = vpop.permute.xlu1 %1771  ;;  %v6699_v60 = vld [vmem:[#allocation2 + $0xc2] sm:$0xff] }
 0x1be   : > { %v1577_v54 = vpop.permute.xlu0 %1576  ;;  %1216 = vrot.lane.b32.xlu1 %v6683_v26, %s5642_s18 }
 0x1bf   : > { %1669 = vst.msk [vmem:[#allocation4 + $0x20] sm:$0xff] %vm1664_vm7, %v1577_v54 }
 0x1c0   : > { %1214 = vrot.lane.b32.xlu0 %v6688_v59, %s5642_s18  ;;  %v1579_v5 = vpop.permute.xlu1 %1578 }
 0x1c1   : > { %1670 = vst.msk [vmem:[#allocation4 + $0x28] sm:$0xff] %vm1664_vm7, %v1579_v5 }
 0x1c2   : > { %v1609_v49 = vpop.permute.xlu0 %1608  ;;  %1863 = vst.msk [vmem:[#allocation4 + $0x28] sm:$0xff] %vm1857_vm8, %v1772_v45  ;;  %1409 = vrot.lane.b32.xlu1 %v6693_v10, %s5643_s19 }
 0x1c3   : > { %1685 = vst.msk [vmem:[#allocation4 + $0xa0] sm:$0xff] %vm1664_vm7, %v1609_v49  ;;  %v1535_v49 = vld [vmem:[#allocation2 + $0x188] sm:$0xff] }
 0x1c4   : > { %1407 = vrot.lane.b32.xlu0 %v6699_v60, %s5643_s19  ;;  %v1611_v54 = vpop.permute.xlu1 %1610 }
 0x1c5   : > { %1686 = vst.msk [vmem:[#allocation4 + $0xa8] sm:$0xff] %vm1664_vm7, %v1611_v54 }
 0x1c6   : > { %v1770_v56 = vpop.permute.xlu0 %1769  ;;  %1598 = vrot.lane.b32.xlu1 %v6420_v63, %s5645_s20 }
 0x1c7   : > { %1862 = vst.msk [vmem:[#allocation4 + $0x20] sm:$0xff] %vm1857_vm8, %v1770_v56 }
 0x1c8   : > { %1596 = vrot.lane.b32.xlu0 %v6425_v1, %s5645_s20  ;;  %v1201_v45 = vpop.permute.xlu1 %1200 }
 0x1c9   : > { %1288 = vst.msk [vmem:[#allocation4 + $0x48] sm:$0xff] %vm1278_vm4, %v1201_v45 }
 0x1ca   : > { %v1199_v5 = vpop.permute.xlu0 %1198  ;;  %1630 = vrot.lane.b32.xlu1 %v1535_v49, %s5645_s20 }
 0x1cb   : > { %1287 = vst.msk [vmem:[#allocation4 + $0x40] sm:$0xff] %vm1278_vm4, %v1199_v5 }
 0x1cc   : > { %1628 = vrot.lane.b32.xlu0 %v1534_v46, %s5645_s20  ;;  %v1233_v54 = vpop.permute.xlu1 %1232 }
 0x1cd   : > { %1304 = vst.msk [vmem:[#allocation4 + $0xc8] sm:$0xff] %vm1278_vm4, %v1233_v54 }
 0x1ce   : > { %v1231_v56 = vpop.permute.xlu0 %1230  ;;  %1783 = vrot.lane.b32.xlu1 %v6580_v8, %s5644_s22 }
 0x1cf   : > { %1303 = vst.msk [vmem:[#allocation4 + $0xc0] sm:$0xff] %vm1278_vm4, %v1231_v56 }
 0x1d0   : > { %1781 = vrot.lane.b32.xlu0 %v6585_v9, %s5644_s22  ;;  %v1394_v45 = vpop.permute.xlu1 %1393 }
 0x1d1   : > { %1481 = vst.msk [vmem:[#allocation4 + $0x48] sm:$0xff] %vm1471_vm5, %v1394_v45  ;;  %v1728_v45 = vld [vmem:[#allocation2 + $0x189] sm:$0xff] }
 0x1d2   : > { %v1392_v5 = vpop.permute.xlu0 %1391  ;;  %1787 = vrot.lane.b32.xlu1 %v6631_v17, %s5644_s22 }
 0x1d3   : > { %1480 = vst.msk [vmem:[#allocation4 + $0x40] sm:$0xff] %vm1471_vm5, %v1392_v5 }
 0x1d4   : > { %1785 = vrot.lane.b32.xlu0 %v6637_v36, %s5644_s22  ;;  %v1426_v46 = vpop.permute.xlu1 %1425 }
 0x1d5   : > { %1497 = vst.msk [vmem:[#allocation4 + $0xc8] sm:$0xff] %vm1471_vm5, %v1426_v46 }
 0x1d6   : > { %v1424_v49 = vpop.permute.xlu0 %1423  ;;  %1791 = vrot.lane.b32.xlu1 %v6683_v26, %s5644_s22 }
 0x1d7   : > { %1496 = vst.msk [vmem:[#allocation4 + $0xc0] sm:$0xff] %vm1471_vm5, %v1424_v49 }
 0x1d8   : > { %1789 = vrot.lane.b32.xlu0 %v6688_v59, %s5644_s22  ;;  %v1776_v8 = vpop.permute.xlu1 %1775 }
 0x1da   : > { %v1581_v9 = vpop.permute.xlu0 %1580  ;;  %1795 = vrot.lane.b32.xlu1 %v6215_v6, %s5644_s22 }
 0x1db   : > { %1671 = vst.msk [vmem:[#allocation4 + $0x30] sm:$0xff] %vm1664_vm7, %v1581_v9 }
 0x1dc   : > { %1793 = vrot.lane.b32.xlu0 %v6217_v7, %s5644_s22  ;;  %v1583_v17 = vpop.permute.xlu1 %1582 }
 0x1dd   : > { %1672 = vst.msk [vmem:[#allocation4 + $0x38] sm:$0xff] %vm1664_vm7, %v1583_v17 }
 0x1de   : > { %v1613_v36 = vpop.permute.xlu0 %1612  ;;  %1865 = vst.msk [vmem:[#allocation4 + $0x38] sm:$0xff] %vm1857_vm8, %v1776_v8  ;;  %1799 = vrot.lane.b32.xlu1 %v6423_v0, %s5644_s22  ;;  %v6831_v8 = vld [vmem:[#allocation2 + $0xda] sm:$0xff] }
 0x1df   : > { %1687 = vst.msk [vmem:[#allocation4 + $0xb0] sm:$0xff] %vm1664_vm7, %v1613_v36  ;;  %v6836_v36 = vld [vmem:[#allocation2 + $0xfa] sm:$0xff] }
 0x1e0   : > { %1797 = vrot.lane.b32.xlu0 %v6429_v2, %s5644_s22  ;;  %v1615_v54 = vpop.permute.xlu1 %1614 }
 0x1e1   : > { %1688 = vst.msk [vmem:[#allocation4 + $0xb8] sm:$0xff] %vm1664_vm7, %v1615_v54  ;;  %v6841_v54 = vld [vmem:[#allocation2 + $0xf2] sm:$0xff] }
 0x1e2   : > { %v1774_v6 = vpop.permute.xlu0 %1773  ;;  %1803 = vrot.lane.b32.xlu1 %v6459_v11, %s5644_s22 }
 0x1e3   : > { %1864 = vst.msk [vmem:[#allocation4 + $0x30] sm:$0xff] %vm1857_vm8, %v1774_v6 }
 0x1e4   : > { %1801 = vrot.lane.b32.xlu0 %v6461_v12, %s5644_s22  ;;  %v1205_v7 = vpop.permute.xlu1 %1204 }
 0x1e5   : > { %1290 = vst.msk [vmem:[#allocation4 + $0x58] sm:$0xff] %vm1278_vm4, %v1205_v7 }
 0x1e6   : > { %v1203_v56 = vpop.permute.xlu0 %1202  ;;  %1807 = vrot.lane.b32.xlu1 %v6495_v19, %s5644_s22 }
 0x1e7   : > { %1289 = vst.msk [vmem:[#allocation4 + $0x50] sm:$0xff] %vm1278_vm4, %v1203_v56 }
 0x1e8   : > { %1805 = vrot.lane.b32.xlu0 %v6497_v20, %s5644_s22  ;;  %v1237_v0 = vpop.permute.xlu1 %1236 }
 0x1e9   : > { %1306 = vst.msk [vmem:[#allocation4 + $0xd8] sm:$0xff] %vm1278_vm4, %v1237_v0 }
 0x1ea   : > { %v1235_v2 = vpop.permute.xlu0 %1234  ;;  %1811 = vrot.lane.b32.xlu1 %v6532_v39, %s5644_s22 }
 0x1eb   : > { %1305 = vst.msk [vmem:[#allocation4 + $0xd0] sm:$0xff] %vm1278_vm4, %v1235_v2 }
 0x1ec   : > { %1809 = vrot.lane.b32.xlu0 %v6537_v27, %s5644_s22  ;;  %v1398_v11 = vpop.permute.xlu1 %1397 }
 0x1ed   : > { %1483 = vst.msk [vmem:[#allocation4 + $0x58] sm:$0xff] %vm1471_vm5, %v1398_v11 }
 0x1ee   : > { %v1396_v12 = vpop.permute.xlu0 %1395  ;;  %1815 = vrot.lane.b32.xlu1 %v6590_v18, %s5644_s22  ;;  %v1727_v18 = vld [vmem:[#allocation2 + $0x181] sm:$0xff] }
 0x1ef   : > { %1482 = vst.msk [vmem:[#allocation4 + $0x50] sm:$0xff] %vm1471_vm5, %v1396_v12  ;;  %v2085_v12 = vld [vmem:[#allocation2 + $0x38] sm:$0xff] }
 0x1f0   : > { %1813 = vrot.lane.b32.xlu0 %v6595_v25, %s5644_s22  ;;  %v1430_v19 = vpop.permute.xlu1 %1429 }
 0x1f1   : > { %1499 = vst.msk [vmem:[#allocation4 + $0xd8] sm:$0xff] %vm1471_vm5, %v1430_v19 }
 0x1f2   : > { %v1428_v20 = vpop.permute.xlu0 %1427  ;;  %1819 = vrot.lane.b32.xlu1 %v6642_v41, %s5644_s22 }
 0x1f3   : > { %1498 = vst.msk [vmem:[#allocation4 + $0xd0] sm:$0xff] %vm1471_vm5, %v1428_v20  ;;  %v2087_v20 = vld [vmem:[#allocation2 + $0x50] sm:$0xff] }
 0x1f4   : > { %1817 = vrot.lane.b32.xlu0 %v6647_v50, %s5644_s22  ;;  %v1780_v39 = vpop.permute.xlu1 %1779 }
 0x1f6   : > { %v1585_v27 = vpop.permute.xlu0 %1584  ;;  %1823 = vrot.lane.b32.xlu1 %v1728_v45, %s5644_s22 }
 0x1f7   : > { %1673 = vst.msk [vmem:[#allocation4 + $0x40] sm:$0xff] %vm1664_vm7, %v1585_v27 }
 0x1f8   : > { %1821 = vrot.lane.b32.xlu0 %v1727_v18, %s5644_s22  ;;  %v1587_v25 = vpop.permute.xlu1 %1586 }
 0x1f9   : > { %1674 = vst.msk [vmem:[#allocation4 + $0x48] sm:$0xff] %vm1664_vm7, %v1587_v25 }
 0x1fa   : > { %v1617_v5 = vpop.permute.xlu0 %1616  ;;  %1867 = vst.msk [vmem:[#allocation4 + $0x48] sm:$0xff] %vm1857_vm8, %v1780_v39  ;;  %1956 = vrot.lane.b32.xlu1 %v6264_v23, %s5646_s21  ;;  %v2086_v39 = vld [vmem:[#allocation2 + $0x48] sm:$0xff] }
 0x1fb   : > { %1689 = vst.msk [vmem:[#allocation4 + $0xc0] sm:$0xff] %vm1664_vm7, %v1617_v5 }
 0x1fc   : > { %1954 = vrot.lane.b32.xlu0 %v6278_v34, %s5646_s21  ;;  %v1619_v41 = vpop.permute.xlu1 %1618 }
 0x1fd   : > { %1690 = vst.msk [vmem:[#allocation4 + $0xc8] sm:$0xff] %vm1664_vm7, %v1619_v41 }
 0x1fe   : > { %v1778_v50 = vpop.permute.xlu0 %1777  ;;  %1960 = vrot.lane.b32.xlu1 %v6437_v3, %s5646_s21 }
 0x1ff   : > { %1866 = vst.msk [vmem:[#allocation4 + $0x40] sm:$0xff] %vm1857_vm8, %v1778_v50 }
 0x200   : > { %1958 = vrot.lane.b32.xlu0 %v6441_v4, %s5646_s21  ;;  %v1209_v46 = vpop.permute.xlu1 %1208 }
 0x201   : > { %1292 = vst.msk [vmem:[#allocation4 + $0x68] sm:$0xff] %vm1278_vm4, %v1209_v46 }
 0x202   : > { %v1207_v49 = vpop.permute.xlu0 %1206  ;;  %1964 = vrot.lane.b32.xlu1 %v6467_v13, %s5646_s21 }
 0x203   : > { %1291 = vst.msk [vmem:[#allocation4 + $0x60] sm:$0xff] %vm1278_vm4, %v1207_v49  ;;  %v5620_v49 = vld [vmem:[%s8342_s3] sm:$0xff]  }
 0x204   : > { %1962 = vrot.lane.b32.xlu0 %v6471_v14, %s5646_s21  ;;  %v1241_v23 = vpop.permute.xlu1 %1240  ;;  %5483 = vmatprep.subr.bf16.mxu1 %v5620_v49 }
 0x205   : > { %1308 = vst.msk [vmem:[#allocation4 + $0xe8] sm:$0xff] %vm1278_vm4, %v1241_v23  ;;  %5484 = vmatpush3.bf16.msra.mxu1 %v5620_v49 }
 0x206   : > { %v1239_v34 = vpop.permute.xlu0 %1238  ;;  %1968 = vrot.lane.b32.xlu1 %v6503_v21, %s5646_s21 }
 0x207   : > { %1307 = vst.msk [vmem:[#allocation4 + $0xe0] sm:$0xff] %vm1278_vm4, %v1239_v34 }
 0x208   : > { %1966 = vrot.lane.b32.xlu0 %v6507_v22, %s5646_s21  ;;  %v1402_v3 = vpop.permute.xlu1 %1401 }
 0x209   : > { %1485 = vst.msk [vmem:[#allocation4 + $0x68] sm:$0xff] %vm1471_vm5, %v1402_v3  ;;  %v2103_v3 = vld [vmem:[#allocation2 + $0x110] sm:$0xff] }
 0x20a   : > { %v1400_v4 = vpop.permute.xlu0 %1399  ;;  %1972 = vrot.lane.b32.xlu1 %v6542_v42, %s5646_s21 }
 0x20b   : > { %1484 = vst.msk [vmem:[#allocation4 + $0x60] sm:$0xff] %vm1471_vm5, %v1400_v4  ;;  %v2102_v4 = vld [vmem:[#allocation2 + $0x108] sm:$0xff] }
 0x20c   : > { %1970 = vrot.lane.b32.xlu0 %v6547_v28, %s5646_s21  ;;  %v1434_v13 = vpop.permute.xlu1 %1433 }
 0x20d   : > { %1501 = vst.msk [vmem:[#allocation4 + $0xe8] sm:$0xff] %vm1471_vm5, %v1434_v13  ;;  %v5621_v13 = vld [vmem:[%s8342_s3 + $0x8] sm:$0xff]  }
 0x20e   : > { %v1432_v14 = vpop.permute.xlu0 %1431  ;;  %1976 = vrot.lane.b32.xlu1 %v6600_v38, %s5646_s21  ;;  %5485 = vmatprep.subr.bf16.mxu1 %v5621_v13 }
 0x20f   : > { %1500 = vst.msk [vmem:[#allocation4 + $0xe0] sm:$0xff] %vm1471_vm5, %v1432_v14  ;;  %5486 = vmatpush3.bf16.msra.mxu1 %v5621_v13  ;;  %v2287_v13 = vld [vmem:[#allocation2 + $0xa9] sm:$0xff] }
 0x210   : > { %1974 = vrot.lane.b32.xlu0 %v6605_v40, %s5646_s21  ;;  %v1591_v21 = vpop.permute.xlu1 %1590 }
 0x211   : > { %1676 = vst.msk [vmem:[#allocation4 + $0x58] sm:$0xff] %vm1664_vm7, %v1591_v21 }
 0x212   : > { %v1589_v22 = vpop.permute.xlu0 %1588  ;;  %1980 = vrot.lane.b32.xlu1 %v6652_v31, %s5646_s21  ;;  %v6826_v31 = vld [vmem:[#allocation2 + $0xe2] sm:$0xff] }
 0x213   : > { %1675 = vst.msk [vmem:[#allocation4 + $0x50] sm:$0xff] %vm1664_vm7, %v1589_v22  ;;  %v2105_v22 = vld [vmem:[#allocation2 + $0x128] sm:$0xff] }
 0x214   : > { %1978 = vrot.lane.b32.xlu0 %v6657_v57, %s5646_s21  ;;  %v1623_v42 = vpop.permute.xlu1 %1622 }
 0x215   : > { %1692 = vst.msk [vmem:[#allocation4 + $0xd8] sm:$0xff] %vm1664_vm7, %v1623_v42  ;;  %v2104_v42 = vld [vmem:[#allocation2 + $0x120] sm:$0xff] }
 0x216   : > { %v1621_v28 = vpop.permute.xlu0 %1620  ;;  %1984 = vrot.lane.b32.xlu1 %v6693_v10, %s5646_s21 }
 0x217   : > { %1691 = vst.msk [vmem:[#allocation4 + $0xd0] sm:$0xff] %vm1664_vm7, %v1621_v28  ;;  %v5622_v28 = vld [vmem:[%s8342_s3 + $0x10] sm:$0xff]  }
 0x218   : > { %1982 = vrot.lane.b32.xlu0 %v6699_v60, %s5646_s21  ;;  %v1213_v38 = vpop.permute.xlu1 %1212  ;;  %5487 = vmatprep.subr.bf16.mxu1 %v5622_v28 }
 0x219   : > { %1294 = vst.msk [vmem:[#allocation4 + $0x78] sm:$0xff] %vm1278_vm4, %v1213_v38  ;;  %5488 = vmatpush3.bf16.msra.mxu1 %v5622_v28  ;;  %v2288_v28 = vld [vmem:[#allocation2 + $0xb1] sm:$0xff] }
 0x21a   : > { %v1211_v40 = vpop.permute.xlu0 %1210  ;;  %1988 = vrot.lane.b32.xlu1 %v6826_v31, %s5646_s21 }
 0x21b   : > { %1293 = vst.msk [vmem:[#allocation4 + $0x70] sm:$0xff] %vm1278_vm4, %v1211_v40 }
 0x21c   : > { %1986 = vrot.lane.b32.xlu0 %v6831_v8, %s5646_s21  ;;  %v1245_v9 = vpop.permute.xlu1 %1244 }
 0x21d   : > { %1310 = vst.msk [vmem:[#allocation4 + $0xf8] sm:$0xff] %vm1278_vm4, %v1245_v9  ;;  %v8361_v9 = vld [vmem:[#allocation7_spill] sm:$0xff] }
 0x21e   : > { %v1243_v17 = vpop.permute.xlu0 %1242  ;;  %1992 = vrot.lane.b32.xlu1 %v6836_v36, %s5646_s21 }
 0x21f   : > { %1309 = vst.msk [vmem:[#allocation4 + $0xf0] sm:$0xff] %vm1278_vm4, %v1243_v17  ;;  %v8362_v17 = vld [vmem:[#allocation6_spill] sm:$0xff] }
 0x220   : > { %1990 = vrot.lane.b32.xlu0 %v6841_v54, %s5646_s21  ;;  %v1406_v6 = vpop.permute.xlu1 %1405 }
 0x221   : > { %1487 = vst.msk [vmem:[#allocation4 + $0x78] sm:$0xff] %vm1471_vm5, %v1406_v6  ;;  %v5623_v6 = vld [vmem:[%s8342_s3 + $0x18] sm:$0xff]  }
 0x222   : > { %v1404_v7 = vpop.permute.xlu0 %1403  ;;  %1996 = vrot.lane.b32.xlu1 %v6475_v15, %s5646_s21  ;;  %5489 = vmatprep.subr.bf16.mxu1 %v5623_v6 }
 0x223   : > { %1486 = vst.msk [vmem:[#allocation4 + $0x70] sm:$0xff] %vm1471_vm5, %v1404_v7  ;;  %5490 = vmatpush3.bf16.msra.mxu1 %v5623_v6 }
 0x224   : > { %1994 = vrot.lane.b32.xlu0 %v6479_v16, %s5646_s21  ;;  %v1438_v56 = vpop.permute.xlu1 %1437 }
 0x225   : > { %1503 = vst.msk [vmem:[#allocation4 + $0xf8] sm:$0xff] %vm1471_vm5, %v1438_v56 }
 0x226   : > { %v1436_v0 = vpop.permute.xlu0 %1435  ;;  %2000 = vrot.lane.b32.xlu1 %v6511_v24, %s5646_s21 }
 0x227   : > { %1502 = vst.msk [vmem:[#allocation4 + $0xf0] sm:$0xff] %vm1471_vm5, %v1436_v0  ;;  %v2277_v0 = vld [vmem:[#allocation2 + $0x31] sm:$0xff] }
 0x228   : > { %1998 = vrot.lane.b32.xlu0 %v6515_v35, %s5646_s21  ;;  %v1595_v2 = vpop.permute.xlu1 %1594 }
 0x229   : > { %1678 = vst.msk [vmem:[#allocation4 + $0x68] sm:$0xff] %vm1664_vm7, %v1595_v2  ;;  %v8363_v2 = vld [vmem:[#allocation8_spill] sm:$0xff] }
 0x22a   : > { %v1593_v11 = vpop.permute.xlu0 %1592  ;;  %2004 = vrot.lane.b32.xlu1 %v6552_v53, %s5646_s21 }
 0x22b   : > { %1677 = vst.msk [vmem:[#allocation4 + $0x60] sm:$0xff] %vm1664_vm7, %v1593_v11  ;;  %v5624_v11 = vld [vmem:[%s8342_s3 + $0x20] sm:$0xff]  }
 0x22c   : > { %2002 = vrot.lane.b32.xlu0 %v6557_v29, %s5646_s21  ;;  %v1627_v15 = vpop.permute.xlu1 %1626  ;;  %5491 = vmatprep.subr.bf16.mxu1 %v5624_v11 }
 0x22d   : > { %1694 = vst.msk [vmem:[#allocation4 + $0xe8] sm:$0xff] %vm1664_vm7, %v1627_v15  ;;  %5492 = vmatpush3.bf16.msra.mxu1 %v5624_v11 }
 0x22e   : > { %v1625_v16 = vpop.permute.xlu0 %1624  ;;  %2008 = vrot.lane.b32.xlu1 %v6610_v52, %s5646_s21  ;;  %v6876_v52 = vld [vmem:[#allocation2 + $0x18a] sm:$0xff] }
 0x22f   : > { %1693 = vst.msk [vmem:[#allocation4 + $0xe0] sm:$0xff] %vm1664_vm7, %v1625_v16 }
 0x230   : > { %2006 = vrot.lane.b32.xlu0 %v6615_v44, %s5646_s21  ;;  %v1217_v24 = vpop.permute.xlu1 %1216  ;;  %v6883_v44 = vld [vmem:[#allocation2 + $0x182] sm:$0xff] }
 0x231   : > { %1296 = vst.msk [vmem:[#allocation4 + $0x88] sm:$0xff] %vm1278_vm4, %v1217_v24  ;;  %v2279_v24 = vld [vmem:[#allocation2 + $0x49] sm:$0xff] }
 0x232   : > { %v1215_v35 = vpop.permute.xlu0 %1214  ;;  %2012 = vrot.lane.b32.xlu1 %v6662_v58, %s5646_s21 }
 0x233   : > { %1295 = vst.msk [vmem:[#allocation4 + $0x80] sm:$0xff] %vm1278_vm4, %v1215_v35  ;;  %v2278_v35 = vld [vmem:[#allocation2 + $0x39] sm:$0xff]  ;;  %vm3733_vm4 = vcmask 261312  }
 0x234   : > { %2010 = vrot.lane.b32.xlu0 %v6667_v37, %s5646_s21  ;;  %v1410_v53 = vpop.permute.xlu1 %1409 }
 0x235   : > { %1489 = vst.msk [vmem:[#allocation4 + $0x88] sm:$0xff] %vm1471_vm5, %v1410_v53  ;;  %v5625_v53 = vld [vmem:[%s8342_s3 + $0x28] sm:$0xff]  }
 0x236   : > { %v1408_v29 = vpop.permute.xlu0 %1407  ;;  %1682 = vst.msk [vmem:[#allocation4 + $0x88] sm:$0xff] %vm1664_vm7, %v6578_v62  ;;  %2016 = vrot.lane.b32.xlu1 %v6876_v52, %s5646_s21  ;;  %v2084_v62 = vld [vmem:[#allocation2 + $0x30] sm:$0xff]  ;;  %5493 = vmatprep.subr.bf16.mxu1 %v5625_v53 }
 0x237   : > { %1488 = vst.msk [vmem:[#allocation4 + $0x80] sm:$0xff] %vm1471_vm5, %v1408_v29  ;;  %5494 = vmatpush3.bf16.msra.mxu1 %v5625_v53  ;;  %v2295_v53 = vld [vmem:[#allocation2 + $0x109] sm:$0xff]  ;;  %vm3926_vm5 = vcmask 326912  }
 0x238   : > { %1681 = vst.msk [vmem:[#allocation4 + $0x80] sm:$0xff] %vm1664_vm7, %v6572_v61  ;;  %2014 = vrot.lane.b32.xlu0 %v6883_v44, %s5646_s21  ;;  %v1599_v58 = vpop.permute.xlu1 %1598  ;;  %s5649_s21 = smov 96  }
 0x239   : > { %1680 = vst.msk [vmem:[#allocation4 + $0x78] sm:$0xff] %vm1664_vm7, %v1599_v58 }
 0x23a   : > { %v1597_v37 = vpop.permute.xlu0 %1596  ;;  %2150 = vrot.lane.b32.xlu1 %v2085_v12, %s5647_s24  ;;  %v2280_v12 = vld [vmem:[#allocation2 + $0x51] sm:$0xff] }
 0x23b   : > { %1679 = vst.msk [vmem:[#allocation4 + $0x70] sm:$0xff] %vm1664_vm7, %v1597_v37  ;;  %v2470_v37 = vld [vmem:[#allocation2 + $0x32] sm:$0xff] }
 0x23c   : > { %2148 = vrot.lane.b32.xlu0 %v2084_v62, %s5647_s24  ;;  %v1631_v19 = vpop.permute.xlu1 %1630  ;;  %v5626_v62 = vld [vmem:[%s8342_s3 + $0x30] sm:$0x3f]  }
 0x23d   : > { %1696 = vst.msk [vmem:[#allocation4 + $0xf8] sm:$0xff] %vm1664_vm7, %v1631_v19  ;;  %5595 = vmatprep.subr.msk.bf16.mxu1 %vm2815_vm10, %v5626_v62 }
 0x23e   : > { %v1629_v61 = vpop.permute.xlu0 %1628  ;;  %2154 = vrot.lane.b32.xlu1 %v2087_v20, %s5647_s24  ;;  %v2472_v20 = vld [vmem:[#allocation2 + $0x4a] sm:$0xff] }
 0x23f   : > { %1695 = vst.msk [vmem:[#allocation4 + $0xf0] sm:$0xff] %vm1664_vm7, %v1629_v61  ;;  %vm4313_vm7 = vcmask 458112  }
 0x240   : > { %2152 = vrot.lane.b32.xlu0 %v2086_v39, %s5647_s24  ;;  %v1784_v27 = vpop.permute.xlu1 %1783  ;;  %v2817_v39 = vsel %vm2815_vm10, %v5626_v62, 0  ;;  %v2488_v62 = vld [vmem:[#allocation2 + $0x10a] sm:$0xff]  ;;  %vm4816_vm10 = vcmask 588800  }
 0x241   : > { %1869 = vst.msk [vmem:[#allocation4 + $0x58] sm:$0xff] %vm1857_vm8, %v1784_v27  ;;  %v2471_v27 = vld [vmem:[#allocation2 + $0x3a] sm:$0xff]  ;;  %5496 = vmatpush3.bf16.msra.mxu1 %v2817_v39 }
 0x242   : > { %v1782_v45 = vpop.permute.xlu0 %1781  ;;  %2158 = vrot.lane.b32.xlu1 %v6321_v51, %s5647_s24 }
 0x243   : > { %1868 = vst.msk [vmem:[#allocation4 + $0x50] sm:$0xff] %vm1857_vm8, %v1782_v45 }
 0x244   : > { %2156 = vrot.lane.b32.xlu0 %v6319_v43, %s5647_s24  ;;  %v1788_v18 = vpop.permute.xlu1 %1787 }
 0x245   : > { %1871 = vst.msk [vmem:[#allocation4 + $0x68] sm:$0xff] %vm1857_vm8, %v1788_v18 }
 0x246   : > { %v1786_v25 = vpop.permute.xlu0 %1785  ;;  %2162 = vrot.lane.b32.xlu1 %v6353_v55, %s5647_s24 }
 0x247   : > { %1870 = vst.msk [vmem:[#allocation4 + $0x60] sm:$0xff] %vm1857_vm8, %v1786_v25  ;;  %v2281_v25 = vld [vmem:[#allocation2 + $0x61] sm:$0xff] }
 0x248   : > { %2160 = vrot.lane.b32.xlu0 %v6351_v30, %s5647_s24  ;;  %v1792_v5 = vpop.permute.xlu1 %1791 }
 0x249   : > { %1873 = vst.msk [vmem:[#allocation4 + $0x78] sm:$0xff] %vm1857_vm8, %v1792_v5  ;;  %v2473_v5 = vld [vmem:[#allocation2 + $0x52] sm:$0xff] }
 0x24a   : > { %v1790_v41 = vpop.permute.xlu0 %1789  ;;  %2166 = vrot.lane.b32.xlu1 %v6383_v32, %s5647_s24 }
 0x24b   : > { %1872 = vst.msk [vmem:[#allocation4 + $0x70] sm:$0xff] %vm1857_vm8, %v1790_v41 }
 0x24c   : > { %2164 = vrot.lane.b32.xlu0 %v6385_v47, %s5647_s24  ;;  %v1796_v43 = vpop.permute.xlu1 %1795 }
 0x24d   : > { %1875 = vst.msk [vmem:[#allocation4 + $0x88] sm:$0xff] %vm1857_vm8, %v1796_v43 }
 0x24e   : > { %v1794_v51 = vpop.permute.xlu0 %1793  ;;  %2170 = vrot.lane.b32.xlu1 %v6403_v33, %s5647_s24  ;;  %v2099_v33 = vld [vmem:[#allocation2 + $0xe0] sm:$0xff] }
 0x24f   : > { %1874 = vst.msk [vmem:[#allocation4 + $0x80] sm:$0xff] %vm1857_vm8, %v1794_v51  ;;  %v2283_v51 = vld [vmem:[#allocation2 + $0x79] sm:$0xff] }
 0x250   : > { %2168 = vrot.lane.b32.xlu0 %v6405_v48, %s5647_s24  ;;  %v1800_v30 = vpop.permute.xlu1 %1799  ;;  %v2098_v48 = vld [vmem:[#allocation2 + $0xd8] sm:$0xff] }
 0x251   : > { %1877 = vst.msk [vmem:[#allocation4 + $0x98] sm:$0xff] %vm1857_vm8, %v1800_v30  ;;  %v2282_v30 = vld [vmem:[#allocation2 + $0x69] sm:$0xff] }
 0x252   : > { %v1798_v55 = vpop.permute.xlu0 %1797  ;;  %2174 = vrot.lane.b32.xlu1 %v6420_v63, %s5647_s24  ;;  %v2101_v63 = vld [vmem:[#allocation2 + $0xf8] sm:$0xff] }
 0x253   : > { %1876 = vst.msk [vmem:[#allocation4 + $0x90] sm:$0xff] %vm1857_vm8, %v1798_v55 }
 0x254   : > { %2172 = vrot.lane.b32.xlu0 %v6425_v1, %s5647_s24  ;;  %v1804_v32 = vpop.permute.xlu1 %1803  ;;  %v2100_v1 = vld [vmem:[#allocation2 + $0xf0] sm:$0xff] }
 0x255   : > { %1879 = vst.msk [vmem:[#allocation4 + $0xa8] sm:$0xff] %vm1857_vm8, %v1804_v32 }
 0x256   : > { %v1802_v47 = vpop.permute.xlu0 %1801  ;;  %2178 = vrot.lane.b32.xlu1 %v2099_v33, %s5647_s24  ;;  %v2284_v33 = vld [vmem:[#allocation2 + $0x81] sm:$0xff] }
 0x257   : > { %1878 = vst.msk [vmem:[#allocation4 + $0xa0] sm:$0xff] %vm1857_vm8, %v1802_v47  ;;  %v2474_v47 = vld [vmem:[#allocation2 + $0x62] sm:$0xff] }
 0x258   : > { %2176 = vrot.lane.b32.xlu0 %v2098_v48, %s5647_s24  ;;  %v1808_v50 = vpop.permute.xlu1 %1807 }
 0x259   : > { %1881 = vst.msk [vmem:[#allocation4 + $0xb8] sm:$0xff] %vm1857_vm8, %v1808_v50 }
 0x25a   : > { %v1806_v46 = vpop.permute.xlu0 %1805  ;;  %2182 = vrot.lane.b32.xlu1 %v2101_v63, %s5647_s24  ;;  %v2475_v63 = vld [vmem:[#allocation2 + $0x6a] sm:$0xff] }
 0x25b   : > { %1880 = vst.msk [vmem:[#allocation4 + $0xb0] sm:$0xff] %vm1857_vm8, %v1806_v46  ;;  %v2476_v46 = vld [vmem:[#allocation2 + $0x7a] sm:$0xff] }
 0x25c   : > { %2180 = vrot.lane.b32.xlu0 %v2100_v1, %s5647_s24  ;;  %v1812_v23 = vpop.permute.xlu1 %1811 }
 0x25d   : > { %1883 = vst.msk [vmem:[#allocation4 + $0xc8] sm:$0xff] %vm1857_vm8, %v1812_v23  ;;  %v2285_v23 = vld [vmem:[#allocation2 + $0x91] sm:$0xff] }
 0x25e   : > { %v1810_v34 = vpop.permute.xlu0 %1809  ;;  %2186 = vrot.lane.b32.xlu1 %v2103_v3, %s5647_s24 }
 0x25f   : > { %1882 = vst.msk [vmem:[#allocation4 + $0xc0] sm:$0xff] %vm1857_vm8, %v1810_v34  ;;  %v2477_v34 = vld [vmem:[#allocation2 + $0x82] sm:$0xff] }
 0x260   : > { %2184 = vrot.lane.b32.xlu0 %v2102_v4, %s5647_s24  ;;  %v1816_v14 = vpop.permute.xlu1 %1815 }
 0x261   : > { %1885 = vst.msk [vmem:[#allocation4 + $0xd8] sm:$0xff] %vm1857_vm8, %v1816_v14  ;;  %v2286_v14 = vld [vmem:[#allocation2 + $0x99] sm:$0xff] }
 0x262   : > { %v1814_v21 = vpop.permute.xlu0 %1813  ;;  %2190 = vrot.lane.b32.xlu1 %v2105_v22, %s5647_s24 }
 0x263   : > { %1884 = vst.msk [vmem:[#allocation4 + $0xd0] sm:$0xff] %vm1857_vm8, %v1814_v21 }
 0x264   : > { %2188 = vrot.lane.b32.xlu0 %v2104_v42, %s5647_s24  ;;  %v1820_v38 = vpop.permute.xlu1 %1819  ;;  %v2478_v42 = vld [vmem:[#allocation2 + $0x92] sm:$0xff] }
 0x265   : > { %1887 = vst.msk [vmem:[#allocation4 + $0xe8] sm:$0xff] %vm1857_vm8, %v1820_v38 }
 0x266   : > { %v1818_v40 = vpop.permute.xlu0 %1817  ;;  %2194 = vrot.lane.b32.xlu1 %v8361_v9, %s5647_s24  ;;  %v2479_v9 = vld [vmem:[#allocation2 + $0x9a] sm:$0xff] }
 0x267   : > { %1886 = vst.msk [vmem:[#allocation4 + $0xe0] sm:$0xff] %vm1857_vm8, %v1818_v40 }
 0x268   : > { %2192 = vrot.lane.b32.xlu0 %v8362_v17, %s5647_s24  ;;  %v1824_v7 = vpop.permute.xlu1 %1823 }
 0x269   : > { %1889 = vst.msk [vmem:[#allocation4 + $0xf8] sm:$0xff] %vm1857_vm8, %v1824_v7  ;;  %v2481_v7 = vld [vmem:[#allocation2 + $0xb2] sm:$0xff] }
 0x26a   : > { %v1822_v56 = vpop.permute.xlu0 %1821  ;;  %2341 = vrot.lane.b32.xlu1 %v2277_v0, %s5648_s14 }
 0x26b   : > { %1888 = vst.msk [vmem:[#allocation4 + $0xf0] sm:$0xff] %vm1857_vm8, %v1822_v56  ;;  %vm4506_vm8 = vcmask 523712  }
 0x26c   : > { %2196 = vrot.lane.b32.xlu0 %v8363_v2, %s5647_s24  ;;  %v1957_v15 = vpop.permute.xlu1 %1956 }
 0x26d   : > { %2052 = vst.msk [vmem:[#allocation4 + $0x8] sm:$0xff] %vm2050_vm9, %v1957_v15 }
 0x26e   : > { %v1955_v16 = vpop.permute.xlu0 %1954  ;;  %2345 = vrot.lane.b32.xlu1 %v2279_v24, %s5648_s14 }
 0x26f   : > { %2051 = vst.msk [vmem:[#allocation4] sm:$0xff] %vm2050_vm9, %v1955_v16 }
 0x270   : > { %2343 = vrot.lane.b32.xlu0 %v2278_v35, %s5648_s14  ;;  %v1961_v29 = vpop.permute.xlu1 %1960 }
 0x271   : > { %2054 = vst.msk [vmem:[#allocation4 + $0x18] sm:$0xff] %vm2050_vm9, %v1961_v29 }
 0x272   : > { %v1959_v58 = vpop.permute.xlu0 %1958  ;;  %2534 = vrot.lane.b32.xlu1 %v2470_v37, %s5649_s21 }
 0x273   : > { %2053 = vst.msk [vmem:[#allocation4 + $0x10] sm:$0xff] %vm2050_vm9, %v1959_v58 }
 0x274   : > { %2347 = vrot.lane.b32.xlu0 %v2280_v12, %s5648_s14  ;;  %v1965_v19 = vpop.permute.xlu1 %1964 }
 0x275   : > { %2056 = vst.msk [vmem:[#allocation4 + $0x28] sm:$0xff] %vm2050_vm9, %v1965_v19 }
 0x276   : > { %v1963_v61 = vpop.permute.xlu0 %1962  ;;  %2538 = vrot.lane.b32.xlu1 %v2472_v20, %s5649_s21  ;;  %v2489_v20 = vld [vmem:[#allocation2 + $0x112] sm:$0xff] }
 0x277   : > { %2055 = vst.msk [vmem:[#allocation4 + $0x20] sm:$0xff] %vm2050_vm9, %v1963_v61 }
 0x278   : > { %2536 = vrot.lane.b32.xlu0 %v2471_v27, %s5649_s21  ;;  %v1969_v45 = vpop.permute.xlu1 %1968 }
 0x279   : > { %2058 = vst.msk [vmem:[#allocation4 + $0x38] sm:$0xff] %vm2050_vm9, %v1969_v45  ;;  %v2299_v45 = vld [vmem:[#allocation2 + $0x139] sm:$0xff] }
 0x27a   : > { %v1967_v18 = vpop.permute.xlu0 %1966  ;;  %2349 = vrot.lane.b32.xlu1 %v2281_v25, %s5648_s14 }
 0x27b   : > { %2057 = vst.msk [vmem:[#allocation4 + $0x30] sm:$0xff] %vm2050_vm9, %v1967_v18 }
 0x27c   : > { %2540 = vrot.lane.b32.xlu0 %v2473_v5, %s5649_s21  ;;  %v1973_v41 = vpop.permute.xlu1 %1972  ;;  %v2490_v5 = vld [vmem:[#allocation2 + $0x122] sm:$0xff] }
 0x27d   : > { %2060 = vst.msk [vmem:[#allocation4 + $0x48] sm:$0xff] %vm2050_vm9, %v1973_v41  ;;  %v2300_v41 = vld [vmem:[#allocation2 + $0x141] sm:$0xff] }
 0x27e   : > { %v1971_v43 = vpop.permute.xlu0 %1970  ;;  %2353 = vrot.lane.b32.xlu1 %v2283_v51, %s5648_s14 }
 0x27f   : > { %2059 = vst.msk [vmem:[#allocation4 + $0x40] sm:$0xff] %vm2050_vm9, %v1971_v43 }
 0x280   : > { %2351 = vrot.lane.b32.xlu0 %v2282_v30, %s5648_s14  ;;  %v1977_v55 = vpop.permute.xlu1 %1976  ;;  %v2492_v30 = vld [vmem:[#allocation2 + $0x13a] sm:$0xff] }
 0x281   : > { %2062 = vst.msk [vmem:[#allocation4 + $0x58] sm:$0xff] %vm2050_vm9, %v1977_v55  ;;  %v2491_v55 = vld [vmem:[#allocation2 + $0x12a] sm:$0xff] }
 0x282   : > { %v1975_v32 = vpop.permute.xlu0 %1974  ;;  %2542 = vrot.lane.b32.xlu1 %v2474_v47, %s5649_s21 }
 0x283   : > { %2061 = vst.msk [vmem:[#allocation4 + $0x50] sm:$0xff] %vm2050_vm9, %v1975_v32 }
 0x284   : > { %2355 = vrot.lane.b32.xlu0 %v2284_v33, %s5648_s14  ;;  %v1981_v48 = vpop.permute.xlu1 %1980  ;;  %v2109_v33 = vld [vmem:[#allocation2 + $0x158] sm:$0xff] }
 0x285   : > { %2064 = vst.msk [vmem:[#allocation4 + $0x68] sm:$0xff] %vm2050_vm9, %v1981_v48  ;;  %v2493_v48 = vld [vmem:[#allocation2 + $0x142] sm:$0xff] }
 0x286   : > { %v1979_v50 = vpop.permute.xlu0 %1978  ;;  %2546 = vrot.lane.b32.xlu1 %v2476_v46, %s5649_s21 }
 0x287   : > { %2063 = vst.msk [vmem:[#allocation4 + $0x60] sm:$0xff] %vm2050_vm9, %v1979_v50 }
 0x288   : > { %2544 = vrot.lane.b32.xlu0 %v2475_v63, %s5649_s21  ;;  %v1985_v1 = vpop.permute.xlu1 %1984  ;;  %v2111_v63 = vld [vmem:[#allocation2 + $0x170] sm:$0xff] }
 0x289   : > { %2066 = vst.msk [vmem:[#allocation4 + $0x78] sm:$0xff] %vm2050_vm9, %v1985_v1  ;;  %v2110_v1 = vld [vmem:[#allocation2 + $0x168] sm:$0xff] }
 0x28a   : > { %v1983_v49 = vpop.permute.xlu0 %1982  ;;  %2357 = vrot.lane.b32.xlu1 %v2285_v23, %s5648_s14 }
 0x28b   : > { %2065 = vst.msk [vmem:[#allocation4 + $0x70] sm:$0xff] %vm2050_vm9, %v1983_v49 }
 0x28c   : > { %2548 = vrot.lane.b32.xlu0 %v2477_v34, %s5649_s21  ;;  %v1989_v3 = vpop.permute.xlu1 %1988  ;;  %v2302_v34 = vld [vmem:[#allocation2 + $0x159] sm:$0xff] }
 0x28d   : > { %2068 = vst.msk [vmem:[#allocation4 + $0x88] sm:$0xff] %vm2050_vm9, %v1989_v3  ;;  %v2301_v3 = vld [vmem:[#allocation2 + $0x151] sm:$0xff] }
 0x28e   : > { %v1987_v4 = vpop.permute.xlu0 %1986  ;;  %2361 = vrot.lane.b32.xlu1 %v2287_v13, %s5648_s14 }
 0x28f   : > { %2067 = vst.msk [vmem:[#allocation4 + $0x80] sm:$0xff] %vm2050_vm9, %v1987_v4 }
 0x290   : > { %2359 = vrot.lane.b32.xlu0 %v2286_v14, %s5648_s14  ;;  %v1993_v21 = vpop.permute.xlu1 %1992  ;;  %v2304_v14 = vld [vmem:[#allocation2 + $0x171] sm:$0xff] }
 0x291   : > { %2070 = vst.msk [vmem:[#allocation4 + $0x98] sm:$0xff] %vm2050_vm9, %v1993_v21  ;;  %v2303_v21 = vld [vmem:[#allocation2 + $0x169] sm:$0xff] }
 0x292   : > { %v1991_v22 = vpop.permute.xlu0 %1990  ;;  %2550 = vrot.lane.b32.xlu1 %v2478_v42, %s5649_s21 }
 0x293   : > { %2069 = vst.msk [vmem:[#allocation4 + $0x90] sm:$0xff] %vm2050_vm9, %v1991_v22 }
 0x294   : > { %2363 = vrot.lane.b32.xlu0 %v2288_v28, %s5648_s14  ;;  %v1997_v38 = vpop.permute.xlu1 %1996  ;;  %v2495_v28 = vld [vmem:[#allocation2 + $0x15a] sm:$0xff] }
 0x295   : > { %2072 = vst.msk [vmem:[#allocation4 + $0xa8] sm:$0xff] %vm2050_vm9, %v1997_v38  ;;  %v2494_v38 = vld [vmem:[#allocation2 + $0x152] sm:$0xff] }
 0x296   : > { %v1995_v40 = vpop.permute.xlu0 %1994  ;;  %2554 = vrot.lane.b32.xlu1 %v6657_v57, %s5649_s21  ;;  %v2291_v57 = vld [vmem:[#allocation2 + $0xd9] sm:$0xff] }
 0x297   : > { %2071 = vst.msk [vmem:[#allocation4 + $0xa0] sm:$0xff] %vm2050_vm9, %v1995_v40 }
 0x298   : > { %2552 = vrot.lane.b32.xlu0 %v2479_v9, %s5649_s21  ;;  %v2001_v17 = vpop.permute.xlu1 %2000 }
 0x299   : > { %2074 = vst.msk [vmem:[#allocation4 + $0xb8] sm:$0xff] %vm2050_vm9, %v2001_v17  ;;  %v2497_v17 = vld [vmem:[#allocation2 + $0x172] sm:$0xff] }
 0x29a   : > { %v1999_v6 = vpop.permute.xlu0 %1998  ;;  %2365 = vrot.lane.b32.xlu1 %v6688_v59, %s5648_s14  ;;  %v2292_v59 = vld [vmem:[#allocation2 + $0xe1] sm:$0xff] }
 0x29b   : > { %2073 = vst.msk [vmem:[#allocation4 + $0xb0] sm:$0xff] %vm2050_vm9, %v1999_v6  ;;  %v2496_v6 = vld [vmem:[#allocation2 + $0x16a] sm:$0xff] }
 0x29c   : > { %2556 = vrot.lane.b32.xlu0 %v2481_v7, %s5649_s21  ;;  %v2005_v56 = vpop.permute.xlu1 %2004 }
 0x29d   : > { %2076 = vst.msk [vmem:[#allocation4 + $0xc8] sm:$0xff] %vm2050_vm9, %v2005_v56 }
 0x29e   : > { %v2003_v0 = vpop.permute.xlu0 %2002  ;;  %2369 = vrot.lane.b32.xlu1 %v2291_v57, %s5648_s14  ;;  %v2112_v57 = vld [vmem:[#allocation2 + $0x180] sm:$0xff] }
 0x29f   : > { %2075 = vst.msk [vmem:[#allocation4 + $0xc0] sm:$0xff] %vm2050_vm9, %v2003_v0  ;;  %v2113_v0 = vld [vmem:[#allocation2 + $0x188] sm:$0xff] }
 0x2a0   : > { %2367 = vrot.lane.b32.xlu0 %v6683_v26, %s5648_s14  ;;  %v2009_v2 = vpop.permute.xlu1 %2008 }
 0x2a1   : > { %2078 = vst.msk [vmem:[#allocation4 + $0xd8] sm:$0xff] %vm2050_vm9, %v2009_v2  ;;  %v2115_v2 = vld [vmem:[#allocation2 + $0x1a0] sm:$0xff] }
 0x2a2   : > { %v2007_v11 = vpop.permute.xlu0 %2006  ;;  %2558 = vrot.lane.b32.xlu1 %v6699_v60, %s5649_s21  ;;  %v2293_v60 = vld [vmem:[#allocation2 + $0xf1] sm:$0xff] }
 0x2a3   : > { %2077 = vst.msk [vmem:[#allocation4 + $0xd0] sm:$0xff] %vm2050_vm9, %v2007_v11 }
 0x2a4   : > { %2371 = vrot.lane.b32.xlu0 %v2292_v59, %s5648_s14  ;;  %v2013_v15 = vpop.permute.xlu1 %2012  ;;  %v2114_v59 = vld [vmem:[#allocation2 + $0x198] sm:$0xff] }
 0x2a5   : > { %2080 = vst.msk [vmem:[#allocation4 + $0xe8] sm:$0xff] %vm2050_vm9, %v2013_v15 }
 0x2a6   : > { %v2011_v16 = vpop.permute.xlu0 %2010  ;;  %2562 = vrot.lane.b32.xlu1 %v6831_v8, %s5649_s21 }
 0x2a7   : > { %2079 = vst.msk [vmem:[#allocation4 + $0xe0] sm:$0xff] %vm2050_vm9, %v2011_v16 }
 0x2a8   : > { %2560 = vrot.lane.b32.xlu0 %v6693_v10, %s5649_s21  ;;  %v2017_v26 = vpop.permute.xlu1 %2016  ;;  %v2294_v10 = vld [vmem:[#allocation2 + $0xf9] sm:$0xff] }
 0x2a9   : > { %2082 = vst.msk [vmem:[#allocation4 + $0xf8] sm:$0xff] %vm2050_vm9, %v2017_v26 }
 0x2aa   : > { %v2015_v24 = vpop.permute.xlu0 %2014  ;;  %2373 = vrot.lane.b32.xlu1 %v2293_v60, %s5648_s14  ;;  %v2305_v60 = vld [vmem:[#allocation2 + $0x181] sm:$0xff] }
 0x2ab   : > { %2081 = vst.msk [vmem:[#allocation4 + $0xf0] sm:$0xff] %vm2050_vm9, %v2015_v24  ;;  %v2306_v24 = vld [vmem:[#allocation2 + $0x189] sm:$0xff]  ;;  %vm4699_vm9 = vcmask 589312  }
 0x2ac   : > { %2564 = vrot.lane.b32.xlu0 %v6826_v31, %s5649_s21  ;;  %v2151_v35 = vpop.permute.xlu1 %2150  ;;  %v2296_v31 = vld [vmem:[#allocation2 + $0x111] sm:$0xff] }
 0x2ad   : > { %2246 = vst.msk [vmem:[#allocation4 + $0x8] sm:$0xff] %vm2244_vm11, %v2151_v35  ;;  %v2308_v35 = vld [vmem:[#allocation2 + $0x1a1] sm:$0xff] }
 0x2ae   : > { %v2149_v8 = vpop.permute.xlu0 %2148  ;;  %2377 = vrot.lane.b32.xlu1 %v2295_v53, %s5648_s14  ;;  %v2307_v53 = vld [vmem:[#allocation2 + $0x199] sm:$0xff] }
 0x2af   : > { %2245 = vst.msk [vmem:[#allocation4] sm:$0xff] %vm2244_vm11, %v2149_v8 }
 0x2b0   : > { %2375 = vrot.lane.b32.xlu0 %v2294_v10, %s5648_s14  ;;  %v2155_v29 = vpop.permute.xlu1 %2154 }
 0x2b1   : > { %2248 = vst.msk [vmem:[#allocation4 + $0x18] sm:$0xff] %vm2244_vm11, %v2155_v29 }
 0x2b2   : > { %v2153_v58 = vpop.permute.xlu0 %2152  ;;  %2566 = vrot.lane.b32.xlu1 %v6841_v54, %s5649_s21  ;;  %v2297_v54 = vld [vmem:[#allocation2 + $0x121] sm:$0xff] }
 0x2b3   : > { %2247 = vst.msk [vmem:[#allocation4 + $0x10] sm:$0xff] %vm2244_vm11, %v2153_v58 }
 0x2b4   : > { %2379 = vrot.lane.b32.xlu0 %v2296_v31, %s5648_s14  ;;  %v2159_v37 = vpop.permute.xlu1 %2158 }
 0x2b5   : > { %2250 = vst.msk [vmem:[#allocation4 + $0x28] sm:$0xff] %vm2244_vm11, %v2159_v37 }
 0x2b6   : > { %v2157_v12 = vpop.permute.xlu0 %2156  ;;  %2570 = vrot.lane.b32.xlu1 %v2488_v62, %s5649_s21  ;;  %v2501_v62 = vld [vmem:[#allocation2 + $0x1a2] sm:$0xff] }
 0x2b7   : > { %2249 = vst.msk [vmem:[#allocation4 + $0x20] sm:$0xff] %vm2244_vm11, %v2157_v12 }
 0x2b8   : > { %2568 = vrot.lane.b32.xlu0 %v6836_v36, %s5649_s21  ;;  %v2163_v19 = vpop.permute.xlu1 %2162  ;;  %v2298_v36 = vld [vmem:[#allocation2 + $0x129] sm:$0xff] }
 0x2b9   : > { %2252 = vst.msk [vmem:[#allocation4 + $0x38] sm:$0xff] %vm2244_vm11, %v2163_v19 }
 0x2ba   : > { %v2161_v61 = vpop.permute.xlu0 %2160  ;;  %2381 = vrot.lane.b32.xlu1 %v2297_v54, %s5648_s14 }
 0x2bb   : > { %2251 = vst.msk [vmem:[#allocation4 + $0x30] sm:$0xff] %vm2244_vm11, %v2161_v61  ;;  %v2500_v61 = vld [vmem:[#allocation2 + $0x19a] sm:$0xff] }
 0x2bc   : > { %2572 = vrot.lane.b32.xlu0 %v2489_v20, %s5649_s21  ;;  %v2167_v39 = vpop.permute.xlu1 %2166 }
 0x2bd   : > { %2254 = vst.msk [vmem:[#allocation4 + $0x48] sm:$0xff] %vm2244_vm11, %v2167_v39 }
 0x2be   : > { %v2165_v27 = vpop.permute.xlu0 %2164  ;;  %2385 = vrot.lane.b32.xlu1 %v2299_v45, %s5648_s14 }
 0x2bf   : > { %2253 = vst.msk [vmem:[#allocation4 + $0x40] sm:$0xff] %vm2244_vm11, %v2165_v27 }
 0x2c0   : > { %2383 = vrot.lane.b32.xlu0 %v2298_v36, %s5648_s14  ;;  %v2171_v18 = vpop.permute.xlu1 %2170 }
 0x2c1   : > { %2256 = vst.msk [vmem:[#allocation4 + $0x58] sm:$0xff] %vm2244_vm11, %v2171_v18 }
 0x2c2   : > { %v2169_v25 = vpop.permute.xlu0 %2168  ;;  %2574 = vrot.lane.b32.xlu1 %v2490_v5, %s5649_s21 }
 0x2c3   : > { %2255 = vst.msk [vmem:[#allocation4 + $0x50] sm:$0xff] %vm2244_vm11, %v2169_v25 }
 0x2c4   : > { %2387 = vrot.lane.b32.xlu0 %v2300_v41, %s5648_s14  ;;  %v2175_v43 = vpop.permute.xlu1 %2174 }
 0x2c5   : > { %2258 = vst.msk [vmem:[#allocation4 + $0x68] sm:$0xff] %vm2244_vm11, %v2175_v43 }
 0x2c6   : > { %v2173_v51 = vpop.permute.xlu0 %2172  ;;  %2578 = vrot.lane.b32.xlu1 %v2492_v30, %s5649_s21 }
 0x2c7   : > { %2257 = vst.msk [vmem:[#allocation4 + $0x60] sm:$0xff] %vm2244_vm11, %v2173_v51 }
 0x2c8   : > { %2576 = vrot.lane.b32.xlu0 %v2491_v55, %s5649_s21  ;;  %v2179_v32 = vpop.permute.xlu1 %2178 }
 0x2c9   : > { %2260 = vst.msk [vmem:[#allocation4 + $0x78] sm:$0xff] %vm2244_vm11, %v2179_v32 }
 0x2ca   : > { %v2177_v47 = vpop.permute.xlu0 %2176  ;;  %2198 = vrot.lane.b32.xlu1 %v2109_v33, %s5647_s24 }
 0x2cb   : > { %2259 = vst.msk [vmem:[#allocation4 + $0x70] sm:$0xff] %vm2244_vm11, %v2177_v47 }
 0x2cc   : > { %2580 = vrot.lane.b32.xlu0 %v2493_v48, %s5649_s21  ;;  %v2183_v50 = vpop.permute.xlu1 %2182 }
 0x2cd   : > { %2262 = vst.msk [vmem:[#allocation4 + $0x88] sm:$0xff] %vm2244_vm11, %v2183_v50 }
 0x2ce   : > { %v2181_v46 = vpop.permute.xlu0 %2180  ;;  %2202 = vrot.lane.b32.xlu1 %v2111_v63, %s5647_s24 }
 0x2cf   : > { %2261 = vst.msk [vmem:[#allocation4 + $0x80] sm:$0xff] %vm2244_vm11, %v2181_v46 }
 0x2d0   : > { %2200 = vrot.lane.b32.xlu0 %v2110_v1, %s5647_s24  ;;  %v2187_v49 = vpop.permute.xlu1 %2186 }
 0x2d1   : > { %2264 = vst.msk [vmem:[#allocation4 + $0x98] sm:$0xff] %vm2244_vm11, %v2187_v49 }
 0x2d2   : > { %v2185_v23 = vpop.permute.xlu0 %2184  ;;  %2391 = vrot.lane.b32.xlu1 %v2302_v34, %s5648_s14 }
 0x2d3   : > { %2263 = vst.msk [vmem:[#allocation4 + $0x90] sm:$0xff] %vm2244_vm11, %v2185_v23 }
 0x2d4   : > { %2389 = vrot.lane.b32.xlu0 %v2301_v3, %s5648_s14  ;;  %v2191_v4 = vpop.permute.xlu1 %2190 }
 0x2d5   : > { %2266 = vst.msk [vmem:[#allocation4 + $0xa8] sm:$0xff] %vm2244_vm11, %v2191_v4 }
 0x2d6   : > { %v2189_v13 = vpop.permute.xlu0 %2188  ;;  %2395 = vrot.lane.b32.xlu1 %v2304_v14, %s5648_s14 }
 0x2d7   : > { %2265 = vst.msk [vmem:[#allocation4 + $0xa0] sm:$0xff] %vm2244_vm11, %v2189_v13 }
 0x2d8   : > { %2393 = vrot.lane.b32.xlu0 %v2303_v21, %s5648_s14  ;;  %v2195_v22 = vpop.permute.xlu1 %2194 }
 0x2d9   : > { %2268 = vst.msk [vmem:[#allocation4 + $0xb8] sm:$0xff] %vm2244_vm11, %v2195_v22 }
 0x2da   : > { %v2193_v42 = vpop.permute.xlu0 %2192  ;;  %2584 = vrot.lane.b32.xlu1 %v2495_v28, %s5649_s21 }
 0x2db   : > { %2267 = vst.msk [vmem:[#allocation4 + $0xb0] sm:$0xff] %vm2244_vm11, %v2193_v42 }
 0x2dc   : > { %2582 = vrot.lane.b32.xlu0 %v2494_v38, %s5649_s21  ;;  %v2342_v40 = vpop.permute.xlu1 %2341 }
 0x2dd   : > { %2438 = vst.msk [vmem:[#allocation4] sm:$0xff] %vm2437_vm12, %v2342_v40 }
 0x2de   : > { %v2197_v9 = vpop.permute.xlu0 %2196  ;;  %2588 = vrot.lane.b32.xlu1 %v2497_v17, %s5649_s21 }
 0x2df   : > { %2269 = vst.msk [vmem:[#allocation4 + $0xc0] sm:$0xff] %vm2244_vm11, %v2197_v9 }
 0x2e0   : > { %2586 = vrot.lane.b32.xlu0 %v2496_v6, %s5649_s21  ;;  %v2346_v7 = vpop.permute.xlu1 %2345 }
 0x2e1   : > { %2440 = vst.msk [vmem:[#allocation4 + $0x10] sm:$0xff] %vm2437_vm12, %v2346_v7 }
 0x2e2   : > { %v2344_v56 = vpop.permute.xlu0 %2343  ;;  %2206 = vrot.lane.b32.xlu1 %v2113_v0, %s5647_s24 }
 0x2e3   : > { %2439 = vst.msk [vmem:[#allocation4 + $0x8] sm:$0xff] %vm2437_vm12, %v2344_v56 }
 0x2e4   : > { %2204 = vrot.lane.b32.xlu0 %v2112_v57, %s5647_s24  ;;  %v2535_v11 = vpop.permute.xlu1 %2534 }
 0x2e5   : > { %2631 = vst.msk [vmem:[#allocation4] sm:$0xff] %vm2630_vm13, %v2535_v11 }
 0x2e6   : > { %v2348_v15 = vpop.permute.xlu0 %2347  ;;  %2210 = vrot.lane.b32.xlu1 %v2115_v2, %s5647_s24 }
 0x2e7   : > { %2441 = vst.msk [vmem:[#allocation4 + $0x18] sm:$0xff] %vm2437_vm12, %v2348_v15 }
 0x2e8   : > { %2208 = vrot.lane.b32.xlu0 %v2114_v59, %s5647_s24  ;;  %v2539_v16 = vpop.permute.xlu1 %2538  ;;  %s5650_s24 = smov 16  }
 0x2e9   : > { %2633 = vst.msk [vmem:[#allocation4 + $0x10] sm:$0xff] %vm2630_vm13, %v2539_v16 }
 0x2ea   : > { %v2537_v26 = vpop.permute.xlu0 %2536  ;;  %2399 = vrot.lane.b32.xlu1 %v2306_v24, %s5648_s14 }
 0x2eb   : > { %2632 = vst.msk [vmem:[#allocation4 + $0x8] sm:$0xff] %vm2630_vm13, %v2537_v26 }
 0x2ec   : > { %2397 = vrot.lane.b32.xlu0 %v2305_v60, %s5648_s14  ;;  %v2350_v8 = vpop.permute.xlu1 %2349  ;;  %v2663_v31 = vld [vmem:[#allocation4] sm:$0xff] }
 0x2ed   : > { %2442 = vst.msk [vmem:[#allocation4 + $0x20] sm:$0xff] %vm2437_vm12, %v2350_v8 }
 0x2ee   : > { %v2541_v10 = vpop.permute.xlu0 %2540  ;;  %2403 = vrot.lane.b32.xlu1 %v2308_v35, %s5648_s14 }
 0x2ef   : > { %2634 = vst.msk [vmem:[#allocation4 + $0x18] sm:$0xff] %vm2630_vm13, %v2541_v10 }
 0x2f0   : > { %2401 = vrot.lane.b32.xlu0 %v2307_v53, %s5648_s14  ;;  %v2354_v29 = vpop.permute.xlu1 %2353  ;;  %v2665_v20 = vld [vmem:[#allocation4 + $0x10] sm:$0xff] }
 0x2f1   : > { %2444 = vst.msk [vmem:[#allocation4 + $0x30] sm:$0xff] %vm2437_vm12, %v2354_v29 }
 0x2f2   : > { %v2352_v58 = vpop.permute.xlu0 %2351  ;;  %v2664_v37 = vld [vmem:[#allocation4 + $0x8] sm:$0xff]  ;;  %2592 = vrot.lane.b32.xlu1 %v6876_v52, %s5649_s21 }
 0x2f3   : > { %2443 = vst.msk [vmem:[#allocation4 + $0x28] sm:$0xff] %vm2437_vm12, %v2352_v58  ;;  %v2695_v12 = vpack.c.bf16 %v2664_v37, %v2663_v31 }
 0x2f4   : > { %2590 = vrot.lane.b32.xlu0 %v6883_v44, %s5649_s21  ;;  %v2543_v19 = vpop.permute.xlu1 %2542 }
 0x2f5   : > { %5497 = vmatprep.mubr.msk.bf16.mxu1 %vm2766_vm14, %v2695_v12  ;;  %2635 = vst.msk [vmem:[#allocation4 + $0x20] sm:$0xff] %vm2630_vm13, %v2543_v19 }
 0x2f6   : > { %v2356_v54 = vpop.permute.xlu0 %2355  ;;  %v2666_v39 = vld [vmem:[#allocation4 + $0x18] sm:$0xff]  ;;  %2596 = vrot.lane.b32.xlu1 %v2501_v62, %s5649_s21 }
 0x2f7   : > { %2445 = vst.msk [vmem:[#allocation4 + $0x38] sm:$0xff] %vm2437_vm12, %v2356_v54  ;;  %v2696_v27 = vpack.c.bf16 %v2666_v39, %v2665_v20 }
 0x2f8   : > { %2594 = vrot.lane.b32.xlu0 %v2500_v61, %s5649_s21  ;;  %v2547_v52 = vpop.permute.xlu1 %2546  ;;  %s5653_s21 = smov 56  }
 0x2f9   : > { %5498 = vmatmul.mubr.msk.bf16.vlgmr.msra.gmra.mrb[16].mxu1 %vm2766_vm14, %v2696_v27  ;;  %2637 = vst.msk [vmem:[#allocation4 + $0x30] sm:$0xff] %vm2630_vm13, %v2547_v52 }
 0x2fa   : > { %v2545_v44 = vpop.permute.xlu0 %2544 }
 0x2fb   : > { %2636 = vst.msk [vmem:[#allocation4 + $0x28] sm:$0xff] %vm2630_vm13, %v2545_v44 }
 0x2fc   : > { %v2358_v45 = vpop.permute.xlu1 %2357  ;;  %v2667_v5 = vld [vmem:[#allocation4 + $0x20] sm:$0xff] }
 0x2fd   : > { %2446 = vst.msk [vmem:[#allocation4 + $0x40] sm:$0xff] %vm2437_vm12, %v2358_v45 }
 0x2fe   : > { %v2549_v36 = vpop.permute.xlu0 %2548 }
 0x2ff   : > { %2638 = vst.msk [vmem:[#allocation4 + $0x38] sm:$0xff] %vm2630_vm13, %v2549_v36 }
 0x300   : > { %v2362_v18 = vpop.permute.xlu1 %2361  ;;  %v2669_v55 = vld [vmem:[#allocation4 + $0x30] sm:$0xff] }
 0x301   : > { %2448 = vst.msk [vmem:[#allocation4 + $0x50] sm:$0xff] %vm2437_vm12, %v2362_v18 }
 0x302   : > { %v2360_v25 = vpop.permute.xlu0 %2359  ;;  %v2668_v41 = vld [vmem:[#allocation4 + $0x28] sm:$0xff] }
 0x303   : > { %2447 = vst.msk [vmem:[#allocation4 + $0x48] sm:$0xff] %vm2437_vm12, %v2360_v25  ;;  %v2697_v43 = vpack.c.bf16 %v2668_v41, %v2667_v5 }
 0x304   : > { %v2551_v51 = vpop.permute.xlu1 %2550 }
 0x305   : > { %5501 = vmatprep.mubr.msk.bf16.mxu1 %vm2766_vm14, %v2697_v43  ;;  %2639 = vst.msk [vmem:[#allocation4 + $0x40] sm:$0xff] %vm2630_vm13, %v2551_v51 }
 0x306   : > { %v2364_v30 = vpop.permute.xlu0 %2363  ;;  %v2670_v32 = vld [vmem:[#allocation4 + $0x38] sm:$0xff] }
 0x307   : > { %2449 = vst.msk [vmem:[#allocation4 + $0x58] sm:$0xff] %vm2437_vm12, %v2364_v30  ;;  %v2698_v47 = vpack.c.bf16 %v2670_v32, %v2669_v55 }
 0x308   : > { %v2555_v33 = vpop.permute.xlu1 %2554 }
 0x309   : > { %5502 = vmatmul.mubr.msk.bf16.gmra.mrb[20].mxu1 %vm2766_vm14, %v2698_v47  ;;  %2641 = vst.msk [vmem:[#allocation4 + $0x50] sm:$0xff] %vm2630_vm13, %v2555_v33  ;;  %v8364_v33 = vmov 0.0  }
 0x30a   : > { %v2553_v48 = vpop.permute.xlu0 %2552  ;;  %420 = vst.msk [vmem:[#allocation3 + $0x40] sm:$0x3] %vm413_vm15, %v8364_v33  ;;  %414 = vst.msk [vmem:[#allocation3 + $0x10] sm:$0x3] %vm413_vm15, %v8364_v33 }
 0x30b   : > { %2640 = vst.msk [vmem:[#allocation4 + $0x48] sm:$0xff] %vm2630_vm13, %v2553_v48 }
 0x30c   : > { %v2366_v50 = vpop.permute.xlu1 %2365  ;;  %v2671_v49 = vld [vmem:[#allocation4 + $0x40] sm:$0xff]  ;;  %417 = vst.msk [vmem:[#allocation3 + $0x28] sm:$0x3] %vm413_vm15, %v8364_v33  ;;  %423 = vst.msk [vmem:[#allocation3 + $0x58] sm:$0x3] %vm413_vm15, %v8364_v33 }
 0x30d   : > { %2450 = vst.msk [vmem:[#allocation4 + $0x60] sm:$0xff] %vm2437_vm12, %v2366_v50 }
 0x30e   : > { %v2557_v46 = vpop.permute.xlu0 %2556  ;;  %426 = vst.msk [vmem:[#allocation3 + $0x70] sm:$0x3] %vm413_vm15, %v8364_v33  ;;  %429 = vst.msk [vmem:[#allocation3 + $0x88] sm:$0x3] %vm413_vm15, %v8364_v33 }
 0x30f   : > { %2642 = vst.msk [vmem:[#allocation4 + $0x58] sm:$0xff] %vm2630_vm13, %v2557_v46  ;;  %v3187_v46 = vld [vmem:[#allocation3 + $0x1] sm:$0xff] }
 0x310   : > { %v2370_v63 = vpop.permute.xlu1 %2369  ;;  %v2673_v13 = vld [vmem:[#allocation4 + $0x50] sm:$0xff]  ;;  %432 = vst.msk [vmem:[#allocation3 + $0xa0] sm:$0x3] %vm413_vm15, %v8364_v33  ;;  %435 = vst.msk [vmem:[#allocation3 + $0xb8] sm:$0x3] %vm413_vm15, %v8364_v33  ;;  %3251 = vrot.lane.b32.xlu0 %v3187_v46, %s5640_s23 }
 0x311   : > { %2452 = vst.msk [vmem:[#allocation4 + $0x70] sm:$0xff] %vm2437_vm12, %v2370_v63 }
 0x312   : > { %v2368_v1 = vpop.permute.xlu0 %2367  ;;  %v2672_v23 = vld [vmem:[#allocation4 + $0x48] sm:$0xff]  ;;  %438 = vst.msk [vmem:[#allocation3 + $0xd0] sm:$0x3] %vm413_vm15, %v8364_v33  ;;  %441 = vst.msk [vmem:[#allocation3 + $0xe8] sm:$0x3] %vm413_vm15, %v8364_v33 }
 0x313   : > { %2451 = vst.msk [vmem:[#allocation4 + $0x68] sm:$0xff] %vm2437_vm12, %v2368_v1  ;;  %v2699_v34 = vpack.c.bf16 %v2672_v23, %v2671_v49  ;;  %v3380_v1 = vld [vmem:[#allocation3 + $0x2] sm:$0xff] }
 0x314   : > { %v2559_v3 = vpop.permute.xlu1 %2558  ;;  %444 = vst.msk [vmem:[#allocation3 + $0x100] sm:$0x3] %vm413_vm15, %v8364_v33  ;;  %447 = vst.msk [vmem:[#allocation3 + $0x118] sm:$0x3] %vm413_vm15, %v8364_v33  ;;  %3444 = vrot.lane.b32.xlu0 %v3380_v1, %s5650_s24 }
 0x315   : > { %5505 = vmatprep.mubr.msk.bf16.mxu1 %vm2766_vm14, %v2699_v34  ;;  %2643 = vst.msk [vmem:[#allocation4 + $0x60] sm:$0xff] %vm2630_vm13, %v2559_v3 }
 0x316   : > { %v2372_v4 = vpop.permute.xlu0 %2371  ;;  %v2674_v14 = vld [vmem:[#allocation4 + $0x58] sm:$0xff]  ;;  %450 = vst.msk [vmem:[#allocation3 + $0x130] sm:$0x3] %vm413_vm15, %v8364_v33  ;;  %453 = vst.msk [vmem:[#allocation3 + $0x148] sm:$0x3] %vm413_vm15, %v8364_v33 }
 0x317   : > { %2453 = vst.msk [vmem:[#allocation4 + $0x78] sm:$0xff] %vm2437_vm12, %v2372_v4  ;;  %v2700_v21 = vpack.c.bf16 %v2674_v14, %v2673_v13  ;;  %v3188_v13 = vld [vmem:[#allocation3 + $0x9] sm:$0xff] }
 0x318   : > { %v2563_v22 = vpop.permute.xlu1 %2562  ;;  %456 = vst.msk [vmem:[#allocation3 + $0x160] sm:$0x3] %vm413_vm15, %v8364_v33  ;;  %459 = vst.msk [vmem:[#allocation3 + $0x178] sm:$0x3] %vm413_vm15, %v8364_v33  ;;  %3253 = vrot.lane.b32.xlu1 %v3188_v13, %s5640_s23 }
 0x319   : > { %5506 = vmatmul.mubr.msk.bf16.gmra.mrb[24].mxu1 %vm2766_vm14, %v2700_v21  ;;  %2645 = vst.msk [vmem:[#allocation4 + $0x70] sm:$0xff] %vm2630_vm13, %v2563_v22  ;;  %v3381_v22 = vld [vmem:[#allocation3 + $0xa] sm:$0xff] }
 0x31a   : > { %v2561_v42 = vpop.permute.xlu0 %2560  ;;  %462 = vst.msk [vmem:[#allocation3 + $0x190] sm:$0x3] %vm413_vm15, %v8364_v33  ;;  %465 = vst.msk [vmem:[#allocation3 + $0x1a8] sm:$0x3] %vm413_vm15, %v8364_v33 }
 0x31b   : > { %2644 = vst.msk [vmem:[#allocation4 + $0x68] sm:$0xff] %vm2630_vm13, %v2561_v42 }
 0x31c   : > { %v2374_v28 = vpop.permute.xlu1 %2373  ;;  %v2675_v17 = vld [vmem:[#allocation4 + $0x60] sm:$0xff]  ;;  %3446 = vrot.lane.b32.xlu1 %v3381_v22, %s5650_s24 }
 0x31d   : > { %2454 = vst.msk [vmem:[#allocation4 + $0x80] sm:$0xff] %vm2437_vm12, %v2374_v28 }
 0x31e   : > { %v2565_v38 = vpop.permute.xlu0 %2564 }
 0x31f   : > { %2646 = vst.msk [vmem:[#allocation4 + $0x78] sm:$0xff] %vm2630_vm13, %v2565_v38 }
 0x320   : > { %v2378_v40 = vpop.permute.xlu1 %2377  ;;  %v2677_v57 = vld [vmem:[#allocation4 + $0x70] sm:$0xff] }
 0x321   : > { %2456 = vst.msk [vmem:[#allocation4 + $0x90] sm:$0xff] %vm2437_vm12, %v2378_v40 }
 0x322   : > { %v2376_v9 = vpop.permute.xlu0 %2375  ;;  %v2676_v6 = vld [vmem:[#allocation4 + $0x68] sm:$0xff] }
 0x323   : > { %2455 = vst.msk [vmem:[#allocation4 + $0x88] sm:$0xff] %vm2437_vm12, %v2376_v9  ;;  %v2701_v7 = vpack.c.bf16 %v2676_v6, %v2675_v17 }
 0x324   : > { %v2567_v56 = vpop.permute.xlu1 %2566 }
 0x325   : > { %5509 = vmatprep.mubr.msk.bf16.mxu1 %vm2766_vm14, %v2701_v7  ;;  %2647 = vst.msk [vmem:[#allocation4 + $0x80] sm:$0xff] %vm2630_vm13, %v2567_v56 }
 0x326   : > { %v2380_v0 = vpop.permute.xlu0 %2379  ;;  %v2678_v2 = vld [vmem:[#allocation4 + $0x78] sm:$0xff] }
 0x327   : > { %2457 = vst.msk [vmem:[#allocation4 + $0x98] sm:$0xff] %vm2437_vm12, %v2380_v0  ;;  %v2702_v11 = vpack.c.bf16 %v2678_v2, %v2677_v57 }
 0x328   : > { %v2571_v59 = vpop.permute.xlu1 %2570 }
 0x329   : > { %5510 = vmatmul.mubr.msk.bf16.gmra.mrb[28].mxu1 %vm2766_vm14, %v2702_v11  ;;  %2649 = vst.msk [vmem:[#allocation4 + $0x90] sm:$0xff] %vm2630_vm13, %v2571_v59  ;;  %v3123_v11 = vld [vmem:[#allocation3] sm:$0xff]  ;;  %v3124_v59 = vld [vmem:[#allocation3 + $0x8] sm:$0xff] }
 0x32a   : > { %v2569_v15 = vpop.permute.xlu0 %2568  ;;  %3155 = vst.msk [vmem:[#allocation5] sm:$0xff] %vm410_vm3, %v3123_v11  ;;  %3156 = vst.msk [vmem:[#allocation5 + $0x8] sm:$0xff] %vm410_vm3, %v3124_v59 }
 0x32b   : > { %2648 = vst.msk [vmem:[#allocation4 + $0x88] sm:$0xff] %vm2630_vm13, %v2569_v15 }
 0x32c   : > { %v2382_v16 = vpop.permute.xlu1 %2381  ;;  %v2679_v35 = vld [vmem:[#allocation4 + $0x80] sm:$0xff] }
 0x32d   : > { %2458 = vst.msk [vmem:[#allocation4 + $0xa0] sm:$0xff] %vm2437_vm12, %v2382_v16  ;;  %v7245_v16 = vld [vmem:[%s8343_s4] ss:$0 sm:$0xff] }
 0x32e   : > { %v2573_v26 = vpop.permute.xlu0 %2572 }
 0x32f   : > { %2650 = vst.msk [vmem:[#allocation4 + $0x98] sm:$0xff] %vm2630_vm13, %v2573_v26 }
 0x330   : > { %v2386_v24 = vpop.permute.xlu1 %2385  ;;  %v2681_v58 = vld [vmem:[#allocation4 + $0x90] sm:$0xff] }
 0x331   : > { %2460 = vst.msk [vmem:[#allocation4 + $0xb0] sm:$0xff] %vm2437_vm12, %v2386_v24  ;;  %v7251_v24 = vld [vmem:[%s8344_s5] ss:$0 sm:$0xff] }
 0x332   : > { %v2384_v60 = vpop.permute.xlu0 %2383  ;;  %v2680_v8 = vld [vmem:[#allocation4 + $0x88] sm:$0xff] }
 0x333   : > { %2459 = vst.msk [vmem:[#allocation4 + $0xa8] sm:$0xff] %vm2437_vm12, %v2384_v60  ;;  %v2703_v53 = vpack.c.bf16 %v2680_v8, %v2679_v35 }
 0x334   : > { %v2575_v10 = vpop.permute.xlu1 %2574 }
 0x335   : > { %5513 = vmatprep.mubr.msk.bf16.mxu1 %vm2766_vm14, %v2703_v53  ;;  %2651 = vst.msk [vmem:[#allocation4 + $0xa0] sm:$0xff] %vm2630_vm13, %v2575_v10 }
 0x336   : > { %v2388_v29 = vpop.permute.xlu0 %2387  ;;  %v2682_v31 = vld [vmem:[#allocation4 + $0x98] sm:$0xff] }
 0x337   : > { %2461 = vst.msk [vmem:[#allocation4 + $0xb8] sm:$0xff] %vm2437_vm12, %v2388_v29  ;;  %v2704_v37 = vpack.c.bf16 %v2682_v31, %v2681_v58 }
 0x338   : > { %v2579_v12 = vpop.permute.xlu1 %2578 }
 0x339   : > { %5514 = vmatmul.mubr.msk.bf16.gmra.mrb[32].mxu1 %vm2766_vm14, %v2704_v37  ;;  %2653 = vst.msk [vmem:[#allocation4 + $0xb0] sm:$0xff] %vm2630_vm13, %v2579_v12 }
 0x33a   : > { %v2577_v62 = vpop.permute.xlu0 %2576 }
 0x33b   : > { %2652 = vst.msk [vmem:[#allocation4 + $0xa8] sm:$0xff] %vm2630_vm13, %v2577_v62 }
 0x33c   : > { %v2199_v19 = vpop.permute.xlu1 %2198  ;;  %v2683_v39 = vld [vmem:[#allocation4 + $0xa0] sm:$0xff] }
 0x33d   : > { %2270 = vst.msk [vmem:[#allocation4 + $0xc8] sm:$0xff] %vm2244_vm11, %v2199_v19 }
 0x33e   : > { %v2581_v61 = vpop.permute.xlu0 %2580 }
 0x33f   : > { %2654 = vst.msk [vmem:[#allocation4 + $0xb8] sm:$0xff] %vm2630_vm13, %v2581_v61 }
 0x340   : > { %v2203_v54 = vpop.permute.xlu1 %2202  ;;  %v2685_v36 = vld [vmem:[#allocation4 + $0xb0] sm:$0xff] }
 0x341   : > { %2272 = vst.msk [vmem:[#allocation4 + $0xd8] sm:$0xff] %vm2244_vm11, %v2203_v54 }
 0x342   : > { %v2201_v20 = vpop.permute.xlu0 %2200  ;;  %v2684_v27 = vld [vmem:[#allocation4 + $0xa8] sm:$0xff] }
 0x343   : > { %2271 = vst.msk [vmem:[#allocation4 + $0xd0] sm:$0xff] %vm2244_vm11, %v2201_v20  ;;  %v2705_v52 = vpack.c.bf16 %v2684_v27, %v2683_v39 }
 0x344   : > { %v2392_v44 = vpop.permute.xlu1 %2391 }
 0x345   : > { %5517 = vmatprep.mubr.msk.bf16.mxu1 %vm2766_vm14, %v2705_v52  ;;  %2463 = vst.msk [vmem:[#allocation4 + $0xc8] sm:$0xff] %vm2437_vm12, %v2392_v44 }
 0x346   : > { %v2390_v45 = vpop.permute.xlu0 %2389  ;;  %v2686_v18 = vld [vmem:[#allocation4 + $0xb8] sm:$0xff] }
 0x347   : > { %2462 = vst.msk [vmem:[#allocation4 + $0xc0] sm:$0xff] %vm2437_vm12, %v2390_v45  ;;  %v2706_v25 = vpack.c.bf16 %v2686_v18, %v2685_v36 }
 0x348   : > { %v2396_v5 = vpop.permute.xlu1 %2395 }
 0x349   : > { %5518 = vmatmul.mubr.msk.bf16.gmra.mrb[36].mxu1 %vm2766_vm14, %v2706_v25  ;;  %2465 = vst.msk [vmem:[#allocation4 + $0xd8] sm:$0xff] %vm2437_vm12, %v2396_v5 }
 0x34a   : > { %v2394_v41 = vpop.permute.xlu0 %2393 }
 0x34b   : > { %2464 = vst.msk [vmem:[#allocation4 + $0xd0] sm:$0xff] %vm2437_vm12, %v2394_v41 }
 0x34c   : > { %v2585_v43 = vpop.permute.xlu1 %2584 }
 0x34d   : > { %2656 = vst.msk [vmem:[#allocation4 + $0xc8] sm:$0xff] %vm2630_vm13, %v2585_v43 }
 0x34e   : > { %v2583_v51 = vpop.permute.xlu0 %2582 }
 0x34f   : > { %2655 = vst.msk [vmem:[#allocation4 + $0xc0] sm:$0xff] %vm2630_vm13, %v2583_v51 }
 0x350   : > { %v2589_v30 = vpop.permute.xlu1 %2588 }
 0x351   : > { %2658 = vst.msk [vmem:[#allocation4 + $0xd8] sm:$0xff] %vm2630_vm13, %v2589_v30 }
 0x352   : > { %v2587_v55 = vpop.permute.xlu0 %2586 }
 0x353   : > { %2657 = vst.msk [vmem:[#allocation4 + $0xd0] sm:$0xff] %vm2630_vm13, %v2587_v55 }
 0x354   : > { %v2207_v32 = vpop.permute.xlu1 %2206  ;;  %v2688_v47 = vld [vmem:[#allocation4 + $0xc8] sm:$0xff] }
 0x355   : > { %2274 = vst.msk [vmem:[#allocation4 + $0xe8] sm:$0xff] %vm2244_vm11, %v2207_v32 }
 0x356   : > { %v2205_v48 = vpop.permute.xlu0 %2204  ;;  %v2687_v50 = vld [vmem:[#allocation4 + $0xc0] sm:$0xff] }
 0x357   : > { %2273 = vst.msk [vmem:[#allocation4 + $0xe0] sm:$0xff] %vm2244_vm11, %v2205_v48  ;;  %v2707_v63 = vpack.c.bf16 %v2688_v47, %v2687_v50 }
 0x358   : > { %v2211_v49 = vpop.permute.xlu1 %2210  ;;  %v2690_v23 = vld [vmem:[#allocation4 + $0xd8] sm:$0xff] }
 0x359   : > { %5521 = vmatprep.mubr.msk.bf16.mxu1 %vm2766_vm14, %v2707_v63  ;;  %2276 = vst.msk [vmem:[#allocation4 + $0xf8] sm:$0xff] %vm2244_vm11, %v2211_v49 }
 0x35a   : > { %v2209_v34 = vpop.permute.xlu0 %2208  ;;  %v2689_v3 = vld [vmem:[#allocation4 + $0xd0] sm:$0xff] }
 0x35b   : > { %2275 = vst.msk [vmem:[#allocation4 + $0xf0] sm:$0xff] %vm2244_vm11, %v2209_v34  ;;  %v2708_v4 = vpack.c.bf16 %v2690_v23, %v2689_v3 }
 0x35c   : > { %v2400_v14 = vpop.permute.xlu1 %2399 }
 0x35d   : > { %5522 = vmatmul.mubr.msk.bf16.gmra.mrb[40].mxu1 %vm2766_vm14, %v2708_v4  ;;  %2467 = vst.msk [vmem:[#allocation4 + $0xe8] sm:$0xff] %vm2437_vm12, %v2400_v14 }
 0x35e   : > { %v2398_v21 = vpop.permute.xlu0 %2397 }
 0x35f   : > { %2466 = vst.msk [vmem:[#allocation4 + $0xe0] sm:$0xff] %vm2437_vm12, %v2398_v21 }
 0x360   : > { %v2404_v42 = vpop.permute.xlu1 %2403 }
 0x361   : > { %2469 = vst.msk [vmem:[#allocation4 + $0xf8] sm:$0xff] %vm2437_vm12, %v2404_v42 }
 0x362   : > { %v2402_v28 = vpop.permute.xlu0 %2401 }
 0x363   : > { %2468 = vst.msk [vmem:[#allocation4 + $0xf0] sm:$0xff] %vm2437_vm12, %v2402_v28 }
 0x364   : > { %v2593_v38 = vpop.permute.xlu1 %2592 }
 0x365   : > { %2660 = vst.msk [vmem:[#allocation4 + $0xe8] sm:$0xff] %vm2630_vm13, %v2593_v38 }
 0x366   : > { %v2591_v40 = vpop.permute.xlu0 %2590 }
 0x367   : > { %2659 = vst.msk [vmem:[#allocation4 + $0xe0] sm:$0xff] %vm2630_vm13, %v2591_v40 }
 0x368   : > { %v2597_v9 = vpop.permute.xlu1 %2596 }
 0x369   : > { %2662 = vst.msk [vmem:[#allocation4 + $0xf8] sm:$0xff] %vm2630_vm13, %v2597_v9 }
 0x36a   : > { %v2595_v17 = vpop.permute.xlu0 %2594 }
 0x36b   : > { %2661 = vst.msk [vmem:[#allocation4 + $0xf0] sm:$0xff] %vm2630_vm13, %v2595_v17 }
 0x36c   : > { %v2692_v6 = vld [vmem:[#allocation4 + $0xe8] sm:$0xff] }
 0x36e   : > { %v2691_v7 = vld [vmem:[#allocation4 + $0xe0] sm:$0xff] }
 0x36f   : > { %v2709_v56 = vpack.c.bf16 %v2692_v6, %v2691_v7 }
 0x370   : > { %v2694_v0 = vld [vmem:[#allocation4 + $0xf8] sm:$0xff] }
 0x371   : > { %5525 = vmatprep.mubr.msk.bf16.mxu1 %vm2766_vm14, %v2709_v56 }
 0x372   : > { %v2693_v57 = vld [vmem:[#allocation4 + $0xf0] sm:$0xff] }
 0x373   : > { %v2710_v2 = vpack.c.bf16 %v2694_v0, %v2693_v57 }
 0x375   : > { %5526 = vmatmul.mubr.msk.bf16.gmra.mrb[44].mxu1 %vm2766_vm14, %v2710_v2 }
 0x382   : > { %v3252_v15 = vpop.permute.xlu0 %3251 }
 0x383   : > { %3348 = vst.msk [vmem:[#allocation5] sm:$0xff] %vm3347_vm0, %v3252_v15 }
 0x386   : > { %v3445_v62 = vpop.permute.xlu0 %3444 }
 0x387   : > { %3541 = vst.msk [vmem:[#allocation5] sm:$0xff] %vm3540_vm1, %v3445_v62 }
 0x38a   : > { %v3254_v31 = vpop.permute.xlu1 %3253 }
 0x38b   : > { %3349 = vst.msk [vmem:[#allocation5 + $0x8] sm:$0xff] %vm3347_vm0, %v3254_v31 }
 0x38e   : > { %v3447_v27 = vpop.permute.xlu1 %3446 }
 0x38f   : > { %3542 = vst.msk [vmem:[#allocation5 + $0x8] sm:$0xff] %vm3540_vm1, %v3447_v27 }
 0x3cc   : > { %v5499_v26 = vpop.f32.mrb[16].mxu1 }
 0x3cd   : > { %v2989_v60 = vmul.f32 %v5499_v26, %v7245_v16  ;;  %v2853_v35 = vpop.f32.mrb[17].mxu1 }
 0x3ce   : > { %v2987_v8 = vmul.f32 %v7245_v16, %v2853_v35  ;;  %v5500_v53 = vpop.f32.mrb[18].mxu1 }
 0x3cf   : > { %v3028_v10 = vadd.f32 %v7251_v24, %v2989_v60  ;;  %v2990_v29 = vmul.f32 %v5500_v53, %v7245_v16  ;;  %v2856_v58 = vpop.f32.mrb[19].mxu1 }
 0x3d0   : > { %v3026_v37 = vadd.f32 %v7251_v24, %v2987_v8  ;;  %v2988_v12 = vmul.f32 %v7245_v16, %v2856_v58 }
 0x3d1   : > { %v3060_v19 = vmax.f32 %v3028_v10, 0.0  ;;  %v3029_v61 = vadd.f32 %v7251_v24, %v2990_v29 }
 0x3d2   : > { %v3058_v54 = vmax.f32 %v3026_v37, 0.0  ;;  %v3027_v20 = vadd.f32 %v7251_v24, %v2988_v12 }
 0x3d3   : > { %3093 = vst.msk [vmem:[#allocation3 + $0x31] sm:$0xff] %vm410_vm3, %v3060_v19  ;;  %v3061_v39 = vmax.f32 %v3029_v61, 0.0 }
 0x3d4   : > { %3091 = vst.msk [vmem:[#allocation3 + $0x19] sm:$0xff] %vm410_vm3, %v3058_v54  ;;  %v3059_v52 = vmax.f32 %v3027_v20, 0.0 }
 0x3d5   : > { %3094 = vst.msk [vmem:[#allocation3 + $0x39] sm:$0xff] %vm410_vm3, %v3061_v39 }
 0x3d6   : > { %3092 = vst.msk [vmem:[#allocation3 + $0x21] sm:$0xff] %vm410_vm3, %v3059_v52 }
 0x3da   : > { %v7268_v44 = vld [vmem:[#allocation3 + $0x31] sm:$0xff] }
 0x3db   : > { %v7270_v45 = vld [vmem:[#allocation3 + $0x30] sm:$0xff]  ;;  %3259 = vrot.lane.b32.xlu0 %v7268_v44, %s5640_s23  ;;  %v7276_v36 = vld [vmem:[#allocation3 + $0x18] sm:$0xff] }
 0x3dc   : > { %3159 = vst.msk [vmem:[#allocation5 + $0x20] sm:$0xff] %vm410_vm3, %v7270_v45  ;;  %v5503_v18 = vpop.f32.mrb[20].mxu1  ;;  %v7278_v25 = vld [vmem:[#allocation3 + $0x39] sm:$0xff]  ;;  %3157 = vst.msk [vmem:[#allocation5 + $0x10] sm:$0xff] %vm410_vm3, %v7276_v36 }
 0x3dd   : > { %v2993_v5 = vmul.f32 %v5503_v18, %v7245_v16  ;;  %3261 = vrot.lane.b32.xlu1 %v7278_v25, %s5640_s23  ;;  %v2869_v41 = vpop.f32.mrb[21].mxu1  ;;  %v7286_v30 = vld [vmem:[#allocation3 + $0x19] sm:$0xff]  ;;  %v7314_v14 = vld [vmem:[#allocation3 + $0x21] sm:$0xff] }
 0x3de   : > { %v2991_v43 = vmul.f32 %v7245_v16, %v2869_v41  ;;  %v5504_v51 = vpop.f32.mrb[22].mxu1  ;;  %v7288_v55 = vld [vmem:[#allocation3 + $0x38] sm:$0xff]  ;;  %v7290_v32 = vld [vmem:[#allocation3 + $0x20] sm:$0xff] }
 0x3df   : > { %v3032_v47 = vadd.f32 %v7251_v24, %v2993_v5  ;;  %v2994_v33 = vmul.f32 %v5504_v51, %v7245_v16  ;;  %3255 = vrot.lane.b32.xlu0 %v7286_v30, %s5640_s23  ;;  %v2872_v48 = vpop.f32.mrb[23].mxu1  ;;  %3160 = vst.msk [vmem:[#allocation5 + $0x28] sm:$0xff] %vm410_vm3, %v7288_v55  ;;  %3158 = vst.msk [vmem:[#allocation5 + $0x18] sm:$0xff] %vm410_vm3, %v7290_v32  ;;  %v7302_v63 = vld [vmem:[#allocation3 + $0x3a] sm:$0xff]  ;;  %v7308_v3 = vld [vmem:[#allocation3 + $0x32] sm:$0xff] }
 0x3e0   : > { %v3030_v50 = vadd.f32 %v7251_v24, %v2991_v43  ;;  %v2992_v46 = vmul.f32 %v7245_v16, %v2872_v48  ;;  %v7320_v21 = vld [vmem:[#allocation3 + $0x1a] sm:$0xff]  ;;  %v7324_v22 = vld [vmem:[#allocation3 + $0x22] sm:$0xff] }
 0x3e1   : > { %v3064_v1 = vmax.f32 %v3032_v47, 0.0  ;;  %v3033_v49 = vadd.f32 %v7251_v24, %v2994_v33  ;;  %3454 = vrot.lane.b32.xlu1 %v7302_v63, %s5650_s24 }
 0x3e2   : > { %v3062_v23 = vmax.f32 %v3030_v50, 0.0  ;;  %v3031_v34 = vadd.f32 %v7251_v24, %v2992_v46 }
 0x3e3   : > { %3097 = vst.msk [vmem:[#allocation3 + $0x61] sm:$0xff] %vm410_vm3, %v3064_v1  ;;  %v3065_v4 = vmax.f32 %v3033_v49, 0.0  ;;  %3452 = vrot.lane.b32.xlu0 %v7308_v3, %s5650_s24 }
 0x3e4   : > { %3095 = vst.msk [vmem:[#allocation3 + $0x49] sm:$0xff] %vm410_vm3, %v3062_v23  ;;  %v3063_v13 = vmax.f32 %v3031_v34, 0.0 }
 0x3e5   : > { %3098 = vst.msk [vmem:[#allocation3 + $0x69] sm:$0xff] %vm410_vm3, %v3065_v4  ;;  %3257 = vrot.lane.b32.xlu1 %v7314_v14, %s5640_s23 }
 0x3e6   : > { %3096 = vst.msk [vmem:[#allocation3 + $0x51] sm:$0xff] %vm410_vm3, %v3063_v13 }
 0x3e7   : > { %3448 = vrot.lane.b32.xlu0 %v7320_v21, %s5650_s24 }
 0x3e9   : > { %3450 = vrot.lane.b32.xlu1 %v7324_v22, %s5650_s24 }
 0x3ea   : > { %v7328_v42 = vld [vmem:[#allocation3 + $0x61] sm:$0xff] }
 0x3eb   : > { %v7330_v28 = vld [vmem:[#allocation3 + $0x60] sm:$0xff]  ;;  %3267 = vrot.lane.b32.xlu0 %v7328_v42, %s5640_s23  ;;  %v7336_v38 = vld [vmem:[#allocation3 + $0x48] sm:$0xff] }
 0x3ec   : > { %3163 = vst.msk [vmem:[#allocation5 + $0x40] sm:$0xff] %vm410_vm3, %v7330_v28  ;;  %v5507_v40 = vpop.f32.mrb[24].mxu1  ;;  %v7338_v9 = vld [vmem:[#allocation3 + $0x69] sm:$0xff]  ;;  %3161 = vst.msk [vmem:[#allocation5 + $0x30] sm:$0xff] %vm410_vm3, %v7336_v38 }
 0x3ed   : > { %v2997_v17 = vmul.f32 %v5507_v40, %v7245_v16  ;;  %3269 = vrot.lane.b32.xlu1 %v7338_v9, %s5640_s23  ;;  %v2885_v6 = vpop.f32.mrb[25].mxu1  ;;  %v7346_v0 = vld [vmem:[#allocation3 + $0x49] sm:$0xff]  ;;  %v7374_v12 = vld [vmem:[#allocation3 + $0x51] sm:$0xff] }
 0x3ee   : > { %v2995_v7 = vmul.f32 %v7245_v16, %v2885_v6  ;;  %v5508_v56 = vpop.f32.mrb[26].mxu1  ;;  %v7348_v57 = vld [vmem:[#allocation3 + $0x68] sm:$0xff]  ;;  %v7350_v2 = vld [vmem:[#allocation3 + $0x50] sm:$0xff] }
 0x3ef   : > { %v3036_v11 = vadd.f32 %v7251_v24, %v2997_v17  ;;  %v2998_v59 = vmul.f32 %v5508_v56, %v7245_v16  ;;  %3263 = vrot.lane.b32.xlu0 %v7346_v0, %s5640_s23  ;;  %v2888_v15 = vpop.f32.mrb[27].mxu1  ;;  %3164 = vst.msk [vmem:[#allocation5 + $0x48] sm:$0xff] %vm410_vm3, %v7348_v57  ;;  %3162 = vst.msk [vmem:[#allocation5 + $0x38] sm:$0xff] %vm410_vm3, %v7350_v2  ;;  %v7362_v35 = vld [vmem:[#allocation3 + $0x6a] sm:$0xff]  ;;  %v7368_v58 = vld [vmem:[#allocation3 + $0x62] sm:$0xff] }
 0x3f0   : > { %v3034_v26 = vadd.f32 %v7251_v24, %v2995_v7  ;;  %v2996_v60 = vmul.f32 %v7245_v16, %v2888_v15  ;;  %v7380_v62 = vld [vmem:[#allocation3 + $0x4a] sm:$0xff]  ;;  %v7384_v19 = vld [vmem:[#allocation3 + $0x52] sm:$0xff] }
 0x3f1   : > { %v3068_v8 = vmax.f32 %v3036_v11, 0.0  ;;  %v3037_v53 = vadd.f32 %v7251_v24, %v2998_v59  ;;  %3462 = vrot.lane.b32.xlu1 %v7362_v35, %s5650_s24 }
 0x3f2   : > { %v3066_v10 = vmax.f32 %v3034_v26, 0.0  ;;  %v3035_v29 = vadd.f32 %v7251_v24, %v2996_v60 }
 0x3f3   : > { %3101 = vst.msk [vmem:[#allocation3 + $0x91] sm:$0xff] %vm410_vm3, %v3068_v8  ;;  %v3069_v31 = vmax.f32 %v3037_v53, 0.0  ;;  %3460 = vrot.lane.b32.xlu0 %v7368_v58, %s5650_s24 }
 0x3f4   : > { %3099 = vst.msk [vmem:[#allocation3 + $0x79] sm:$0xff] %vm410_vm3, %v3066_v10  ;;  %v3067_v37 = vmax.f32 %v3035_v29, 0.0 }
 0x3f5   : > { %3102 = vst.msk [vmem:[#allocation3 + $0x99] sm:$0xff] %vm410_vm3, %v3069_v31  ;;  %3265 = vrot.lane.b32.xlu1 %v7374_v12, %s5640_s23 }
 0x3f6   : > { %3100 = vst.msk [vmem:[#allocation3 + $0x81] sm:$0xff] %vm410_vm3, %v3067_v37 }
 0x3f7   : > { %3456 = vrot.lane.b32.xlu0 %v7380_v62, %s5650_s24 }
 0x3f9   : > { %3458 = vrot.lane.b32.xlu1 %v7384_v19, %s5650_s24 }
 0x3fa   : > { %v7388_v61 = vld [vmem:[#allocation3 + $0x91] sm:$0xff] }
 0x3fb   : > { %v7390_v54 = vld [vmem:[#allocation3 + $0x90] sm:$0xff]  ;;  %3275 = vrot.lane.b32.xlu0 %v7388_v61, %s5640_s23  ;;  %v7396_v20 = vld [vmem:[#allocation3 + $0x78] sm:$0xff] }
 0x3fc   : > { %3167 = vst.msk [vmem:[#allocation5 + $0x60] sm:$0xff] %vm410_vm3, %v7390_v54  ;;  %v5511_v39 = vpop.f32.mrb[28].mxu1  ;;  %v7398_v27 = vld [vmem:[#allocation3 + $0x99] sm:$0xff]  ;;  %3165 = vst.msk [vmem:[#allocation5 + $0x50] sm:$0xff] %vm410_vm3, %v7396_v20 }
 0x3fd   : > { %v3001_v52 = vmul.f32 %v5511_v39, %v7245_v16  ;;  %3277 = vrot.lane.b32.xlu1 %v7398_v27, %s5640_s23  ;;  %v2901_v18 = vpop.f32.mrb[29].mxu1  ;;  %v7406_v43 = vld [vmem:[#allocation3 + $0x79] sm:$0xff]  ;;  %v7422_v49 = vld [vmem:[#allocation3 + $0x81] sm:$0xff] }
 0x3fe   : > { %v2999_v5 = vmul.f32 %v7245_v16, %v2901_v18  ;;  %v5512_v41 = vpop.f32.mrb[30].mxu1  ;;  %v7408_v51 = vld [vmem:[#allocation3 + $0x98] sm:$0xff]  ;;  %v7410_v47 = vld [vmem:[#allocation3 + $0x80] sm:$0xff] }
 0x3ff   : > { %v3040_v33 = vadd.f32 %v7251_v24, %v3001_v52  ;;  %v3002_v48 = vmul.f32 %v5512_v41, %v7245_v16  ;;  %3271 = vrot.lane.b32.xlu0 %v7406_v43, %s5640_s23  ;;  %v2904_v50 = vpop.f32.mrb[31].mxu1  ;;  %3168 = vst.msk [vmem:[#allocation5 + $0x68] sm:$0xff] %vm410_vm3, %v7408_v51  ;;  %3166 = vst.msk [vmem:[#allocation5 + $0x58] sm:$0xff] %vm410_vm3, %v7410_v47  ;;  %v7428_v40 = vld [vmem:[#allocation3 + $0x7a] sm:$0xff]  ;;  %v7434_v7 = vld [vmem:[#allocation3 + $0x82] sm:$0xff] }
 0x400   : > { %v3038_v46 = vadd.f32 %v7251_v24, %v2999_v5  ;;  %v3000_v1 = vmul.f32 %v7245_v16, %v2904_v50 }
 0x401   : > { %v3072_v23 = vmax.f32 %v3040_v33, 0.0  ;;  %v3041_v34 = vadd.f32 %v7251_v24, %v3002_v48  ;;  %3273 = vrot.lane.b32.xlu1 %v7422_v49, %s5640_s23 }
 0x402   : > { %v3070_v4 = vmax.f32 %v3038_v46, 0.0  ;;  %v3039_v13 = vadd.f32 %v7251_v24, %v3000_v1 }
 0x403   : > { %3105 = vst.msk [vmem:[#allocation3 + $0xc1] sm:$0xff] %vm410_vm3, %v3072_v23  ;;  %v3073_v17 = vmax.f32 %v3041_v34, 0.0  ;;  %3464 = vrot.lane.b32.xlu0 %v7428_v40, %s5650_s24 }
 0x404   : > { %3103 = vst.msk [vmem:[#allocation3 + $0xa9] sm:$0xff] %vm410_vm3, %v3070_v4  ;;  %v3071_v6 = vmax.f32 %v3039_v13, 0.0 }
 0x405   : > { %3106 = vst.msk [vmem:[#allocation3 + $0xc9] sm:$0xff] %vm410_vm3, %v3073_v17  ;;  %3466 = vrot.lane.b32.xlu1 %v7434_v7, %s5650_s24 }
 0x406   : > { %3104 = vst.msk [vmem:[#allocation3 + $0xb1] sm:$0xff] %vm410_vm3, %v3071_v6 }
 0x40a   : > { %v3203_v56 = vld [vmem:[#allocation3 + $0xc1] sm:$0xff] }
 0x40b   : > { %v7440_v11 = vld [vmem:[#allocation3 + $0xc0] sm:$0xff]  ;;  %3283 = vrot.lane.b32.xlu0 %v3203_v56, %s5640_s23  ;;  %v7445_v59 = vld [vmem:[#allocation3 + $0xa8] sm:$0xff] }
 0x40c   : > { %3171 = vst.msk [vmem:[#allocation5 + $0x80] sm:$0xff] %vm410_vm3, %v7440_v11  ;;  %v5515_v15 = vpop.f32.mrb[32].mxu1  ;;  %v3204_v26 = vld [vmem:[#allocation3 + $0xc9] sm:$0xff]  ;;  %3169 = vst.msk [vmem:[#allocation5 + $0x70] sm:$0xff] %vm410_vm3, %v7445_v59 }
 0x40d   : > { %v3005_v60 = vmul.f32 %v5515_v15, %v7245_v16  ;;  %3285 = vrot.lane.b32.xlu1 %v3204_v26, %s5640_s23  ;;  %v2917_v8 = vpop.f32.mrb[33].mxu1  ;;  %v7452_v29 = vld [vmem:[#allocation3 + $0xa9] sm:$0xff]  ;;  %v7468_v33 = vld [vmem:[#allocation3 + $0xb1] sm:$0xff] }
 0x40e   : > { %v3003_v53 = vmul.f32 %v7245_v16, %v2917_v8  ;;  %v5516_v10 = vpop.f32.mrb[34].mxu1  ;;  %v7454_v31 = vld [vmem:[#allocation3 + $0xc8] sm:$0xff]  ;;  %v7456_v37 = vld [vmem:[#allocation3 + $0xb0] sm:$0xff] }
 0x40f   : > { %v3044_v39 = vadd.f32 %v7251_v24, %v3005_v60  ;;  %v3006_v52 = vmul.f32 %v5516_v10, %v7245_v16  ;;  %3279 = vrot.lane.b32.xlu0 %v7452_v29, %s5640_s23  ;;  %v2920_v18 = vpop.f32.mrb[35].mxu1  ;;  %3172 = vst.msk [vmem:[#allocation5 + $0x88] sm:$0xff] %vm410_vm3, %v7454_v31  ;;  %3170 = vst.msk [vmem:[#allocation5 + $0x78] sm:$0xff] %vm410_vm3, %v7456_v37 }
 0x410   : > { %v3042_v5 = vadd.f32 %v7251_v24, %v3003_v53  ;;  %v3004_v41 = vmul.f32 %v7245_v16, %v2920_v18 }
 0x411   : > { %v3076_v48 = vmax.f32 %v3044_v39, 0.0  ;;  %v3045_v50 = vadd.f32 %v7251_v24, %v3006_v52  ;;  %3281 = vrot.lane.b32.xlu1 %v7468_v33, %s5640_s23 }
 0x412   : > { %v3074_v46 = vmax.f32 %v3042_v5, 0.0  ;;  %v3043_v1 = vadd.f32 %v7251_v24, %v3004_v41 }
 0x413   : > { %3109 = vst.msk [vmem:[#allocation3 + $0xf1] sm:$0xff] %vm410_vm3, %v3076_v48  ;;  %v3077_v23 = vmax.f32 %v3045_v50, 0.0 }
 0x414   : > { %3107 = vst.msk [vmem:[#allocation3 + $0xd9] sm:$0xff] %vm410_vm3, %v3074_v46  ;;  %v3075_v34 = vmax.f32 %v3043_v1, 0.0 }
 0x415   : > { %3110 = vst.msk [vmem:[#allocation3 + $0xf9] sm:$0xff] %vm410_vm3, %v3077_v23 }
 0x416   : > { %3108 = vst.msk [vmem:[#allocation3 + $0xe1] sm:$0xff] %vm410_vm3, %v3075_v34 }
 0x41a   : > { %v3207_v4 = vld [vmem:[#allocation3 + $0xf1] sm:$0xff] }
 0x41b   : > { %v7478_v13 = vld [vmem:[#allocation3 + $0xf0] sm:$0xff]  ;;  %3291 = vrot.lane.b32.xlu0 %v3207_v4, %s5640_s23  ;;  %v7483_v17 = vld [vmem:[#allocation3 + $0xd8] sm:$0xff] }
 0x41c   : > { %3175 = vst.msk [vmem:[#allocation5 + $0xa0] sm:$0xff] %vm410_vm3, %v7478_v13  ;;  %v5519_v6 = vpop.f32.mrb[36].mxu1  ;;  %v3208_v56 = vld [vmem:[#allocation3 + $0xf9] sm:$0xff]  ;;  %3173 = vst.msk [vmem:[#allocation5 + $0x90] sm:$0xff] %vm410_vm3, %v7483_v17 }
 0x41d   : > { %v3009_v15 = vmul.f32 %v5519_v6, %v7245_v16  ;;  %3293 = vrot.lane.b32.xlu1 %v3208_v56, %s5640_s23  ;;  %v2933_v26 = vpop.f32.mrb[37].mxu1  ;;  %v3205_v53 = vld [vmem:[#allocation3 + $0xd9] sm:$0xff]  ;;  %v3206_v50 = vld [vmem:[#allocation3 + $0xe1] sm:$0xff] }
 0x41e   : > { %v3007_v60 = vmul.f32 %v7245_v16, %v2933_v26  ;;  %v5520_v8 = vpop.f32.mrb[38].mxu1  ;;  %v7490_v10 = vld [vmem:[#allocation3 + $0xf8] sm:$0xff]  ;;  %v7492_v39 = vld [vmem:[#allocation3 + $0xe0] sm:$0xff] }
 0x41f   : > { %v3048_v52 = vadd.f32 %v7251_v24, %v3009_v15  ;;  %v3010_v18 = vmul.f32 %v5520_v8, %v7245_v16  ;;  %3287 = vrot.lane.b32.xlu0 %v3205_v53, %s5640_s23  ;;  %v2936_v5 = vpop.f32.mrb[39].mxu1  ;;  %3176 = vst.msk [vmem:[#allocation5 + $0xa8] sm:$0xff] %vm410_vm3, %v7490_v10  ;;  %3174 = vst.msk [vmem:[#allocation5 + $0x98] sm:$0xff] %vm410_vm3, %v7492_v39 }
 0x420   : > { %v3046_v41 = vadd.f32 %v7251_v24, %v3007_v60  ;;  %v3008_v48 = vmul.f32 %v7245_v16, %v2936_v5 }
 0x421   : > { %v3080_v46 = vmax.f32 %v3048_v52, 0.0  ;;  %v3049_v1 = vadd.f32 %v7251_v24, %v3010_v18  ;;  %3289 = vrot.lane.b32.xlu1 %v3206_v50, %s5640_s23 }
 0x422   : > { %v3078_v23 = vmax.f32 %v3046_v41, 0.0  ;;  %v3047_v34 = vadd.f32 %v7251_v24, %v3008_v48 }
 0x423   : > { %3113 = vst.msk [vmem:[#allocation3 + $0x121] sm:$0xff] %vm410_vm3, %v3080_v46  ;;  %v3081_v4 = vmax.f32 %v3049_v1, 0.0 }
 0x424   : > { %3111 = vst.msk [vmem:[#allocation3 + $0x109] sm:$0xff] %vm410_vm3, %v3078_v23  ;;  %v3079_v6 = vmax.f32 %v3047_v34, 0.0 }
 0x425   : > { %3114 = vst.msk [vmem:[#allocation3 + $0x129] sm:$0xff] %vm410_vm3, %v3081_v4 }
 0x426   : > { %3112 = vst.msk [vmem:[#allocation3 + $0x111] sm:$0xff] %vm410_vm3, %v3079_v6 }
 0x42a   : > { %v3211_v56 = vld [vmem:[#allocation3 + $0x121] sm:$0xff] }
 0x42b   : > { %v7510_v15 = vld [vmem:[#allocation3 + $0x120] sm:$0xff]  ;;  %3299 = vrot.lane.b32.xlu0 %v3211_v56, %s5640_s23  ;;  %v7515_v26 = vld [vmem:[#allocation3 + $0x108] sm:$0xff] }
 0x42c   : > { %8365 = vst [vmem:[#allocation7_spill] sm:$0xff] %v7510_v15  ;;  %3179 = vst.msk [vmem:[#allocation5 + $0xc0] sm:$0xff] %vm410_vm3, %v7510_v15  ;;  %v3212_v60 = vld [vmem:[#allocation3 + $0x129] sm:$0xff] }
 0x42d   : > { %3177 = vst.msk [vmem:[#allocation5 + $0xb0] sm:$0xff] %vm410_vm3, %v7515_v26  ;;  %3301 = vrot.lane.b32.xlu1 %v3212_v60, %s5640_s23  ;;  %v3209_v8 = vld [vmem:[#allocation3 + $0x109] sm:$0xff]  ;;  %v3210_v5 = vld [vmem:[#allocation3 + $0x111] sm:$0xff] }
 0x42e   : > { %v7520_v53 = vld [vmem:[#allocation3 + $0x128] sm:$0xff]  ;;  %v7522_v52 = vld [vmem:[#allocation3 + $0x110] sm:$0xff] }
 0x42f   : > { %8366 = vst [vmem:[#allocation6_spill] sm:$0xff] %v7520_v53  ;;  %3295 = vrot.lane.b32.xlu0 %v3209_v8, %s5640_s23  ;;  %3180 = vst.msk [vmem:[#allocation5 + $0xc8] sm:$0xff] %vm410_vm3, %v7520_v53 }
 0x430   : > { %3178 = vst.msk [vmem:[#allocation5 + $0xb8] sm:$0xff] %vm410_vm3, %v7522_v52  ;;  %v5523_v18 = vpop.f32.mrb[40].mxu1 }
 0x431   : > { %v3013_v41 = vmul.f32 %v5523_v18, %v7245_v16  ;;  %3297 = vrot.lane.b32.xlu1 %v3210_v5, %s5640_s23  ;;  %v2949_v48 = vpop.f32.mrb[41].mxu1 }
 0x432   : > { %v3011_v50 = vmul.f32 %v7245_v16, %v2949_v48  ;;  %v5524_v46 = vpop.f32.mrb[42].mxu1 }
 0x433   : > { %v3052_v1 = vadd.f32 %v7251_v24, %v3013_v41  ;;  %v3014_v23 = vmul.f32 %v5524_v46, %v7245_v16  ;;  %v2952_v34 = vpop.f32.mrb[43].mxu1 }
 0x434   : > { %v3050_v4 = vadd.f32 %v7251_v24, %v3011_v50  ;;  %v3012_v6 = vmul.f32 %v7245_v16, %v2952_v34 }
 0x435   : > { %v3084_v56 = vmax.f32 %v3052_v1, 0.0  ;;  %v3053_v60 = vadd.f32 %v7251_v24, %v3014_v23 }
 0x436   : > { %v3082_v8 = vmax.f32 %v3050_v4, 0.0  ;;  %v3051_v18 = vadd.f32 %v7251_v24, %v3012_v6 }
 0x437   : > { %3117 = vst.msk [vmem:[#allocation3 + $0x151] sm:$0xff] %vm410_vm3, %v3084_v56  ;;  %v3085_v5 = vmax.f32 %v3053_v60, 0.0  ;;  %v7556_v56 = vld [vmem:[#allocation3 + $0x92] sm:$0xff] }
 0x438   : > { %3115 = vst.msk [vmem:[#allocation3 + $0x139] sm:$0xff] %vm410_vm3, %v3082_v8  ;;  %v3083_v48 = vmax.f32 %v3051_v18, 0.0  ;;  %v7560_v8 = vld [vmem:[#allocation3 + $0x9a] sm:$0xff] }
 0x439   : > { %3118 = vst.msk [vmem:[#allocation3 + $0x159] sm:$0xff] %vm410_vm3, %v3085_v5 }
 0x43a   : > { %3116 = vst.msk [vmem:[#allocation3 + $0x141] sm:$0xff] %vm410_vm3, %v3083_v48 }
 0x43e   : > { %v3215_v41 = vld [vmem:[#allocation3 + $0x151] sm:$0xff] }
 0x43f   : > { %v3151_v50 = vld [vmem:[#allocation3 + $0x150] sm:$0xff]  ;;  %3307 = vrot.lane.b32.xlu0 %v3215_v41, %s5640_s23  ;;  %v7544_v46 = vld [vmem:[#allocation3 + $0x138] sm:$0xff] }
 0x440   : > { %3183 = vst.msk [vmem:[#allocation5 + $0xe0] sm:$0xff] %vm410_vm3, %v3151_v50  ;;  %8367 = vst [vmem:[#allocation8_spill] sm:$0xff] %v7544_v46  ;;  %v3216_v1 = vld [vmem:[#allocation3 + $0x159] sm:$0xff] }
 0x441   : > { %3181 = vst.msk [vmem:[#allocation5 + $0xd0] sm:$0xff] %vm410_vm3, %v7544_v46  ;;  %3309 = vrot.lane.b32.xlu1 %v3216_v1, %s5640_s23  ;;  %v3213_v23 = vld [vmem:[#allocation3 + $0x139] sm:$0xff]  ;;  %v3214_v6 = vld [vmem:[#allocation3 + $0x141] sm:$0xff] }
 0x442   : > { %v3152_v34 = vld [vmem:[#allocation3 + $0x158] sm:$0xff]  ;;  %v7549_v4 = vld [vmem:[#allocation3 + $0x140] sm:$0xff] }
 0x443   : > { %8368 = vst [vmem:[#allocation9_spill] sm:$0xff] %v7549_v4  ;;  %3303 = vrot.lane.b32.xlu0 %v3213_v23, %s5640_s23  ;;  %3184 = vst.msk [vmem:[#allocation5 + $0xe8] sm:$0xff] %vm410_vm3, %v3152_v34 }
 0x444   : > { %3182 = vst.msk [vmem:[#allocation5 + $0xd8] sm:$0xff] %vm410_vm3, %v7549_v4 }
 0x445   : > { %3305 = vrot.lane.b32.xlu1 %v3214_v6, %s5640_s23 }
 0x447   : > { %3468 = vrot.lane.b32.xlu0 %v7556_v56, %s5650_s24 }
 0x448   : > { %v5527_v60 = vpop.f32.mrb[44].mxu1 }
 0x449   : > { %v3017_v18 = vmul.f32 %v5527_v60, %v7245_v16  ;;  %3470 = vrot.lane.b32.xlu1 %v7560_v8, %s5650_s24  ;;  %v2965_v5 = vpop.f32.mrb[45].mxu1 }
 0x44a   : > { %v3015_v48 = vmul.f32 %v7245_v16, %v2965_v5  ;;  %v5528_v41 = vpop.f32.mrb[46].mxu1 }
 0x44b   : > { %v3056_v50 = vadd.f32 %v7251_v24, %v3017_v18  ;;  %v3018_v1 = vmul.f32 %v5528_v41, %v7245_v16  ;;  %v2968_v23 = vpop.f32.mrb[47].mxu1 }
 0x44c   : > { %v3054_v34 = vadd.f32 %v7251_v24, %v3015_v48  ;;  %v3016_v6 = vmul.f32 %v7245_v16, %v2968_v23 }
 0x44d   : > { %v3088_v4 = vmax.f32 %v3056_v50, 0.0  ;;  %v3057_v46 = vadd.f32 %v7251_v24, %v3018_v1  ;;  %v3260_v60 = vpop.permute.xlu0 %3259 }
 0x44e   : > { %v3086_v53 = vmax.f32 %v3054_v34, 0.0  ;;  %v3055_v15 = vadd.f32 %v7251_v24, %v3016_v6  ;;  %3352 = vst.msk [vmem:[#allocation5 + $0x20] sm:$0xff] %vm3347_vm0, %v3260_v60  ;;  %v7586_v34 = vld [vmem:[#allocation3 + $0xaa] sm:$0xff]  ;;  %v7592_v60 = vld [vmem:[#allocation3 + $0xb2] sm:$0xff] }
 0x44f   : > { %3121 = vst.msk [vmem:[#allocation3 + $0x181] sm:$0xff] %vm410_vm3, %v3088_v4  ;;  %v3089_v5 = vmax.f32 %v3057_v46, 0.0  ;;  %v3262_v18 = vpop.permute.xlu1 %3261 }
 0x450   : > { %3119 = vst.msk [vmem:[#allocation3 + $0x169] sm:$0xff] %vm410_vm3, %v3086_v53  ;;  %v3087_v41 = vmax.f32 %v3055_v15, 0.0 }
 0x451   : > { %3353 = vst.msk [vmem:[#allocation5 + $0x28] sm:$0xff] %vm3347_vm0, %v3262_v18  ;;  %v3256_v16 = vpop.permute.xlu0 %3255  ;;  %v7597_v18 = vld [vmem:[#allocation3 + $0xc2] sm:$0xff] }
 0x452   : > { %3122 = vst.msk [vmem:[#allocation3 + $0x189] sm:$0xff] %vm410_vm3, %v3089_v5  ;;  %3120 = vst.msk [vmem:[#allocation3 + $0x171] sm:$0xff] %vm410_vm3, %v3087_v41 }
 0x453   : > { %3350 = vst.msk [vmem:[#allocation5 + $0x10] sm:$0xff] %vm3347_vm0, %v3256_v16  ;;  %v3455_v48 = vpop.permute.xlu1 %3454  ;;  %v7602_v16 = vld [vmem:[#allocation3 + $0xca] sm:$0xff] }
 0x454   : > { %3546 = vst.msk [vmem:[#allocation5 + $0x28] sm:$0xff] %vm3540_vm1, %v3455_v48 }
 0x455   : > { %v3453_v24 = vpop.permute.xlu0 %3452 }
 0x456   : > { %3545 = vst.msk [vmem:[#allocation5 + $0x20] sm:$0xff] %vm3540_vm1, %v3453_v24  ;;  %v7607_v24 = vld [vmem:[#allocation3 + $0xda] sm:$0xff] }
 0x457   : > { %v3258_v46 = vpop.permute.xlu1 %3257  ;;  %v3217_v4 = vld [vmem:[#allocation3 + $0x169] sm:$0xff] }
 0x458   : > { %v3153_v50 = vld [vmem:[#allocation3 + $0x168] sm:$0xff]  ;;  %3351 = vst.msk [vmem:[#allocation5 + $0x18] sm:$0xff] %vm3347_vm0, %v3258_v46  ;;  %3311 = vrot.lane.b32.xlu0 %v3217_v4, %s5640_s23 }
 0x459   : > { %3185 = vst.msk [vmem:[#allocation5 + $0xf0] sm:$0xff] %vm410_vm3, %v3153_v50  ;;  %v3449_v15 = vpop.permute.xlu0 %3448  ;;  %v3218_v53 = vld [vmem:[#allocation3 + $0x171] sm:$0xff]  ;;  %v7612_v4 = vld [vmem:[#allocation3 + $0xe2] sm:$0xff] }
 0x45a   : > { %3543 = vst.msk [vmem:[#allocation5 + $0x10] sm:$0xff] %vm3540_vm1, %v3449_v15  ;;  %3313 = vrot.lane.b32.xlu1 %v3218_v53, %s5640_s23  ;;  %v3154_v1 = vld [vmem:[#allocation3 + $0x170] sm:$0xff]  ;;  %s5651_s23 = smov 32  }
 0x45b   : > { %v3451_v23 = vpop.permute.xlu1 %3450  ;;  %3186 = vst.msk [vmem:[#allocation5 + $0xf8] sm:$0xff] %vm410_vm3, %v3154_v1  ;;  %v3400_v15 = vld [vmem:[#allocation3 + $0xf2] sm:$0xff]  ;;  %v3401_v1 = vld [vmem:[#allocation3 + $0xfa] sm:$0xff] }
 0x45c   : > { %3544 = vst.msk [vmem:[#allocation5 + $0x18] sm:$0xff] %vm3540_vm1, %v3451_v23  ;;  %3472 = vrot.lane.b32.xlu0 %v7586_v34, %s5650_s24 }
 0x45d   : > { %v3268_v6 = vpop.permute.xlu0 %3267 }
 0x45e   : > { %3356 = vst.msk [vmem:[#allocation5 + $0x40] sm:$0xff] %vm3347_vm0, %v3268_v6  ;;  %3474 = vrot.lane.b32.xlu1 %v7592_v60, %s5650_s24  ;;  %v3402_v6 = vld [vmem:[#allocation3 + $0x10a] sm:$0xff] }
 0x45f   : > { %v3270_v5 = vpop.permute.xlu1 %3269 }
 0x460   : > { %3357 = vst.msk [vmem:[#allocation5 + $0x48] sm:$0xff] %vm3347_vm0, %v3270_v5  ;;  %3476 = vrot.lane.b32.xlu0 %v7597_v18, %s5650_s24 }
 0x461   : > { %v3264_v41 = vpop.permute.xlu0 %3263 }
 0x462   : > { %3354 = vst.msk [vmem:[#allocation5 + $0x30] sm:$0xff] %vm3347_vm0, %v3264_v41  ;;  %3478 = vrot.lane.b32.xlu1 %v7602_v16, %s5650_s24  ;;  %v3403_v41 = vld [vmem:[#allocation3 + $0x112] sm:$0xff] }
 0x463   : > { %v3463_v48 = vpop.permute.xlu1 %3462 }
 0x464   : > { %3550 = vst.msk [vmem:[#allocation5 + $0x48] sm:$0xff] %vm3540_vm1, %v3463_v48  ;;  %3480 = vrot.lane.b32.xlu0 %v7607_v24, %s5650_s24 }
 0x465   : > { %v3461_v46 = vpop.permute.xlu0 %3460 }
 0x466   : > { %3549 = vst.msk [vmem:[#allocation5 + $0x40] sm:$0xff] %vm3540_vm1, %v3461_v46  ;;  %3482 = vrot.lane.b32.xlu1 %v7612_v4, %s5650_s24  ;;  %v3404_v46 = vld [vmem:[#allocation3 + $0x122] sm:$0xff] }
 0x467   : > { %v3266_v50 = vpop.permute.xlu1 %3265 }
 0x468   : > { %3355 = vst.msk [vmem:[#allocation5 + $0x38] sm:$0xff] %vm3347_vm0, %v3266_v50  ;;  %3484 = vrot.lane.b32.xlu0 %v3400_v15, %s5650_s24  ;;  %v3405_v15 = vld [vmem:[#allocation3 + $0x12a] sm:$0xff] }
 0x469   : > { %v3457_v53 = vpop.permute.xlu0 %3456 }
 0x46a   : > { %3547 = vst.msk [vmem:[#allocation5 + $0x30] sm:$0xff] %vm3540_vm1, %v3457_v53  ;;  %3486 = vrot.lane.b32.xlu1 %v3401_v1, %s5650_s24  ;;  %v3406_v1 = vld [vmem:[#allocation3 + $0x13a] sm:$0xff] }
 0x46b   : > { %v3459_v23 = vpop.permute.xlu1 %3458 }
 0x46c   : > { %3548 = vst.msk [vmem:[#allocation5 + $0x38] sm:$0xff] %vm3540_vm1, %v3459_v23  ;;  %3488 = vrot.lane.b32.xlu0 %v3402_v6, %s5650_s24  ;;  %v3407_v6 = vld [vmem:[#allocation3 + $0x142] sm:$0xff] }
 0x46d   : > { %v3276_v5 = vpop.permute.xlu0 %3275 }
 0x46e   : > { %3360 = vst.msk [vmem:[#allocation5 + $0x60] sm:$0xff] %vm3347_vm0, %v3276_v5  ;;  %3490 = vrot.lane.b32.xlu1 %v3403_v41, %s5650_s24  ;;  %v3408_v41 = vld [vmem:[#allocation3 + $0x152] sm:$0xff] }
 0x46f   : > { %v3278_v48 = vpop.permute.xlu1 %3277 }
 0x470   : > { %3361 = vst.msk [vmem:[#allocation5 + $0x68] sm:$0xff] %vm3347_vm0, %v3278_v48  ;;  %3492 = vrot.lane.b32.xlu0 %v3404_v46, %s5650_s24  ;;  %v3409_v48 = vld [vmem:[#allocation3 + $0x15a] sm:$0xff]  ;;  %v3410_v46 = vld [vmem:[#allocation3 + $0x16a] sm:$0xff] }
 0x471   : > { %v3272_v50 = vpop.permute.xlu0 %3271 }
 0x472   : > { %3358 = vst.msk [vmem:[#allocation5 + $0x50] sm:$0xff] %vm3347_vm0, %v3272_v50  ;;  %3494 = vrot.lane.b32.xlu1 %v3405_v15, %s5650_s24  ;;  %v3411_v15 = vld [vmem:[#allocation3 + $0x172] sm:$0xff] }
 0x473   : > { %v3274_v53 = vpop.permute.xlu1 %3273 }
 0x474   : > { %3359 = vst.msk [vmem:[#allocation5 + $0x58] sm:$0xff] %vm3347_vm0, %v3274_v53  ;;  %3496 = vrot.lane.b32.xlu0 %v3406_v1, %s5650_s24 }
 0x475   : > { %v3465_v23 = vpop.permute.xlu0 %3464 }
 0x476   : > { %3551 = vst.msk [vmem:[#allocation5 + $0x50] sm:$0xff] %vm3540_vm1, %v3465_v23  ;;  %3498 = vrot.lane.b32.xlu1 %v3407_v6, %s5650_s24 }
 0x477   : > { %v3467_v5 = vpop.permute.xlu1 %3466 }
 0x478   : > { %3552 = vst.msk [vmem:[#allocation5 + $0x58] sm:$0xff] %vm3540_vm1, %v3467_v5  ;;  %3500 = vrot.lane.b32.xlu0 %v3408_v41, %s5650_s24 }
 0x47a   : > { %3502 = vrot.lane.b32.xlu1 %v3409_v48, %s5650_s24 }
 0x47c   : > { %3504 = vrot.lane.b32.xlu0 %v3410_v46, %s5650_s24 }
 0x47d   : > { %v3284_v50 = vpop.permute.xlu0 %3283 }
 0x47e   : > { %3364 = vst.msk [vmem:[#allocation5 + $0x80] sm:$0xff] %vm3347_vm0, %v3284_v50  ;;  %3506 = vrot.lane.b32.xlu1 %v3411_v15, %s5650_s24  ;;  %v5628_v15 = vld [vmem:[%s8345_s6 + $0x8] sm:$0xff]  }
 0x47f   : > { %v3286_v53 = vpop.permute.xlu1 %3285 }
 0x480   : > { %3365 = vst.msk [vmem:[#allocation5 + $0x88] sm:$0xff] %vm3347_vm0, %v3286_v53  ;;  %3637 = vrot.lane.b32.xlu0 %v7276_v36, %s5643_s19 }
 0x481   : > { %v3280_v1 = vpop.permute.xlu0 %3279 }
 0x482   : > { %3362 = vst.msk [vmem:[#allocation5 + $0x70] sm:$0xff] %vm3347_vm0, %v3280_v1  ;;  %3639 = vrot.lane.b32.xlu1 %v7290_v32, %s5643_s19 }
 0x483   : > { %v3282_v23 = vpop.permute.xlu1 %3281 }
 0x484   : > { %3363 = vst.msk [vmem:[#allocation5 + $0x78] sm:$0xff] %vm3347_vm0, %v3282_v23  ;;  %3641 = vrot.lane.b32.xlu0 %v7270_v45, %s5643_s19 }
 0x486   : > { %3643 = vrot.lane.b32.xlu1 %v7288_v55, %s5643_s19 }
 0x488   : > { %3645 = vrot.lane.b32.xlu0 %v7336_v38, %s5643_s19 }
 0x48a   : > { %3647 = vrot.lane.b32.xlu1 %v7350_v2, %s5643_s19 }
 0x48c   : > { %3649 = vrot.lane.b32.xlu0 %v7330_v28, %s5643_s19 }
 0x48d   : > { %v3292_v36 = vpop.permute.xlu0 %3291 }
 0x48e   : > { %3368 = vst.msk [vmem:[#allocation5 + $0xa0] sm:$0xff] %vm3347_vm0, %v3292_v36  ;;  %3651 = vrot.lane.b32.xlu1 %v7348_v57, %s5643_s19 }
 0x48f   : > { %v3294_v32 = vpop.permute.xlu1 %3293 }
 0x490   : > { %3369 = vst.msk [vmem:[#allocation5 + $0xa8] sm:$0xff] %vm3347_vm0, %v3294_v32  ;;  %3653 = vrot.lane.b32.xlu0 %v7396_v20, %s5643_s19 }
 0x491   : > { %v3288_v6 = vpop.permute.xlu0 %3287 }
 0x492   : > { %3366 = vst.msk [vmem:[#allocation5 + $0x90] sm:$0xff] %vm3347_vm0, %v3288_v6  ;;  %3655 = vrot.lane.b32.xlu1 %v7410_v47, %s5643_s19 }
 0x493   : > { %v3290_v5 = vpop.permute.xlu1 %3289 }
 0x494   : > { %3367 = vst.msk [vmem:[#allocation5 + $0x98] sm:$0xff] %vm3347_vm0, %v3290_v5  ;;  %3657 = vrot.lane.b32.xlu0 %v7390_v54, %s5643_s19 }
 0x496   : > { %3659 = vrot.lane.b32.xlu1 %v7408_v51, %s5643_s19 }
 0x498   : > { %3661 = vrot.lane.b32.xlu0 %v7445_v59, %s5643_s19 }
 0x49a   : > { %3663 = vrot.lane.b32.xlu1 %v7456_v37, %s5643_s19 }
 0x49c   : > { %3665 = vrot.lane.b32.xlu0 %v7440_v11, %s5643_s19 }
 0x49d   : > { %v3300_v41 = vpop.permute.xlu0 %3299 }
 0x49e   : > { %3372 = vst.msk [vmem:[#allocation5 + $0xc0] sm:$0xff] %vm3347_vm0, %v3300_v41  ;;  %3667 = vrot.lane.b32.xlu1 %v7454_v31, %s5643_s19 }
 0x49f   : > { %v3302_v48 = vpop.permute.xlu1 %3301 }
 0x4a0   : > { %3373 = vst.msk [vmem:[#allocation5 + $0xc8] sm:$0xff] %vm3347_vm0, %v3302_v48  ;;  %3669 = vrot.lane.b32.xlu0 %v7483_v17, %s5643_s19 }
 0x4a1   : > { %v3296_v46 = vpop.permute.xlu0 %3295 }
 0x4a2   : > { %3370 = vst.msk [vmem:[#allocation5 + $0xb0] sm:$0xff] %vm3347_vm0, %v3296_v46  ;;  %3830 = vrot.lane.b32.xlu1 %v7286_v30, %s5651_s23 }
 0x4a3   : > { %v3298_v50 = vpop.permute.xlu1 %3297 }
 0x4a4   : > { %3371 = vst.msk [vmem:[#allocation5 + $0xb8] sm:$0xff] %vm3347_vm0, %v3298_v50  ;;  %3832 = vrot.lane.b32.xlu0 %v7314_v14, %s5651_s23  ;;  %v5627_v14 = vld [vmem:[%s8345_s6] sm:$0xff]  }
 0x4a5   : > { %5529 = vmatprep.subr.bf16.mxu0 %v5627_v14 }
 0x4a6   : > { %3834 = vrot.lane.b32.xlu1 %v7268_v44, %s5651_s23  ;;  %5530 = vmatpush3.bf16.msra.mxu0 %v5627_v14 }
 0x4a7   : > { %5531 = vmatprep.subr.bf16.mxu0 %v5628_v15 }
 0x4a8   : > { %3836 = vrot.lane.b32.xlu0 %v7278_v25, %s5651_s23 }
 0x4aa   : > { %4023 = vrot.lane.b32.xlu1 %v7320_v21, %s5652_s12  ;;  %5532 = vmatpush3.bf16.msra.mxu0 %v5628_v15 }
 0x4ac   : > { %4025 = vrot.lane.b32.xlu0 %v7324_v22, %s5652_s12 }
 0x4ae   : > { %4027 = vrot.lane.b32.xlu1 %v7308_v3, %s5652_s12 }
 0x4b0   : > { %4029 = vrot.lane.b32.xlu0 %v7302_v63, %s5652_s12 }
 0x4b1   : > { %v3308_v30 = vpop.permute.xlu0 %3307 }
 0x4b2   : > { %3376 = vst.msk [vmem:[#allocation5 + $0xe0] sm:$0xff] %vm3347_vm0, %v3308_v30  ;;  %4217 = vrot.lane.b32.xlu1 %v7270_v45, %s5644_s22 }
 0x4b3   : > { %v3310_v21 = vpop.permute.xlu1 %3309 }
 0x4b4   : > { %3377 = vst.msk [vmem:[#allocation5 + $0xe8] sm:$0xff] %vm3347_vm0, %v3310_v21  ;;  %4219 = vrot.lane.b32.xlu0 %v7288_v55, %s5644_s22  ;;  %v5629_v55 = vld [vmem:[%s8345_s6 + $0x10] sm:$0xff]  }
 0x4b5   : > { %v3304_v22 = vpop.permute.xlu0 %3303  ;;  %5533 = vmatprep.subr.bf16.mxu0 %v5629_v55 }
 0x4b6   : > { %3374 = vst.msk [vmem:[#allocation5 + $0xd0] sm:$0xff] %vm3347_vm0, %v3304_v22  ;;  %4221 = vrot.lane.b32.xlu1 %v7336_v38, %s5644_s22  ;;  %5534 = vmatpush3.bf16.msra.mxu0 %v5629_v55 }
 0x4b7   : > { %v3306_v53 = vpop.permute.xlu1 %3305 }
 0x4b8   : > { %3375 = vst.msk [vmem:[#allocation5 + $0xd8] sm:$0xff] %vm3347_vm0, %v3306_v53  ;;  %4223 = vrot.lane.b32.xlu0 %v7350_v2, %s5644_s22  ;;  %v5630_v2 = vld [vmem:[%s8345_s6 + $0x18] sm:$0xff]  }
 0x4b9   : > { %v3469_v45 = vpop.permute.xlu0 %3468  ;;  %5535 = vmatprep.subr.bf16.mxu0 %v5630_v2 }
 0x4ba   : > { %3553 = vst.msk [vmem:[#allocation5 + $0x60] sm:$0xff] %vm3540_vm1, %v3469_v45  ;;  %4410 = vrot.lane.b32.xlu1 %v7268_v44, %s5653_s21  ;;  %5536 = vmatpush3.bf16.msra.mxu0 %v5630_v2  ;;  %v5631_v44 = vld [vmem:[%s8345_s6 + $0x20] ss:$0 sps:$4 sm:$0xff]  }
 0x4bb   : > { %v3471_v38 = vpop.permute.xlu1 %3470  ;;  %5596 = vmatprep.subr.msk.bf16.mxu0 %vm4865_vm2, %v5631_v44 }
 0x4bc   : > { %3554 = vst.msk [vmem:[#allocation5 + $0x68] sm:$0xff] %vm3540_vm1, %v3471_v38  ;;  %4412 = vrot.lane.b32.xlu0 %v7278_v25, %s5653_s21  ;;  %v4867_v25 = vsel %vm4865_vm2, %v5631_v44, 0  ;;  %v3780_v38 = vld [vmem:[#allocation3 + $0xc1] sm:$0xff]  ;;  %v3781_v44 = vld [vmem:[#allocation3 + $0xc9] sm:$0xff] }
 0x4be   : > { %4414 = vrot.lane.b32.xlu1 %v7346_v0, %s5653_s21  ;;  %5538 = vmatpush3.bf16.msra.mxu0 %v4867_v25 }
 0x4c0   : > { %4416 = vrot.lane.b32.xlu0 %v7374_v12, %s5653_s21 }
 0x4c2   : > { %4603 = vrot.lane.b32.xlu1 %v7308_v3, %s5654_s28 }
 0x4c4   : > { %4605 = vrot.lane.b32.xlu0 %v7302_v63, %s5654_s28 }
 0x4c6   : > { %4607 = vrot.lane.b32.xlu1 %v7380_v62, %s5654_s28 }
 0x4c8   : > { %4609 = vrot.lane.b32.xlu0 %v7384_v19, %s5654_s28 }
 0x4ca   : > { %v3312_v1 = vpop.permute.xlu0 %3311  ;;  %3838 = vrot.lane.b32.xlu1 %v7346_v0, %s5651_s23 }
 0x4cb   : > { %3378 = vst.msk [vmem:[#allocation5 + $0xf0] sm:$0xff] %vm3347_vm0, %v3312_v1 }
 0x4cc   : > { %3840 = vrot.lane.b32.xlu0 %v7374_v12, %s5651_s23  ;;  %v3314_v3 = vpop.permute.xlu1 %3313 }
 0x4cd   : > { %3379 = vst.msk [vmem:[#allocation5 + $0xf8] sm:$0xff] %vm3347_vm0, %v3314_v3 }
 0x4ce   : > { %v3473_v63 = vpop.permute.xlu0 %3472  ;;  %3842 = vrot.lane.b32.xlu1 %v7328_v42, %s5651_s23 }
 0x4cf   : > { %3555 = vst.msk [vmem:[#allocation5 + $0x70] sm:$0xff] %vm3540_vm1, %v3473_v63 }
 0x4d0   : > { %3844 = vrot.lane.b32.xlu0 %v7338_v9, %s5651_s23  ;;  %v3475_v23 = vpop.permute.xlu1 %3474 }
 0x4d1   : > { %3556 = vst.msk [vmem:[#allocation5 + $0x78] sm:$0xff] %vm3540_vm1, %v3475_v23 }
 0x4d2   : > { %v3477_v0 = vpop.permute.xlu0 %3476  ;;  %4031 = vrot.lane.b32.xlu1 %v7380_v62, %s5652_s12 }
 0x4d3   : > { %3557 = vst.msk [vmem:[#allocation5 + $0x80] sm:$0xff] %vm3540_vm1, %v3477_v0 }
 0x4d4   : > { %4033 = vrot.lane.b32.xlu0 %v7384_v19, %s5652_s12  ;;  %v3479_v12 = vpop.permute.xlu1 %3478 }
 0x4d5   : > { %3558 = vst.msk [vmem:[#allocation5 + $0x88] sm:$0xff] %vm3540_vm1, %v3479_v12 }
 0x4d6   : > { %v3481_v36 = vpop.permute.xlu0 %3480  ;;  %4035 = vrot.lane.b32.xlu1 %v7368_v58, %s5652_s12 }
 0x4d7   : > { %3559 = vst.msk [vmem:[#allocation5 + $0x90] sm:$0xff] %vm3540_vm1, %v3481_v36 }
 0x4d8   : > { %4037 = vrot.lane.b32.xlu0 %v7362_v35, %s5652_s12  ;;  %v3483_v32 = vpop.permute.xlu1 %3482 }
 0x4d9   : > { %3560 = vst.msk [vmem:[#allocation5 + $0x98] sm:$0xff] %vm3540_vm1, %v3483_v32  ;;  %v4361_v32 = vld [vmem:[#allocation3 + $0xe1] sm:$0xff] }
 0x4da   : > { %v3485_v62 = vpop.permute.xlu0 %3484  ;;  %4225 = vrot.lane.b32.xlu1 %v7330_v28, %s5644_s22 }
 0x4db   : > { %3561 = vst.msk [vmem:[#allocation5 + $0xa0] sm:$0xff] %vm3540_vm1, %v3485_v62 }
 0x4dc   : > { %4227 = vrot.lane.b32.xlu0 %v7348_v57, %s5644_s22  ;;  %v3487_v19 = vpop.permute.xlu1 %3486 }
 0x4dd   : > { %3562 = vst.msk [vmem:[#allocation5 + $0xa8] sm:$0xff] %vm3540_vm1, %v3487_v19 }
 0x4de   : > { %v3489_v6 = vpop.permute.xlu0 %3488  ;;  %4229 = vrot.lane.b32.xlu1 %v7396_v20, %s5644_s22 }
 0x4df   : > { %3563 = vst.msk [vmem:[#allocation5 + $0xb0] sm:$0xff] %vm3540_vm1, %v3489_v6 }
 0x4e0   : > { %4231 = vrot.lane.b32.xlu0 %v7410_v47, %s5644_s22  ;;  %v3491_v5 = vpop.permute.xlu1 %3490 }
 0x4e1   : > { %3564 = vst.msk [vmem:[#allocation5 + $0xb8] sm:$0xff] %vm3540_vm1, %v3491_v5 }
 0x4e2   : > { %v3493_v28 = vpop.permute.xlu0 %3492  ;;  %4418 = vrot.lane.b32.xlu1 %v7328_v42, %s5653_s21 }
 0x4e3   : > { %3565 = vst.msk [vmem:[#allocation5 + $0xc0] sm:$0xff] %vm3540_vm1, %v3493_v28 }
 0x4e4   : > { %4420 = vrot.lane.b32.xlu0 %v7338_v9, %s5653_s21  ;;  %v3495_v57 = vpop.permute.xlu1 %3494 }
 0x4e5   : > { %3566 = vst.msk [vmem:[#allocation5 + $0xc8] sm:$0xff] %vm3540_vm1, %v3495_v57 }
 0x4e6   : > { %v3497_v20 = vpop.permute.xlu0 %3496  ;;  %4422 = vrot.lane.b32.xlu1 %v7406_v43, %s5653_s21 }
 0x4e7   : > { %3567 = vst.msk [vmem:[#allocation5 + $0xd0] sm:$0xff] %vm3540_vm1, %v3497_v20 }
 0x4e8   : > { %4424 = vrot.lane.b32.xlu0 %v7422_v49, %s5653_s21  ;;  %v3499_v47 = vpop.permute.xlu1 %3498 }
 0x4e9   : > { %3568 = vst.msk [vmem:[#allocation5 + $0xd8] sm:$0xff] %vm3540_vm1, %v3499_v47 }
 0x4ea   : > { %v3501_v42 = vpop.permute.xlu0 %3500  ;;  %4611 = vrot.lane.b32.xlu1 %v7368_v58, %s5654_s28 }
 0x4eb   : > { %3569 = vst.msk [vmem:[#allocation5 + $0xe0] sm:$0xff] %vm3540_vm1, %v3501_v42 }
 0x4ec   : > { %4613 = vrot.lane.b32.xlu0 %v7362_v35, %s5654_s28  ;;  %v3503_v9 = vpop.permute.xlu1 %3502 }
 0x4ed   : > { %3570 = vst.msk [vmem:[#allocation5 + $0xe8] sm:$0xff] %vm3540_vm1, %v3503_v9 }
 0x4ee   : > { %v3505_v41 = vpop.permute.xlu0 %3504  ;;  %4615 = vrot.lane.b32.xlu1 %v7428_v40, %s5654_s28 }
 0x4ef   : > { %3571 = vst.msk [vmem:[#allocation5 + $0xf0] sm:$0xff] %vm3540_vm1, %v3505_v41 }
 0x4f0   : > { %4617 = vrot.lane.b32.xlu0 %v7434_v7, %s5654_s28  ;;  %v3507_v48 = vpop.permute.xlu1 %3506 }
 0x4f1   : > { %3572 = vst.msk [vmem:[#allocation5 + $0xf8] sm:$0xff] %vm3540_vm1, %v3507_v48  ;;  %v3784_v48 = vld [vmem:[#allocation3 + $0xf1] sm:$0xff] }
 0x4f2   : > { %v3638_v58 = vpop.permute.xlu0 %3637  ;;  %3846 = vrot.lane.b32.xlu1 %v7406_v43, %s5651_s23 }
 0x4f3   : > { %3734 = vst.msk [vmem:[#allocation5] sm:$0xff] %vm3733_vm4, %v3638_v58 }
 0x4f4   : > { %3848 = vrot.lane.b32.xlu0 %v7422_v49, %s5651_s23  ;;  %v3640_v35 = vpop.permute.xlu1 %3639 }
 0x4f5   : > { %3735 = vst.msk [vmem:[#allocation5 + $0x8] sm:$0xff] %vm3733_vm4, %v3640_v35  ;;  %v3785_v35 = vld [vmem:[#allocation3 + $0xf9] sm:$0xff] }
 0x4f6   : > { %v3642_v46 = vpop.permute.xlu0 %3641  ;;  %3850 = vrot.lane.b32.xlu1 %v7388_v61, %s5651_s23 }
 0x4f7   : > { %3736 = vst.msk [vmem:[#allocation5 + $0x10] sm:$0xff] %vm3733_vm4, %v3642_v46 }
 0x4f8   : > { %3852 = vrot.lane.b32.xlu0 %v7398_v27, %s5651_s23  ;;  %v3644_v50 = vpop.permute.xlu1 %3643 }
 0x4f9   : > { %3737 = vst.msk [vmem:[#allocation5 + $0x18] sm:$0xff] %vm3733_vm4, %v3644_v50  ;;  %v3975_v50 = vld [vmem:[#allocation3 + $0xda] sm:$0xff] }
 0x4fa   : > { %v3646_v43 = vpop.permute.xlu0 %3645  ;;  %4039 = vrot.lane.b32.xlu1 %v7428_v40, %s5652_s12 }
 0x4fb   : > { %3738 = vst.msk [vmem:[#allocation5 + $0x20] sm:$0xff] %vm3733_vm4, %v3646_v43 }
 0x4fc   : > { %4041 = vrot.lane.b32.xlu0 %v7434_v7, %s5652_s12  ;;  %v3648_v49 = vpop.permute.xlu1 %3647 }
 0x4fd   : > { %3739 = vst.msk [vmem:[#allocation5 + $0x28] sm:$0xff] %vm3733_vm4, %v3648_v49  ;;  %v3976_v49 = vld [vmem:[#allocation3 + $0xe2] sm:$0xff] }
 0x4fe   : > { %v3650_v61 = vpop.permute.xlu0 %3649  ;;  %4043 = vrot.lane.b32.xlu1 %v7556_v56, %s5652_s12 }
 0x4ff   : > { %3740 = vst.msk [vmem:[#allocation5 + $0x30] sm:$0xff] %vm3733_vm4, %v3650_v61 }
 0x500   : > { %4045 = vrot.lane.b32.xlu0 %v7560_v8, %s5652_s12  ;;  %v3652_v27 = vpop.permute.xlu1 %3651 }
 0x501   : > { %3741 = vst.msk [vmem:[#allocation5 + $0x38] sm:$0xff] %vm3733_vm4, %v3652_v27  ;;  %v3977_v27 = vld [vmem:[#allocation3 + $0xf2] sm:$0xff] }
 0x502   : > { %v3654_v40 = vpop.permute.xlu0 %3653  ;;  %4233 = vrot.lane.b32.xlu1 %v7390_v54, %s5644_s22  ;;  %v4354_v54 = vld [vmem:[#allocation3 + $0x91] sm:$0xff] }
 0x503   : > { %3742 = vst.msk [vmem:[#allocation5 + $0x40] sm:$0xff] %vm3733_vm4, %v3654_v40 }
 0x504   : > { %4235 = vrot.lane.b32.xlu0 %v7408_v51, %s5644_s22  ;;  %v3656_v7 = vpop.permute.xlu1 %3655  ;;  %v4355_v51 = vld [vmem:[#allocation3 + $0x99] sm:$0xff] }
 0x505   : > { %3743 = vst.msk [vmem:[#allocation5 + $0x48] sm:$0xff] %vm3733_vm4, %v3656_v7  ;;  %v3978_v7 = vld [vmem:[#allocation3 + $0xfa] sm:$0xff] }
 0x506   : > { %v3658_v30 = vpop.permute.xlu0 %3657  ;;  %4237 = vrot.lane.b32.xlu1 %v7445_v59, %s5644_s22 }
 0x507   : > { %3744 = vst.msk [vmem:[#allocation5 + $0x50] sm:$0xff] %vm3733_vm4, %v3658_v30 }
 0x508   : > { %4239 = vrot.lane.b32.xlu0 %v7456_v37, %s5644_s22  ;;  %v3660_v14 = vpop.permute.xlu1 %3659 }
 0x509   : > { %3745 = vst.msk [vmem:[#allocation5 + $0x58] sm:$0xff] %vm3733_vm4, %v3660_v14 }
 0x50a   : > { %v3662_v21 = vpop.permute.xlu0 %3661  ;;  %4426 = vrot.lane.b32.xlu1 %v4354_v54, %s5653_s21 }
 0x50b   : > { %3746 = vst.msk [vmem:[#allocation5 + $0x60] sm:$0xff] %vm3733_vm4, %v3662_v21 }
 0x50c   : > { %4428 = vrot.lane.b32.xlu0 %v4355_v51, %s5653_s21  ;;  %v3664_v22 = vpop.permute.xlu1 %3663 }
 0x50d   : > { %3747 = vst.msk [vmem:[#allocation5 + $0x68] sm:$0xff] %vm3733_vm4, %v3664_v22  ;;  %v4364_v22 = vld [vmem:[#allocation3 + $0x109] sm:$0xff] }
 0x50e   : > { %v3666_v59 = vpop.permute.xlu0 %3665  ;;  %4430 = vrot.lane.b32.xlu1 %v7452_v29, %s5653_s21 }
 0x50f   : > { %3748 = vst.msk [vmem:[#allocation5 + $0x70] sm:$0xff] %vm3733_vm4, %v3666_v59 }
 0x510   : > { %4432 = vrot.lane.b32.xlu0 %v7468_v33, %s5653_s21  ;;  %v3668_v37 = vpop.permute.xlu1 %3667 }
 0x511   : > { %3749 = vst.msk [vmem:[#allocation5 + $0x78] sm:$0xff] %vm3733_vm4, %v3668_v37  ;;  %v4365_v37 = vld [vmem:[#allocation3 + $0x111] sm:$0xff] }
 0x512   : > { %v3670_v15 = vpop.permute.xlu0 %3669  ;;  %4619 = vrot.lane.b32.xlu1 %v7556_v56, %s5654_s28  ;;  %v3778_v56 = vld [vmem:[#allocation3 + $0xa9] sm:$0xff] }
 0x513   : > { %3750 = vst.msk [vmem:[#allocation5 + $0x80] sm:$0xff] %vm3733_vm4, %v3670_v15 }
 0x514   : > { %4621 = vrot.lane.b32.xlu0 %v7560_v8, %s5654_s28  ;;  %v3831_v53 = vpop.permute.xlu1 %3830  ;;  %v3779_v8 = vld [vmem:[#allocation3 + $0xb1] sm:$0xff] }
 0x515   : > { %3927 = vst.msk [vmem:[#allocation5] sm:$0xff] %vm3926_vm5, %v3831_v53 }
 0x516   : > { %v3833_v29 = vpop.permute.xlu0 %3832  ;;  %4623 = vrot.lane.b32.xlu1 %v7586_v34, %s5654_s28 }
 0x517   : > { %3928 = vst.msk [vmem:[#allocation5 + $0x8] sm:$0xff] %vm3926_vm5, %v3833_v29 }
 0x518   : > { %4625 = vrot.lane.b32.xlu0 %v7592_v60, %s5654_s28  ;;  %v3835_v33 = vpop.permute.xlu1 %3834 }
 0x519   : > { %3929 = vst.msk [vmem:[#allocation5 + $0x10] sm:$0xff] %vm3926_vm5, %v3835_v33 }
 0x51a   : > { %v3837_v45 = vpop.permute.xlu0 %3836  ;;  %3854 = vrot.lane.b32.xlu1 %v3778_v56, %s5651_s23 }
 0x51b   : > { %3930 = vst.msk [vmem:[#allocation5 + $0x18] sm:$0xff] %vm3926_vm5, %v3837_v45 }
 0x51c   : > { %3856 = vrot.lane.b32.xlu0 %v3779_v8, %s5651_s23  ;;  %v4024_v55 = vpop.permute.xlu1 %4023 }
 0x51d   : > { %4120 = vst.msk [vmem:[#allocation5] sm:$0xff] %vm4119_vm6, %v4024_v55 }
 0x51e   : > { %v4026_v2 = vpop.permute.xlu0 %4025  ;;  %3858 = vrot.lane.b32.xlu1 %v3780_v38, %s5651_s23 }
 0x51f   : > { %4121 = vst.msk [vmem:[#allocation5 + $0x8] sm:$0xff] %vm4119_vm6, %v4026_v2 }
 0x520   : > { %3860 = vrot.lane.b32.xlu0 %v3781_v44, %s5651_s23  ;;  %v4028_v25 = vpop.permute.xlu1 %4027 }
 0x521   : > { %4122 = vst.msk [vmem:[#allocation5 + $0x10] sm:$0xff] %vm4119_vm6, %v4028_v25  ;;  %v4558_v25 = vld [vmem:[#allocation3 + $0x112] sm:$0xff] }
 0x522   : > { %v4030_v1 = vpop.permute.xlu0 %4029  ;;  %4047 = vrot.lane.b32.xlu1 %v7586_v34, %s5652_s12 }
 0x523   : > { %4123 = vst.msk [vmem:[#allocation5 + $0x18] sm:$0xff] %vm4119_vm6, %v4030_v1 }
 0x524   : > { %4049 = vrot.lane.b32.xlu0 %v7592_v60, %s5652_s12  ;;  %v4218_v3 = vpop.permute.xlu1 %4217 }
 0x525   : > { %4314 = vst.msk [vmem:[#allocation5] sm:$0xff] %vm4313_vm7, %v4218_v3 }
 0x526   : > { %v4220_v63 = vpop.permute.xlu0 %4219  ;;  %4051 = vrot.lane.b32.xlu1 %v7597_v18, %s5652_s12 }
 0x527   : > { %4315 = vst.msk [vmem:[#allocation5 + $0x8] sm:$0xff] %vm4313_vm7, %v4220_v63 }
 0x528   : > { %4053 = vrot.lane.b32.xlu0 %v7602_v16, %s5652_s12  ;;  %v4222_v23 = vpop.permute.xlu1 %4221 }
 0x529   : > { %4316 = vst.msk [vmem:[#allocation5 + $0x10] sm:$0xff] %vm4313_vm7, %v4222_v23  ;;  %v8369_v23 = vld [vmem:[#allocation7_spill] sm:$0xff] }
 0x52a   : > { %v4224_v34 = vpop.permute.xlu0 %4223  ;;  %4241 = vrot.lane.b32.xlu1 %v7440_v11, %s5644_s22 }
 0x52b   : > { %4317 = vst.msk [vmem:[#allocation5 + $0x18] sm:$0xff] %vm4313_vm7, %v4224_v34 }
 0x52c   : > { %4243 = vrot.lane.b32.xlu0 %v7454_v31, %s5644_s22  ;;  %v4411_v60 = vpop.permute.xlu1 %4410 }
 0x52d   : > { %4507 = vst.msk [vmem:[#allocation5] sm:$0xff] %vm4506_vm8, %v4411_v60 }
 0x52e   : > { %v4413_v0 = vpop.permute.xlu0 %4412  ;;  %4245 = vrot.lane.b32.xlu1 %v7483_v17, %s5644_s22  ;;  %v4360_v17 = vld [vmem:[#allocation3 + $0xd9] sm:$0xff] }
 0x52f   : > { %4508 = vst.msk [vmem:[#allocation5 + $0x8] sm:$0xff] %vm4506_vm8, %v4413_v0  ;;  %v8370_v0 = vld [vmem:[#allocation6_spill] sm:$0xff] }
 0x530   : > { %4247 = vrot.lane.b32.xlu0 %v7492_v39, %s5644_s22  ;;  %v4415_v12 = vpop.permute.xlu1 %4414 }
 0x531   : > { %4509 = vst.msk [vmem:[#allocation5 + $0x10] sm:$0xff] %vm4506_vm8, %v4415_v12  ;;  %v3788_v12 = vld [vmem:[#allocation3 + $0x121] sm:$0xff] }
 0x532   : > { %v4417_v11 = vpop.permute.xlu0 %4416  ;;  %4434 = vrot.lane.b32.xlu1 %v3780_v38, %s5653_s21  ;;  %v4557_v38 = vld [vmem:[#allocation3 + $0x10a] sm:$0xff] }
 0x533   : > { %4510 = vst.msk [vmem:[#allocation5 + $0x18] sm:$0xff] %vm4506_vm8, %v4417_v11 }
 0x534   : > { %4436 = vrot.lane.b32.xlu0 %v3781_v44, %s5653_s21  ;;  %v4604_v31 = vpop.permute.xlu1 %4603 }
 0x535   : > { %4700 = vst.msk [vmem:[#allocation5] sm:$0xff] %vm4699_vm9, %v4604_v31  ;;  %v3789_v31 = vld [vmem:[#allocation3 + $0x129] sm:$0xff] }
 0x536   : > { %v4606_v36 = vpop.permute.xlu0 %4605  ;;  %4438 = vrot.lane.b32.xlu1 %v4360_v17, %s5653_s21 }
 0x537   : > { %4701 = vst.msk [vmem:[#allocation5 + $0x8] sm:$0xff] %vm4699_vm9, %v4606_v36 }
 0x538   : > { %4440 = vrot.lane.b32.xlu0 %v4361_v32, %s5653_s21  ;;  %v4608_v62 = vpop.permute.xlu1 %4607 }
 0x539   : > { %4702 = vst.msk [vmem:[#allocation5 + $0x10] sm:$0xff] %vm4699_vm9, %v4608_v62  ;;  %v3981_v62 = vld [vmem:[#allocation3 + $0x122] sm:$0xff] }
 0x53a   : > { %v4610_v19 = vpop.permute.xlu0 %4609  ;;  %4627 = vrot.lane.b32.xlu1 %v7597_v18, %s5654_s28 }
 0x53b   : > { %4703 = vst.msk [vmem:[#allocation5 + $0x18] sm:$0xff] %vm4699_vm9, %v4610_v19 }
 0x53c   : > { %4629 = vrot.lane.b32.xlu0 %v7602_v16, %s5654_s28  ;;  %v3839_v6 = vpop.permute.xlu1 %3838  ;;  %v4732_v28 = vld [vmem:[#allocation5] sm:$0xff] }
 0x53d   : > { %3931 = vst.msk [vmem:[#allocation5 + $0x20] sm:$0xff] %vm3926_vm5, %v3839_v6  ;;  %v3982_v6 = vld [vmem:[#allocation3 + $0x12a] sm:$0xff] }
 0x53e   : > { %v3841_v5 = vpop.permute.xlu0 %3840  ;;  %4631 = vrot.lane.b32.xlu1 %v7607_v24, %s5654_s28  ;;  %v4733_v57 = vld [vmem:[#allocation5 + $0x8] sm:$0xff] }
 0x53f   : > { %3932 = vst.msk [vmem:[#allocation5 + $0x28] sm:$0xff] %vm3926_vm5, %v3841_v5  ;;  %v4764_v20 = vpack.c.bf16 %v4733_v57, %v4732_v28  ;;  %v4173_v28 = vld [vmem:[#allocation3 + $0x120] sm:$0xff] }
 0x540   : > { %4633 = vrot.lane.b32.xlu0 %v7612_v4, %s5654_s28  ;;  %v3843_v18 = vpop.permute.xlu1 %3842  ;;  %v4734_v47 = vld [vmem:[#allocation5 + $0x10] sm:$0xff] }
 0x541   : > { %3933 = vst.msk [vmem:[#allocation5 + $0x30] sm:$0xff] %vm3926_vm5, %v3843_v18  ;;  %5539 = vmatprep.mubr.msk.bf16.mxu0 %vm4816_vm10, %v4764_v20  ;;  %v4174_v20 = vld [vmem:[#allocation3 + $0x128] sm:$0xff] }
 0x542   : > { %v3845_v16 = vpop.permute.xlu0 %3844  ;;  %3671 = vrot.lane.b32.xlu1 %v7492_v39, %s5643_s19  ;;  %v4735_v24 = vld [vmem:[#allocation5 + $0x18] sm:$0xff] }
 0x543   : > { %3934 = vst.msk [vmem:[#allocation5 + $0x38] sm:$0xff] %vm3926_vm5, %v3845_v16  ;;  %v4765_v42 = vpack.c.bf16 %v4735_v24, %v4734_v47  ;;  %v8371_v16 = vld [vmem:[#allocation8_spill] sm:$0xff] }
 0x544   : > { %3673 = vrot.lane.b32.xlu0 %v7478_v13, %s5643_s19  ;;  %v4032_v9 = vpop.permute.xlu1 %4031 }
 0x545   : > { %4124 = vst.msk [vmem:[#allocation5 + $0x20] sm:$0xff] %vm4119_vm6, %v4032_v9  ;;  %5540 = vmatmul.mubr.msk.bf16.vlgmr.msra.gmra.mrb[16].mxu0 %vm4816_vm10, %v4765_v42  ;;  %v8372_v42 = vld [vmem:[#allocation9_spill] sm:$0xff] }
 0x546   : > { %v4034_v4 = vpop.permute.xlu0 %4033  ;;  %3675 = vrot.lane.b32.xlu1 %v7490_v10, %s5643_s19 }
 0x547   : > { %4125 = vst.msk [vmem:[#allocation5 + $0x28] sm:$0xff] %vm4119_vm6, %v4034_v4 }
 0x548   : > { %3862 = vrot.lane.b32.xlu0 %v4360_v17, %s5651_s23  ;;  %v4036_v39 = vpop.permute.xlu1 %4035 }
 0x549   : > { %4126 = vst.msk [vmem:[#allocation5 + $0x30] sm:$0xff] %vm4119_vm6, %v4036_v39 }
 0x54a   : > { %v4038_v41 = vpop.permute.xlu0 %4037  ;;  %3864 = vrot.lane.b32.xlu1 %v4361_v32, %s5651_s23 }
 0x54b   : > { %4127 = vst.msk [vmem:[#allocation5 + $0x38] sm:$0xff] %vm4119_vm6, %v4038_v41 }
 0x54c   : > { %3866 = vrot.lane.b32.xlu0 %v3784_v48, %s5651_s23  ;;  %v4226_v58 = vpop.permute.xlu1 %4225 }
 0x54d   : > { %4318 = vst.msk [vmem:[#allocation5 + $0x20] sm:$0xff] %vm4313_vm7, %v4226_v58 }
 0x54e   : > { %v4228_v46 = vpop.permute.xlu0 %4227  ;;  %3868 = vrot.lane.b32.xlu1 %v3785_v35, %s5651_s23 }
 0x54f   : > { %4319 = vst.msk [vmem:[#allocation5 + $0x28] sm:$0xff] %vm4313_vm7, %v4228_v46  ;;  %v4368_v46 = vld [vmem:[#allocation3 + $0x139] sm:$0xff] }
 0x550   : > { %4055 = vrot.lane.b32.xlu0 %v3975_v50, %s5652_s12  ;;  %v4230_v43 = vpop.permute.xlu1 %4229 }
 0x551   : > { %4320 = vst.msk [vmem:[#allocation5 + $0x30] sm:$0xff] %vm4313_vm7, %v4230_v43 }
 0x552   : > { %v4232_v61 = vpop.permute.xlu0 %4231  ;;  %4057 = vrot.lane.b32.xlu1 %v3976_v49, %s5652_s12  ;;  %v4369_v49 = vld [vmem:[#allocation3 + $0x141] sm:$0xff] }
 0x553   : > { %4321 = vst.msk [vmem:[#allocation5 + $0x38] sm:$0xff] %vm4313_vm7, %v4232_v61 }
 0x554   : > { %4059 = vrot.lane.b32.xlu0 %v3977_v27, %s5652_s12  ;;  %v4419_v40 = vpop.permute.xlu1 %4418 }
 0x555   : > { %4511 = vst.msk [vmem:[#allocation5 + $0x20] sm:$0xff] %vm4506_vm8, %v4419_v40 }
 0x556   : > { %v4421_v30 = vpop.permute.xlu0 %4420  ;;  %4061 = vrot.lane.b32.xlu1 %v3978_v7, %s5652_s12 }
 0x557   : > { %4512 = vst.msk [vmem:[#allocation5 + $0x28] sm:$0xff] %vm4506_vm8, %v4421_v30 }
 0x558   : > { %4249 = vrot.lane.b32.xlu0 %v7478_v13, %s5644_s22  ;;  %v4423_v14 = vpop.permute.xlu1 %4422 }
 0x559   : > { %4513 = vst.msk [vmem:[#allocation5 + $0x30] sm:$0xff] %vm4506_vm8, %v4423_v14  ;;  %v4562_v14 = vld [vmem:[#allocation3 + $0x142] sm:$0xff] }
 0x55a   : > { %v4425_v54 = vpop.permute.xlu0 %4424  ;;  %4251 = vrot.lane.b32.xlu1 %v7490_v10, %s5644_s22 }
 0x55b   : > { %4514 = vst.msk [vmem:[#allocation5 + $0x38] sm:$0xff] %vm4506_vm8, %v4425_v54 }
 0x55c   : > { %4253 = vrot.lane.b32.xlu0 %v7515_v26, %s5644_s22  ;;  %v4612_v21 = vpop.permute.xlu1 %4611 }
 0x55d   : > { %4704 = vst.msk [vmem:[#allocation5 + $0x20] sm:$0xff] %vm4699_vm9, %v4612_v21  ;;  %v3597_v21 = vld [vmem:[#allocation3 + $0x138] sm:$0xff] }
 0x55e   : > { %v4614_v51 = vpop.permute.xlu0 %4613  ;;  %4255 = vrot.lane.b32.xlu1 %v7522_v52, %s5644_s22 }
 0x55f   : > { %4705 = vst.msk [vmem:[#allocation5 + $0x28] sm:$0xff] %vm4699_vm9, %v4614_v51 }
 0x560   : > { %4442 = vrot.lane.b32.xlu0 %v3784_v48, %s5653_s21  ;;  %v4616_v13 = vpop.permute.xlu1 %4615 }
 0x561   : > { %4706 = vst.msk [vmem:[#allocation5 + $0x30] sm:$0xff] %vm4699_vm9, %v4616_v13  ;;  %v3598_v13 = vld [vmem:[#allocation3 + $0x140] sm:$0xff] }
 0x562   : > { %v4618_v10 = vpop.permute.xlu0 %4617  ;;  %4444 = vrot.lane.b32.xlu1 %v3785_v35, %s5653_s21 }
 0x563   : > { %4707 = vst.msk [vmem:[#allocation5 + $0x38] sm:$0xff] %vm4699_vm9, %v4618_v10 }
 0x564   : > { %4446 = vrot.lane.b32.xlu0 %v4364_v22, %s5653_s21  ;;  %v3847_v59 = vpop.permute.xlu1 %3846  ;;  %v4736_v53 = vld [vmem:[#allocation5 + $0x20] sm:$0xff] }
 0x565   : > { %3935 = vst.msk [vmem:[#allocation5 + $0x40] sm:$0xff] %vm3926_vm5, %v3847_v59 }
 0x566   : > { %v3849_v15 = vpop.permute.xlu0 %3848  ;;  %4448 = vrot.lane.b32.xlu1 %v4365_v37, %s5653_s21  ;;  %v4737_v29 = vld [vmem:[#allocation5 + $0x28] sm:$0xff] }
 0x567   : > { %3936 = vst.msk [vmem:[#allocation5 + $0x48] sm:$0xff] %vm3926_vm5, %v3849_v15  ;;  %v4766_v33 = vpack.c.bf16 %v4737_v29, %v4736_v53 }
 0x568   : > { %4635 = vrot.lane.b32.xlu0 %v3977_v27, %s5654_s28  ;;  %v3851_v56 = vpop.permute.xlu1 %3850  ;;  %v4738_v8 = vld [vmem:[#allocation5 + $0x30] sm:$0xff] }
 0x569   : > { %3937 = vst.msk [vmem:[#allocation5 + $0x50] sm:$0xff] %vm3926_vm5, %v3851_v56  ;;  %5543 = vmatprep.mubr.msk.bf16.mxu0 %vm4816_vm10, %v4766_v33  ;;  %v3792_v33 = vld [vmem:[#allocation3 + $0x151] sm:$0xff] }
 0x56a   : > { %v3853_v45 = vpop.permute.xlu0 %3852  ;;  %4637 = vrot.lane.b32.xlu1 %v3978_v7, %s5654_s28  ;;  %v4739_v55 = vld [vmem:[#allocation5 + $0x38] sm:$0xff]  ;;  %v4561_v7 = vld [vmem:[#allocation3 + $0x13a] sm:$0xff] }
 0x56b   : > { %3938 = vst.msk [vmem:[#allocation5 + $0x58] sm:$0xff] %vm3926_vm5, %v3853_v45  ;;  %v4767_v2 = vpack.c.bf16 %v4739_v55, %v4738_v8  ;;  %v3793_v45 = vld [vmem:[#allocation3 + $0x159] sm:$0xff] }
 0x56c   : > { %4639 = vrot.lane.b32.xlu0 %v4557_v38, %s5654_s28  ;;  %v4040_v44 = vpop.permute.xlu1 %4039 }
 0x56d   : > { %4128 = vst.msk [vmem:[#allocation5 + $0x40] sm:$0xff] %vm4119_vm6, %v4040_v44  ;;  %5544 = vmatmul.mubr.msk.bf16.gmra.mrb[20].mxu0 %vm4816_vm10, %v4767_v2  ;;  %v3985_v2 = vld [vmem:[#allocation3 + $0x152] sm:$0xff] }
 0x56e   : > { %v4042_v1 = vpop.permute.xlu0 %4041  ;;  %4641 = vrot.lane.b32.xlu1 %v4558_v25, %s5654_s28 }
 0x56f   : > { %4129 = vst.msk [vmem:[#allocation5 + $0x48] sm:$0xff] %vm4119_vm6, %v4042_v1 }
 0x570   : > { %3677 = vrot.lane.b32.xlu0 %v7515_v26, %s5643_s19  ;;  %v4044_v3 = vpop.permute.xlu1 %4043 }
 0x571   : > { %4130 = vst.msk [vmem:[#allocation5 + $0x50] sm:$0xff] %vm4119_vm6, %v4044_v3 }
 0x572   : > { %v4046_v63 = vpop.permute.xlu0 %4045  ;;  %3679 = vrot.lane.b32.xlu1 %v7522_v52, %s5643_s19 }
 0x573   : > { %4131 = vst.msk [vmem:[#allocation5 + $0x58] sm:$0xff] %vm4119_vm6, %v4046_v63 }
 0x574   : > { %3681 = vrot.lane.b32.xlu0 %v8369_v23, %s5643_s19  ;;  %v4234_v34 = vpop.permute.xlu1 %4233 }
 0x575   : > { %4322 = vst.msk [vmem:[#allocation5 + $0x40] sm:$0xff] %vm4313_vm7, %v4234_v34 }
 0x576   : > { %v4236_v60 = vpop.permute.xlu0 %4235  ;;  %3683 = vrot.lane.b32.xlu1 %v8370_v0, %s5643_s19 }
 0x577   : > { %4323 = vst.msk [vmem:[#allocation5 + $0x48] sm:$0xff] %vm4313_vm7, %v4236_v60 }
 0x578   : > { %3870 = vrot.lane.b32.xlu0 %v4364_v22, %s5651_s23  ;;  %v4238_v26 = vpop.permute.xlu1 %4237  ;;  %v3599_v22 = vld [vmem:[#allocation3 + $0x150] sm:$0xff] }
 0x579   : > { %4324 = vst.msk [vmem:[#allocation5 + $0x50] sm:$0xff] %vm4313_vm7, %v4238_v26 }
 0x57a   : > { %v4240_v52 = vpop.permute.xlu0 %4239  ;;  %3872 = vrot.lane.b32.xlu1 %v4365_v37, %s5651_s23  ;;  %v3600_v37 = vld [vmem:[#allocation3 + $0x158] sm:$0xff] }
 0x57b   : > { %4325 = vst.msk [vmem:[#allocation5 + $0x58] sm:$0xff] %vm4313_vm7, %v4240_v52  ;;  %v4179_v52 = vld [vmem:[#allocation3 + $0x168] sm:$0xff] }
 0x57c   : > { %3874 = vrot.lane.b32.xlu0 %v3788_v12, %s5651_s23  ;;  %v4427_v11 = vpop.permute.xlu1 %4426 }
 0x57d   : > { %4515 = vst.msk [vmem:[#allocation5 + $0x40] sm:$0xff] %vm4506_vm8, %v4427_v11 }
 0x57e   : > { %v4429_v17 = vpop.permute.xlu0 %4428  ;;  %3876 = vrot.lane.b32.xlu1 %v3789_v31, %s5651_s23 }
 0x57f   : > { %4516 = vst.msk [vmem:[#allocation5 + $0x48] sm:$0xff] %vm4506_vm8, %v4429_v17 }
 0x580   : > { %4063 = vrot.lane.b32.xlu0 %v4557_v38, %s5652_s12  ;;  %v4431_v36 = vpop.permute.xlu1 %4430 }
 0x581   : > { %4517 = vst.msk [vmem:[#allocation5 + $0x50] sm:$0xff] %vm4506_vm8, %v4431_v36 }
 0x582   : > { %v4433_v32 = vpop.permute.xlu0 %4432  ;;  %4065 = vrot.lane.b32.xlu1 %v4558_v25, %s5652_s12  ;;  %v3986_v25 = vld [vmem:[#allocation3 + $0x15a] sm:$0xff] }
 0x583   : > { %4518 = vst.msk [vmem:[#allocation5 + $0x58] sm:$0xff] %vm4506_vm8, %v4433_v32 }
 0x584   : > { %4067 = vrot.lane.b32.xlu0 %v3981_v62, %s5652_s12  ;;  %v4620_v19 = vpop.permute.xlu1 %4619 }
 0x585   : > { %4708 = vst.msk [vmem:[#allocation5 + $0x40] sm:$0xff] %vm4699_vm9, %v4620_v19 }
 0x586   : > { %v4622_v5 = vpop.permute.xlu0 %4621  ;;  %4069 = vrot.lane.b32.xlu1 %v3982_v6, %s5652_s12 }
 0x587   : > { %4709 = vst.msk [vmem:[#allocation5 + $0x48] sm:$0xff] %vm4699_vm9, %v4622_v5 }
 0x588   : > { %4257 = vrot.lane.b32.xlu0 %v4173_v28, %s5644_s22  ;;  %v4624_v57 = vpop.permute.xlu1 %4623 }
 0x589   : > { %4710 = vst.msk [vmem:[#allocation5 + $0x50] sm:$0xff] %vm4699_vm9, %v4624_v57 }
 0x58a   : > { %v4626_v18 = vpop.permute.xlu0 %4625  ;;  %4259 = vrot.lane.b32.xlu1 %v4174_v20, %s5644_s22  ;;  %v4565_v20 = vld [vmem:[#allocation3 + $0x16a] sm:$0xff] }
 0x58b   : > { %4711 = vst.msk [vmem:[#allocation5 + $0x58] sm:$0xff] %vm4699_vm9, %v4626_v18 }
 0x58c   : > { %4261 = vrot.lane.b32.xlu0 %v8371_v16, %s5644_s22  ;;  %v3855_v47 = vpop.permute.xlu1 %3854  ;;  %v4740_v9 = vld [vmem:[#allocation5 + $0x40] sm:$0xff] }
 0x58d   : > { %3939 = vst.msk [vmem:[#allocation5 + $0x60] sm:$0xff] %vm3926_vm5, %v3855_v47  ;;  %v4566_v16 = vld [vmem:[#allocation3 + $0x172] sm:$0xff] }
 0x58e   : > { %v3857_v24 = vpop.permute.xlu0 %3856  ;;  %4263 = vrot.lane.b32.xlu1 %v8372_v42, %s5644_s22  ;;  %v4741_v4 = vld [vmem:[#allocation5 + $0x48] sm:$0xff] }
 0x58f   : > { %3940 = vst.msk [vmem:[#allocation5 + $0x68] sm:$0xff] %vm3926_vm5, %v3857_v24  ;;  %v4768_v39 = vpack.c.bf16 %v4741_v4, %v4740_v9  ;;  %v3603_v9 = vld [vmem:[#allocation3 + $0x180] sm:$0xff] }
 0x590   : > { %4450 = vrot.lane.b32.xlu0 %v3788_v12, %s5653_s21  ;;  %v3859_v41 = vpop.permute.xlu1 %3858  ;;  %v4742_v58 = vld [vmem:[#allocation5 + $0x50] sm:$0xff] }
 0x591   : > { %3941 = vst.msk [vmem:[#allocation5 + $0x70] sm:$0xff] %vm3926_vm5, %v3859_v41  ;;  %5547 = vmatprep.mubr.msk.bf16.mxu0 %vm4816_vm10, %v4768_v39  ;;  %v3604_v39 = vld [vmem:[#allocation3 + $0x188] sm:$0xff] }
 0x592   : > { %v3861_v48 = vpop.permute.xlu0 %3860  ;;  %4452 = vrot.lane.b32.xlu1 %v3789_v31, %s5653_s21  ;;  %v4743_v35 = vld [vmem:[#allocation5 + $0x58] sm:$0xff]  ;;  %v4180_v31 = vld [vmem:[#allocation3 + $0x170] sm:$0xff] }
 0x593   : > { %3942 = vst.msk [vmem:[#allocation5 + $0x78] sm:$0xff] %vm3926_vm5, %v3861_v48  ;;  %v4769_v50 = vpack.c.bf16 %v4743_v35, %v4742_v58  ;;  %v3796_v35 = vld [vmem:[#allocation3 + $0x181] sm:$0xff] }
 0x594   : > { %4454 = vrot.lane.b32.xlu0 %v4368_v46, %s5653_s21  ;;  %v4048_v43 = vpop.permute.xlu1 %4047 }
 0x595   : > { %4132 = vst.msk [vmem:[#allocation5 + $0x60] sm:$0xff] %vm4119_vm6, %v4048_v43  ;;  %5548 = vmatmul.mubr.msk.bf16.gmra.mrb[24].mxu0 %vm4816_vm10, %v4769_v50  ;;  %v3797_v50 = vld [vmem:[#allocation3 + $0x189] sm:$0xff] }
 0x596   : > { %v4050_v61 = vpop.permute.xlu0 %4049  ;;  %4456 = vrot.lane.b32.xlu1 %v4369_v49, %s5653_s21 }
 0x597   : > { %4133 = vst.msk [vmem:[#allocation5 + $0x68] sm:$0xff] %vm4119_vm6, %v4050_v61 }
 0x598   : > { %4643 = vrot.lane.b32.xlu0 %v3981_v62, %s5654_s28  ;;  %v4052_v27 = vpop.permute.xlu1 %4051  ;;  %v4372_v62 = vld [vmem:[#allocation3 + $0x169] sm:$0xff] }
 0x599   : > { %4134 = vst.msk [vmem:[#allocation5 + $0x70] sm:$0xff] %vm4119_vm6, %v4052_v27  ;;  %v3989_v27 = vld [vmem:[#allocation3 + $0x182] sm:$0xff] }
 0x59a   : > { %v4054_v40 = vpop.permute.xlu0 %4053  ;;  %4645 = vrot.lane.b32.xlu1 %v3982_v6, %s5654_s28  ;;  %v4373_v6 = vld [vmem:[#allocation3 + $0x171] sm:$0xff] }
 0x59b   : > { %4135 = vst.msk [vmem:[#allocation5 + $0x78] sm:$0xff] %vm4119_vm6, %v4054_v40 }
 0x59c   : > { %4647 = vrot.lane.b32.xlu0 %v4561_v7, %s5654_s28  ;;  %v4242_v30 = vpop.permute.xlu1 %4241 }
 0x59d   : > { %4326 = vst.msk [vmem:[#allocation5 + $0x60] sm:$0xff] %vm4313_vm7, %v4242_v30 }
 0x59e   : > { %v4244_v54 = vpop.permute.xlu0 %4243  ;;  %4649 = vrot.lane.b32.xlu1 %v4562_v14, %s5654_s28 }
 0x59f   : > { %4327 = vst.msk [vmem:[#allocation5 + $0x68] sm:$0xff] %vm4313_vm7, %v4244_v54 }
 0x5a0   : > { %3685 = vrot.lane.b32.xlu0 %v3597_v21, %s5643_s19  ;;  %v4246_v51 = vpop.permute.xlu1 %4245 }
 0x5a1   : > { %4328 = vst.msk [vmem:[#allocation5 + $0x70] sm:$0xff] %vm4313_vm7, %v4246_v51 }
 0x5a2   : > { %v4248_v10 = vpop.permute.xlu0 %4247  ;;  %3687 = vrot.lane.b32.xlu1 %v3598_v13, %s5643_s19 }
 0x5a3   : > { %4329 = vst.msk [vmem:[#allocation5 + $0x78] sm:$0xff] %vm4313_vm7, %v4248_v10 }
 0x5a4   : > { %3689 = vrot.lane.b32.xlu0 %v3599_v22, %s5643_s19  ;;  %v4435_v59 = vpop.permute.xlu1 %4434 }
 0x5a5   : > { %4519 = vst.msk [vmem:[#allocation5 + $0x60] sm:$0xff] %vm4506_vm8, %v4435_v59  ;;  %v4183_v59 = vld [vmem:[#allocation3 + $0x198] sm:$0xff] }
 0x5a6   : > { %v4437_v15 = vpop.permute.xlu0 %4436  ;;  %3691 = vrot.lane.b32.xlu1 %v3600_v37, %s5643_s19 }
 0x5a7   : > { %4520 = vst.msk [vmem:[#allocation5 + $0x68] sm:$0xff] %vm4506_vm8, %v4437_v15  ;;  %v4184_v15 = vld [vmem:[#allocation3 + $0x1a0] sm:$0xff] }
 0x5a8   : > { %3878 = vrot.lane.b32.xlu0 %v4368_v46, %s5651_s23  ;;  %v4439_v53 = vpop.permute.xlu1 %4438 }
 0x5a9   : > { %4521 = vst.msk [vmem:[#allocation5 + $0x70] sm:$0xff] %vm4506_vm8, %v4439_v53 }
 0x5aa   : > { %v4441_v29 = vpop.permute.xlu0 %4440  ;;  %3880 = vrot.lane.b32.xlu1 %v4369_v49, %s5651_s23 }
 0x5ab   : > { %4522 = vst.msk [vmem:[#allocation5 + $0x78] sm:$0xff] %vm4506_vm8, %v4441_v29 }
 0x5ac   : > { %3882 = vrot.lane.b32.xlu0 %v3792_v33, %s5651_s23  ;;  %v4628_v56 = vpop.permute.xlu1 %4627 }
 0x5ad   : > { %4712 = vst.msk [vmem:[#allocation5 + $0x60] sm:$0xff] %vm4699_vm9, %v4628_v56  ;;  %v4376_v56 = vld [vmem:[#allocation3 + $0x199] sm:$0xff] }
 0x5ae   : > { %v4630_v8 = vpop.permute.xlu0 %4629  ;;  %3884 = vrot.lane.b32.xlu1 %v3793_v45, %s5651_s23 }
 0x5af   : > { %4713 = vst.msk [vmem:[#allocation5 + $0x68] sm:$0xff] %vm4699_vm9, %v4630_v8  ;;  %v4377_v8 = vld [vmem:[#allocation3 + $0x1a1] sm:$0xff] }
 0x5b0   : > { %4071 = vrot.lane.b32.xlu0 %v4561_v7, %s5652_s12  ;;  %v4632_v55 = vpop.permute.xlu1 %4631 }
 0x5b1   : > { %4714 = vst.msk [vmem:[#allocation5 + $0x70] sm:$0xff] %vm4699_vm9, %v4632_v55 }
 0x5b2   : > { %v4634_v38 = vpop.permute.xlu0 %4633  ;;  %4073 = vrot.lane.b32.xlu1 %v4562_v14, %s5652_s12  ;;  %v3990_v14 = vld [vmem:[#allocation3 + $0x18a] sm:$0xff] }
 0x5b3   : > { %4715 = vst.msk [vmem:[#allocation5 + $0x78] sm:$0xff] %vm4699_vm9, %v4634_v38 }
 0x5b4   : > { %4075 = vrot.lane.b32.xlu0 %v3985_v2, %s5652_s12  ;;  %v3672_v44 = vpop.permute.xlu1 %3671  ;;  %v4744_v3 = vld [vmem:[#allocation5 + $0x60] sm:$0xff] }
 0x5b5   : > { %3751 = vst.msk [vmem:[#allocation5 + $0x88] sm:$0xff] %vm3733_vm4, %v3672_v44  ;;  %v4569_v44 = vld [vmem:[#allocation3 + $0x19a] sm:$0xff] }
 0x5b6   : > { %v3674_v1 = vpop.permute.xlu0 %3673  ;;  %4077 = vrot.lane.b32.xlu1 %v3986_v25, %s5652_s12  ;;  %v4745_v63 = vld [vmem:[#allocation5 + $0x68] sm:$0xff] }
 0x5b7   : > { %3752 = vst.msk [vmem:[#allocation5 + $0x90] sm:$0xff] %vm3733_vm4, %v3674_v1  ;;  %v4770_v23 = vpack.c.bf16 %v4745_v63, %v4744_v3  ;;  %v4570_v1 = vld [vmem:[#allocation3 + $0x1a2] sm:$0xff] }
 0x5b8   : > { %4265 = vrot.lane.b32.xlu0 %v3599_v22, %s5644_s22  ;;  %v3676_v34 = vpop.permute.xlu1 %3675  ;;  %v4746_v0 = vld [vmem:[#allocation5 + $0x70] sm:$0xff] }
 0x5b9   : > { %3753 = vst.msk [vmem:[#allocation5 + $0x98] sm:$0xff] %vm3733_vm4, %v3676_v34  ;;  %5551 = vmatprep.mubr.msk.bf16.mxu0 %vm4816_vm10, %v4770_v23 }
 0x5ba   : > { %v3863_v60 = vpop.permute.xlu0 %3862  ;;  %4267 = vrot.lane.b32.xlu1 %v3600_v37, %s5644_s22  ;;  %v4747_v26 = vld [vmem:[#allocation5 + $0x78] sm:$0xff] }
 0x5bb   : > { %3943 = vst.msk [vmem:[#allocation5 + $0x80] sm:$0xff] %vm3926_vm5, %v3863_v60  ;;  %v4771_v12 = vpack.c.bf16 %v4747_v26, %v4746_v0 }
 0x5bc   : > { %4269 = vrot.lane.b32.xlu0 %v4179_v52, %s5644_s22  ;;  %v3865_v11 = vpop.permute.xlu1 %3864 }
 0x5bd   : > { %3944 = vst.msk [vmem:[#allocation5 + $0x88] sm:$0xff] %vm3926_vm5, %v3865_v11  ;;  %5552 = vmatmul.mubr.msk.bf16.gmra.mrb[28].mxu0 %vm4816_vm10, %v4771_v12 }
 0x5be   : > { %v3867_v17 = vpop.permute.xlu0 %3866  ;;  %4271 = vrot.lane.b32.xlu1 %v4180_v31, %s5644_s22 }
 0x5bf   : > { %3945 = vst.msk [vmem:[#allocation5 + $0x90] sm:$0xff] %vm3926_vm5, %v3867_v17 }
 0x5c0   : > { %4458 = vrot.lane.b32.xlu0 %v3792_v33, %s5653_s21  ;;  %v3869_v36 = vpop.permute.xlu1 %3868 }
 0x5c1   : > { %3946 = vst.msk [vmem:[#allocation5 + $0x98] sm:$0xff] %vm3926_vm5, %v3869_v36 }
 0x5c2   : > { %v4056_v32 = vpop.permute.xlu0 %4055  ;;  %4460 = vrot.lane.b32.xlu1 %v3793_v45, %s5653_s21 }
 0x5c3   : > { %4136 = vst.msk [vmem:[#allocation5 + $0x80] sm:$0xff] %vm4119_vm6, %v4056_v32 }
 0x5c4   : > { %4462 = vrot.lane.b32.xlu0 %v4372_v62, %s5653_s21  ;;  %v4058_v19 = vpop.permute.xlu1 %4057 }
 0x5c5   : > { %4137 = vst.msk [vmem:[#allocation5 + $0x88] sm:$0xff] %vm4119_vm6, %v4058_v19 }
 0x5c6   : > { %v4060_v5 = vpop.permute.xlu0 %4059  ;;  %4464 = vrot.lane.b32.xlu1 %v4373_v6, %s5653_s21 }
 0x5c7   : > { %4138 = vst.msk [vmem:[#allocation5 + $0x90] sm:$0xff] %vm4119_vm6, %v4060_v5  ;;  %v8142_v5 = vld [vmem:[%s8346_s7] ss:$0 sm:$0xff] }
 0x5c8   : > { %4651 = vrot.lane.b32.xlu0 %v3985_v2, %s5654_s28  ;;  %v4062_v28 = vpop.permute.xlu1 %4061 }
 0x5c9   : > { %4139 = vst.msk [vmem:[#allocation5 + $0x98] sm:$0xff] %vm4119_vm6, %v4062_v28 }
 0x5ca   : > { %v4250_v57 = vpop.permute.xlu0 %4249  ;;  %4653 = vrot.lane.b32.xlu1 %v3986_v25, %s5654_s28 }
 0x5cb   : > { %4330 = vst.msk [vmem:[#allocation5 + $0x80] sm:$0xff] %vm4313_vm7, %v4250_v57  ;;  %v8149_v57 = vld [vmem:[%s8347_s8] ss:$0 sm:$0xff] }
 0x5cc   : > { %4655 = vrot.lane.b32.xlu0 %v4565_v20, %s5654_s28  ;;  %v4252_v18 = vpop.permute.xlu1 %4251 }
 0x5cd   : > { %4331 = vst.msk [vmem:[#allocation5 + $0x88] sm:$0xff] %vm4313_vm7, %v4252_v18 }
 0x5ce   : > { %v4254_v47 = vpop.permute.xlu0 %4253  ;;  %4657 = vrot.lane.b32.xlu1 %v4566_v16, %s5654_s28 }
 0x5cf   : > { %4332 = vst.msk [vmem:[#allocation5 + $0x90] sm:$0xff] %vm4313_vm7, %v4254_v47 }
 0x5d0   : > { %3693 = vrot.lane.b32.xlu0 %v4179_v52, %s5643_s19  ;;  %v4256_v24 = vpop.permute.xlu1 %4255 }
 0x5d1   : > { %4333 = vst.msk [vmem:[#allocation5 + $0x98] sm:$0xff] %vm4313_vm7, %v4256_v24 }
 0x5d2   : > { %v4443_v42 = vpop.permute.xlu0 %4442  ;;  %3695 = vrot.lane.b32.xlu1 %v4180_v31, %s5643_s19 }
 0x5d3   : > { %4523 = vst.msk [vmem:[#allocation5 + $0x80] sm:$0xff] %vm4506_vm8, %v4443_v42 }
 0x5d4   : > { %3697 = vrot.lane.b32.xlu0 %v3603_v9, %s5643_s19  ;;  %v4445_v4 = vpop.permute.xlu1 %4444 }
 0x5d5   : > { %4524 = vst.msk [vmem:[#allocation5 + $0x88] sm:$0xff] %vm4506_vm8, %v4445_v4 }
 0x5d6   : > { %v4447_v41 = vpop.permute.xlu0 %4446  ;;  %3699 = vrot.lane.b32.xlu1 %v3604_v39, %s5643_s19 }
 0x5d7   : > { %4525 = vst.msk [vmem:[#allocation5 + $0x90] sm:$0xff] %vm4506_vm8, %v4447_v41 }
 0x5d8   : > { %3886 = vrot.lane.b32.xlu0 %v4372_v62, %s5651_s23  ;;  %v4449_v48 = vpop.permute.xlu1 %4448 }
 0x5d9   : > { %4526 = vst.msk [vmem:[#allocation5 + $0x98] sm:$0xff] %vm4506_vm8, %v4449_v48 }
 0x5da   : > { %v4636_v58 = vpop.permute.xlu0 %4635  ;;  %3888 = vrot.lane.b32.xlu1 %v4373_v6, %s5651_s23 }
 0x5db   : > { %4716 = vst.msk [vmem:[#allocation5 + $0x80] sm:$0xff] %vm4699_vm9, %v4636_v58 }
 0x5dc   : > { %3890 = vrot.lane.b32.xlu0 %v3796_v35, %s5651_s23  ;;  %v4638_v46 = vpop.permute.xlu1 %4637 }
 0x5dd   : > { %4717 = vst.msk [vmem:[#allocation5 + $0x88] sm:$0xff] %vm4699_vm9, %v4638_v46 }
 0x5de   : > { %v4640_v43 = vpop.permute.xlu0 %4639  ;;  %3892 = vrot.lane.b32.xlu1 %v3797_v50, %s5651_s23 }
 0x5df   : > { %4718 = vst.msk [vmem:[#allocation5 + $0x90] sm:$0xff] %vm4699_vm9, %v4640_v43 }
 0x5e0   : > { %4079 = vrot.lane.b32.xlu0 %v4565_v20, %s5652_s12  ;;  %v4642_v49 = vpop.permute.xlu1 %4641 }
 0x5e1   : > { %4719 = vst.msk [vmem:[#allocation5 + $0x98] sm:$0xff] %vm4699_vm9, %v4642_v49 }
 0x5e2   : > { %v3678_v61 = vpop.permute.xlu0 %3677  ;;  %4081 = vrot.lane.b32.xlu1 %v4566_v16, %s5652_s12  ;;  %v4748_v7 = vld [vmem:[#allocation5 + $0x80] sm:$0xff] }
 0x5e3   : > { %3754 = vst.msk [vmem:[#allocation5 + $0xa0] sm:$0xff] %vm3733_vm4, %v3678_v61 }
 0x5e4   : > { %4083 = vrot.lane.b32.xlu0 %v3989_v27, %s5652_s12  ;;  %v3680_v40 = vpop.permute.xlu1 %3679  ;;  %v4749_v30 = vld [vmem:[#allocation5 + $0x88] sm:$0xff] }
 0x5e5   : > { %3755 = vst.msk [vmem:[#allocation5 + $0xa8] sm:$0xff] %vm3733_vm4, %v3680_v40  ;;  %v4772_v54 = vpack.c.bf16 %v4749_v30, %v4748_v7 }
 0x5e6   : > { %v3682_v21 = vpop.permute.xlu0 %3681  ;;  %4085 = vrot.lane.b32.xlu1 %v3990_v14, %s5652_s12  ;;  %v4750_v13 = vld [vmem:[#allocation5 + $0x90] sm:$0xff] }
 0x5e7   : > { %3756 = vst.msk [vmem:[#allocation5 + $0xb0] sm:$0xff] %vm3733_vm4, %v3682_v21  ;;  %5555 = vmatprep.mubr.msk.bf16.mxu0 %vm4816_vm10, %v4772_v54 }
 0x5e8   : > { %4273 = vrot.lane.b32.xlu0 %v3603_v9, %s5644_s22  ;;  %v3684_v51 = vpop.permute.xlu1 %3683  ;;  %v4751_v10 = vld [vmem:[#allocation5 + $0x98] sm:$0xff] }
 0x5e9   : > { %3757 = vst.msk [vmem:[#allocation5 + $0xb8] sm:$0xff] %vm3733_vm4, %v3684_v51  ;;  %v4773_v22 = vpack.c.bf16 %v4751_v10, %v4750_v13 }
 0x5ea   : > { %v3871_v37 = vpop.permute.xlu0 %3870  ;;  %4275 = vrot.lane.b32.xlu1 %v3604_v39, %s5644_s22 }
 0x5eb   : > { %3947 = vst.msk [vmem:[#allocation5 + $0xa0] sm:$0xff] %vm3926_vm5, %v3871_v37  ;;  %5556 = vmatmul.mubr.msk.bf16.gmra.mrb[32].mxu0 %vm4816_vm10, %v4773_v22 }
 0x5ec   : > { %4277 = vrot.lane.b32.xlu0 %v4183_v59, %s5644_s22  ;;  %v3873_v53 = vpop.permute.xlu1 %3872 }
 0x5ed   : > { %3948 = vst.msk [vmem:[#allocation5 + $0xa8] sm:$0xff] %vm3926_vm5, %v3873_v53 }
 0x5ee   : > { %v3875_v29 = vpop.permute.xlu0 %3874  ;;  %4279 = vrot.lane.b32.xlu1 %v4184_v15, %s5644_s22 }
 0x5ef   : > { %3949 = vst.msk [vmem:[#allocation5 + $0xb0] sm:$0xff] %vm3926_vm5, %v3875_v29 }
 0x5f0   : > { %4466 = vrot.lane.b32.xlu0 %v3796_v35, %s5653_s21  ;;  %v3877_v33 = vpop.permute.xlu1 %3876 }
 0x5f1   : > { %3950 = vst.msk [vmem:[#allocation5 + $0xb8] sm:$0xff] %vm3926_vm5, %v3877_v33 }
 0x5f2   : > { %v4064_v45 = vpop.permute.xlu0 %4063  ;;  %4468 = vrot.lane.b32.xlu1 %v3797_v50, %s5653_s21 }
 0x5f3   : > { %4140 = vst.msk [vmem:[#allocation5 + $0xa0] sm:$0xff] %vm4119_vm6, %v4064_v45 }
 0x5f4   : > { %4470 = vrot.lane.b32.xlu0 %v4376_v56, %s5653_s21  ;;  %v4066_v55 = vpop.permute.xlu1 %4065 }
 0x5f5   : > { %4141 = vst.msk [vmem:[#allocation5 + $0xa8] sm:$0xff] %vm4119_vm6, %v4066_v55 }
 0x5f6   : > { %v4068_v38 = vpop.permute.xlu0 %4067  ;;  %4472 = vrot.lane.b32.xlu1 %v4377_v8, %s5653_s21 }
 0x5f7   : > { %4142 = vst.msk [vmem:[#allocation5 + $0xb0] sm:$0xff] %vm4119_vm6, %v4068_v38 }
 0x5f8   : > { %4659 = vrot.lane.b32.xlu0 %v3989_v27, %s5654_s28  ;;  %v4070_v2 = vpop.permute.xlu1 %4069 }
 0x5f9   : > { %4143 = vst.msk [vmem:[#allocation5 + $0xb8] sm:$0xff] %vm4119_vm6, %v4070_v2 }
 0x5fa   : > { %v4258_v25 = vpop.permute.xlu0 %4257  ;;  %4661 = vrot.lane.b32.xlu1 %v3990_v14, %s5654_s28 }
 0x5fb   : > { %4334 = vst.msk [vmem:[#allocation5 + $0xa0] sm:$0xff] %vm4313_vm7, %v4258_v25 }
 0x5fc   : > { %v4260_v3 = vpop.permute.xlu1 %4259  ;;  %4663 = vrot.lane.b32.xlu0 %v4569_v44, %s5654_s28 }
 0x5fd   : > { %4335 = vst.msk [vmem:[#allocation5 + $0xa8] sm:$0xff] %vm4313_vm7, %v4260_v3 }
 0x5fe   : > { %v4262_v63 = vpop.permute.xlu0 %4261  ;;  %4665 = vrot.lane.b32.xlu1 %v4570_v1, %s5654_s28 }
 0x5ff   : > { %4336 = vst.msk [vmem:[#allocation5 + $0xb0] sm:$0xff] %vm4313_vm7, %v4262_v63 }
 0x600   : > { %v4264_v23 = vpop.permute.xlu1 %4263 }
 0x601   : > { %4337 = vst.msk [vmem:[#allocation5 + $0xb8] sm:$0xff] %vm4313_vm7, %v4264_v23 }
 0x602   : > { %v4451_v34 = vpop.permute.xlu0 %4450 }
 0x603   : > { %4527 = vst.msk [vmem:[#allocation5 + $0xa0] sm:$0xff] %vm4506_vm8, %v4451_v34 }
 0x604   : > { %v4453_v60 = vpop.permute.xlu1 %4452 }
 0x605   : > { %4528 = vst.msk [vmem:[#allocation5 + $0xa8] sm:$0xff] %vm4506_vm8, %v4453_v60 }
 0x606   : > { %v4455_v0 = vpop.permute.xlu0 %4454 }
 0x607   : > { %4529 = vst.msk [vmem:[#allocation5 + $0xb0] sm:$0xff] %vm4506_vm8, %v4455_v0 }
 0x608   : > { %v4457_v26 = vpop.permute.xlu1 %4456 }
 0x609   : > { %4530 = vst.msk [vmem:[#allocation5 + $0xb8] sm:$0xff] %vm4506_vm8, %v4457_v26 }
 0x60a   : > { %v4644_v52 = vpop.permute.xlu0 %4643 }
 0x60b   : > { %4720 = vst.msk [vmem:[#allocation5 + $0xa0] sm:$0xff] %vm4699_vm9, %v4644_v52 }
 0x60c   : > { %v4646_v12 = vpop.permute.xlu1 %4645 }
 0x60d   : > { %4721 = vst.msk [vmem:[#allocation5 + $0xa8] sm:$0xff] %vm4699_vm9, %v4646_v12 }
 0x60e   : > { %v4648_v11 = vpop.permute.xlu0 %4647 }
 0x60f   : > { %4722 = vst.msk [vmem:[#allocation5 + $0xb0] sm:$0xff] %vm4699_vm9, %v4648_v11 }
 0x610   : > { %v4650_v31 = vpop.permute.xlu1 %4649 }
 0x611   : > { %4723 = vst.msk [vmem:[#allocation5 + $0xb8] sm:$0xff] %vm4699_vm9, %v4650_v31 }
 0x612   : > { %v3686_v17 = vpop.permute.xlu0 %3685  ;;  %v4752_v32 = vld [vmem:[#allocation5 + $0xa0] sm:$0xff] }
 0x613   : > { %3758 = vst.msk [vmem:[#allocation5 + $0xc0] sm:$0xff] %vm3733_vm4, %v3686_v17 }
 0x614   : > { %v3688_v36 = vpop.permute.xlu1 %3687  ;;  %v4753_v62 = vld [vmem:[#allocation5 + $0xa8] sm:$0xff] }
 0x615   : > { %3759 = vst.msk [vmem:[#allocation5 + $0xc8] sm:$0xff] %vm3733_vm4, %v3688_v36  ;;  %v4774_v19 = vpack.c.bf16 %v4753_v62, %v4752_v32 }
 0x616   : > { %v3690_v6 = vpop.permute.xlu0 %3689  ;;  %v4754_v18 = vld [vmem:[#allocation5 + $0xb0] sm:$0xff] }
 0x617   : > { %3760 = vst.msk [vmem:[#allocation5 + $0xd0] sm:$0xff] %vm3733_vm4, %v3690_v6  ;;  %5559 = vmatprep.mubr.msk.bf16.mxu0 %vm4816_vm10, %v4774_v19 }
 0x618   : > { %v5541_v28 = vpop.f32.mrb[16].mxu0  ;;  %v3692_v20 = vpop.permute.xlu1 %3691  ;;  %v4755_v16 = vld [vmem:[#allocation5 + $0xb8] sm:$0xff] }
 0x619   : > { %v5039_v47 = vmul.f32 %v5541_v28, %v8142_v5  ;;  %3761 = vst.msk [vmem:[#allocation5 + $0xd8] sm:$0xff] %vm3733_vm4, %v3692_v20  ;;  %v4903_v24 = vpop.f32.mrb[17].mxu0  ;;  %v4775_v42 = vpack.c.bf16 %v4755_v16, %v4754_v18 }
 0x61a   : > { %v5037_v9 = vmul.f32 %v8142_v5, %v4903_v24  ;;  %v3879_v4 = vpop.permute.xlu0 %3878  ;;  %v5542_v39 = vpop.f32.mrb[18].mxu0 }
 0x61b   : > { %v5078_v41 = vadd.f32 %v8149_v57, %v5039_v47  ;;  %3951 = vst.msk [vmem:[#allocation5 + $0xc0] sm:$0xff] %vm3926_vm5, %v3879_v4  ;;  %v5040_v48 = vmul.f32 %v5542_v39, %v8142_v5  ;;  %v4906_v58 = vpop.f32.mrb[19].mxu0  ;;  %5560 = vmatmul.mubr.msk.bf16.gmra.mrb[36].mxu0 %vm4816_vm10, %v4775_v42 }
 0x61c   : > { %v5076_v35 = vadd.f32 %v8149_v57, %v5037_v9  ;;  %v5038_v46 = vmul.f32 %v8142_v5, %v4906_v58  ;;  %v3881_v50 = vpop.permute.xlu1 %3880 }
 0x61d   : > { %v5110_v43 = vmax.f32 %v5078_v41, 0.0  ;;  %v5079_v49 = vadd.f32 %v8149_v57, %v5040_v48  ;;  %3952 = vst.msk [vmem:[#allocation5 + $0xc8] sm:$0xff] %vm3926_vm5, %v3881_v50 }
 0x61e   : > { %v5108_v61 = vmax.f32 %v5076_v35, 0.0  ;;  %v5077_v27 = vadd.f32 %v8149_v57, %v5038_v46  ;;  %v3883_v40 = vpop.permute.xlu0 %3882 }
 0x61f   : > { %5142 = vst.msk [vmem:[%s8163_s13 + $0x10] sm:$0xff] %vm410_vm3, %v5110_v43  ;;  %v5111_v7 = vmax.f32 %v5079_v49, 0.0 }
 0x620   : > { %3953 = vst.msk [vmem:[#allocation5 + $0xd0] sm:$0xff] %vm3926_vm5, %v3883_v40  ;;  %v5109_v30 = vmax.f32 %v5077_v27, 0.0  ;;  %v3885_v14 = vpop.permute.xlu1 %3884 }
 0x621   : > { %5140 = vst.msk [vmem:[%s8163_s13] sm:$0xff] %vm410_vm3, %v5108_v61  ;;  %5143 = vst.msk [vmem:[%s8163_s13 + $0x18] sm:$0xff] %vm410_vm3, %v5111_v7 }
 0x622   : > { %3954 = vst.msk [vmem:[#allocation5 + $0xd8] sm:$0xff] %vm3926_vm5, %v3885_v14  ;;  %v4072_v54 = vpop.permute.xlu0 %4071 }
 0x623   : > { %5141 = vst.msk [vmem:[%s8163_s13 + $0x8] sm:$0xff] %vm410_vm3, %v5109_v30 }
 0x624   : > { %4144 = vst.msk [vmem:[#allocation5 + $0xc0] sm:$0xff] %vm4119_vm6, %v4072_v54  ;;  %v4074_v21 = vpop.permute.xlu1 %4073 }
 0x625   : > { %4145 = vst.msk [vmem:[#allocation5 + $0xc8] sm:$0xff] %vm4119_vm6, %v4074_v21 }
 0x626   : > { %v4076_v51 = vpop.permute.xlu0 %4075 }
 0x627   : > { %4146 = vst.msk [vmem:[#allocation5 + $0xd0] sm:$0xff] %vm4119_vm6, %v4076_v51 }
 0x628   : > { %v4078_v13 = vpop.permute.xlu1 %4077 }
 0x629   : > { %4147 = vst.msk [vmem:[#allocation5 + $0xd8] sm:$0xff] %vm4119_vm6, %v4078_v13 }
 0x62a   : > { %v4266_v10 = vpop.permute.xlu0 %4265 }
 0x62b   : > { %4338 = vst.msk [vmem:[#allocation5 + $0xc0] sm:$0xff] %vm4313_vm7, %v4266_v10 }
 0x62c   : > { %v4268_v22 = vpop.permute.xlu1 %4267 }
 0x62d   : > { %4339 = vst.msk [vmem:[#allocation5 + $0xc8] sm:$0xff] %vm4313_vm7, %v4268_v22 }
 0x62e   : > { %v4270_v59 = vpop.permute.xlu0 %4269 }
 0x62f   : > { %4340 = vst.msk [vmem:[#allocation5 + $0xd0] sm:$0xff] %vm4313_vm7, %v4270_v59 }
 0x630   : > { %v4272_v37 = vpop.permute.xlu1 %4271 }
 0x631   : > { %4341 = vst.msk [vmem:[#allocation5 + $0xd8] sm:$0xff] %vm4313_vm7, %v4272_v37 }
 0x632   : > { %v4459_v15 = vpop.permute.xlu0 %4458 }
 0x633   : > { %4531 = vst.msk [vmem:[#allocation5 + $0xc0] sm:$0xff] %vm4506_vm8, %v4459_v15 }
 0x634   : > { %v4461_v53 = vpop.permute.xlu1 %4460 }
 0x635   : > { %4532 = vst.msk [vmem:[#allocation5 + $0xc8] sm:$0xff] %vm4506_vm8, %v4461_v53 }
 0x636   : > { %v4463_v29 = vpop.permute.xlu0 %4462 }
 0x637   : > { %4533 = vst.msk [vmem:[#allocation5 + $0xd0] sm:$0xff] %vm4506_vm8, %v4463_v29 }
 0x638   : > { %v4465_v33 = vpop.permute.xlu1 %4464 }
 0x639   : > { %4534 = vst.msk [vmem:[#allocation5 + $0xd8] sm:$0xff] %vm4506_vm8, %v4465_v33 }
 0x63a   : > { %v4652_v56 = vpop.permute.xlu0 %4651 }
 0x63b   : > { %4724 = vst.msk [vmem:[#allocation5 + $0xc0] sm:$0xff] %vm4699_vm9, %v4652_v56 }
 0x63c   : > { %v4654_v45 = vpop.permute.xlu1 %4653 }
 0x63d   : > { %4725 = vst.msk [vmem:[#allocation5 + $0xc8] sm:$0xff] %vm4699_vm9, %v4654_v45 }
 0x63e   : > { %v4656_v8 = vpop.permute.xlu0 %4655 }
 0x63f   : > { %4726 = vst.msk [vmem:[#allocation5 + $0xd0] sm:$0xff] %vm4699_vm9, %v4656_v8 }
 0x640   : > { %v5545_v55 = vpop.f32.mrb[20].mxu0  ;;  %v4658_v38 = vpop.permute.xlu1 %4657 }
 0x641   : > { %v5043_v2 = vmul.f32 %v5545_v55, %v8142_v5  ;;  %4727 = vst.msk [vmem:[#allocation5 + $0xd8] sm:$0xff] %vm4699_vm9, %v4658_v38  ;;  %v4919_v44 = vpop.f32.mrb[21].mxu0 }
 0x642   : > { %v5041_v25 = vmul.f32 %v8142_v5, %v4919_v44  ;;  %v3694_v1 = vpop.permute.xlu0 %3693  ;;  %v5546_v3 = vpop.f32.mrb[22].mxu0  ;;  %v4756_v52 = vld [vmem:[#allocation5 + $0xc0] sm:$0xff] }
 0x643   : > { %v5082_v63 = vadd.f32 %v8149_v57, %v5043_v2  ;;  %3762 = vst.msk [vmem:[#allocation5 + $0xe0] sm:$0xff] %vm3733_vm4, %v3694_v1  ;;  %v5044_v23 = vmul.f32 %v5546_v3, %v8142_v5  ;;  %v4922_v34 = vpop.f32.mrb[23].mxu0 }
 0x644   : > { %v5080_v60 = vadd.f32 %v8149_v57, %v5041_v25  ;;  %v5042_v0 = vmul.f32 %v8142_v5, %v4922_v34  ;;  %v3696_v26 = vpop.permute.xlu1 %3695  ;;  %v4757_v12 = vld [vmem:[#allocation5 + $0xc8] sm:$0xff] }
 0x645   : > { %v5114_v11 = vmax.f32 %v5082_v63, 0.0  ;;  %v5083_v31 = vadd.f32 %v8149_v57, %v5044_v23  ;;  %3763 = vst.msk [vmem:[#allocation5 + $0xe8] sm:$0xff] %vm3733_vm4, %v3696_v26  ;;  %v4776_v17 = vpack.c.bf16 %v4757_v12, %v4756_v52 }
 0x646   : > { %v5112_v36 = vmax.f32 %v5080_v60, 0.0  ;;  %v5081_v32 = vadd.f32 %v8149_v57, %v5042_v0  ;;  %v3698_v62 = vpop.permute.xlu0 %3697  ;;  %v4758_v20 = vld [vmem:[#allocation5 + $0xd0] sm:$0xff] }
 0x647   : > { %5146 = vst.msk [vmem:[%s8163_s13 + $0x30] sm:$0xff] %vm410_vm3, %v5114_v11  ;;  %v5115_v19 = vmax.f32 %v5083_v31, 0.0  ;;  %5563 = vmatprep.mubr.msk.bf16.mxu0 %vm4816_vm10, %v4776_v17 }
 0x648   : > { %3764 = vst.msk [vmem:[#allocation5 + $0xf0] sm:$0xff] %vm3733_vm4, %v3698_v62  ;;  %v5113_v6 = vmax.f32 %v5081_v32, 0.0  ;;  %v3700_v28 = vpop.permute.xlu1 %3699  ;;  %v4759_v18 = vld [vmem:[#allocation5 + $0xd8] sm:$0xff] }
 0x649   : > { %5144 = vst.msk [vmem:[%s8163_s13 + $0x20] sm:$0xff] %vm410_vm3, %v5112_v36  ;;  %5147 = vst.msk [vmem:[%s8163_s13 + $0x38] sm:$0xff] %vm410_vm3, %v5115_v19  ;;  %v4777_v16 = vpack.c.bf16 %v4759_v18, %v4758_v20 }
 0x64a   : > { %3765 = vst.msk [vmem:[#allocation5 + $0xf8] sm:$0xff] %vm3733_vm4, %v3700_v28  ;;  %v3887_v47 = vpop.permute.xlu0 %3886 }
 0x64b   : > { %5145 = vst.msk [vmem:[%s8163_s13 + $0x28] sm:$0xff] %vm410_vm3, %v5113_v6  ;;  %5564 = vmatmul.mubr.msk.bf16.gmra.mrb[40].mxu0 %vm4816_vm10, %v4777_v16 }
 0x64c   : > { %3955 = vst.msk [vmem:[#allocation5 + $0xe0] sm:$0xff] %vm3926_vm5, %v3887_v47  ;;  %v3889_v24 = vpop.permute.xlu1 %3888 }
 0x64d   : > { %3956 = vst.msk [vmem:[#allocation5 + $0xe8] sm:$0xff] %vm3926_vm5, %v3889_v24 }
 0x64e   : > { %v3891_v42 = vpop.permute.xlu0 %3890 }
 0x64f   : > { %3957 = vst.msk [vmem:[#allocation5 + $0xf0] sm:$0xff] %vm3926_vm5, %v3891_v42 }
 0x650   : > { %v3893_v9 = vpop.permute.xlu1 %3892 }
 0x651   : > { %3958 = vst.msk [vmem:[#allocation5 + $0xf8] sm:$0xff] %vm3926_vm5, %v3893_v9 }
 0x652   : > { %v4080_v4 = vpop.permute.xlu0 %4079 }
 0x653   : > { %4148 = vst.msk [vmem:[#allocation5 + $0xe0] sm:$0xff] %vm4119_vm6, %v4080_v4 }
 0x654   : > { %v4082_v39 = vpop.permute.xlu1 %4081 }
 0x655   : > { %4149 = vst.msk [vmem:[#allocation5 + $0xe8] sm:$0xff] %vm4119_vm6, %v4082_v39 }
 0x656   : > { %v4084_v41 = vpop.permute.xlu0 %4083 }
 0x657   : > { %4150 = vst.msk [vmem:[#allocation5 + $0xf0] sm:$0xff] %vm4119_vm6, %v4084_v41 }
 0x658   : > { %v4086_v48 = vpop.permute.xlu1 %4085 }
 0x659   : > { %4151 = vst.msk [vmem:[#allocation5 + $0xf8] sm:$0xff] %vm4119_vm6, %v4086_v48 }
 0x65a   : > { %v4274_v58 = vpop.permute.xlu0 %4273 }
 0x65b   : > { %4342 = vst.msk [vmem:[#allocation5 + $0xe0] sm:$0xff] %vm4313_vm7, %v4274_v58 }
 0x65c   : > { %v4276_v35 = vpop.permute.xlu1 %4275 }
 0x65d   : > { %4343 = vst.msk [vmem:[#allocation5 + $0xe8] sm:$0xff] %vm4313_vm7, %v4276_v35 }
 0x65e   : > { %v4278_v46 = vpop.permute.xlu0 %4277 }
 0x65f   : > { %4344 = vst.msk [vmem:[#allocation5 + $0xf0] sm:$0xff] %vm4313_vm7, %v4278_v46 }
 0x660   : > { %v4280_v50 = vpop.permute.xlu1 %4279 }
 0x661   : > { %4345 = vst.msk [vmem:[#allocation5 + $0xf8] sm:$0xff] %vm4313_vm7, %v4280_v50 }
 0x662   : > { %v4467_v43 = vpop.permute.xlu0 %4466 }
 0x663   : > { %4535 = vst.msk [vmem:[#allocation5 + $0xe0] sm:$0xff] %vm4506_vm8, %v4467_v43 }
 0x664   : > { %v4469_v49 = vpop.permute.xlu1 %4468 }
 0x665   : > { %4536 = vst.msk [vmem:[#allocation5 + $0xe8] sm:$0xff] %vm4506_vm8, %v4469_v49 }
 0x666   : > { %v4471_v61 = vpop.permute.xlu0 %4470 }
 0x667   : > { %4537 = vst.msk [vmem:[#allocation5 + $0xf0] sm:$0xff] %vm4506_vm8, %v4471_v61 }
 0x668   : > { %v5549_v27 = vpop.f32.mrb[24].mxu0  ;;  %v4473_v40 = vpop.permute.xlu1 %4472 }
 0x669   : > { %v5047_v7 = vmul.f32 %v5549_v27, %v8142_v5  ;;  %4538 = vst.msk [vmem:[#allocation5 + $0xf8] sm:$0xff] %vm4506_vm8, %v4473_v40  ;;  %v4935_v30 = vpop.f32.mrb[25].mxu0 }
 0x66a   : > { %v5045_v14 = vmul.f32 %v8142_v5, %v4935_v30  ;;  %v4660_v54 = vpop.permute.xlu0 %4659  ;;  %v5550_v21 = vpop.f32.mrb[26].mxu0 }
 0x66b   : > { %v5086_v51 = vadd.f32 %v8149_v57, %v5047_v7  ;;  %4728 = vst.msk [vmem:[#allocation5 + $0xe0] sm:$0xff] %vm4699_vm9, %v4660_v54  ;;  %v5048_v13 = vmul.f32 %v5550_v21, %v8142_v5  ;;  %v4938_v10 = vpop.f32.mrb[27].mxu0 }
 0x66c   : > { %v5084_v22 = vadd.f32 %v8149_v57, %v5045_v14  ;;  %v5046_v59 = vmul.f32 %v8142_v5, %v4938_v10  ;;  %v4662_v37 = vpop.permute.xlu1 %4661 }
 0x66d   : > { %v5118_v15 = vmax.f32 %v5086_v51, 0.0  ;;  %v5087_v53 = vadd.f32 %v8149_v57, %v5048_v13  ;;  %4729 = vst.msk [vmem:[#allocation5 + $0xe8] sm:$0xff] %vm4699_vm9, %v4662_v37 }
 0x66e   : > { %v5116_v29 = vmax.f32 %v5084_v22, 0.0  ;;  %v5085_v33 = vadd.f32 %v8149_v57, %v5046_v59  ;;  %v4664_v56 = vpop.permute.xlu0 %4663 }
 0x66f   : > { %5150 = vst.msk [vmem:[%s8163_s13 + $0x50] sm:$0xff] %vm410_vm3, %v5118_v15  ;;  %v5119_v45 = vmax.f32 %v5087_v53, 0.0 }
 0x670   : > { %4730 = vst.msk [vmem:[#allocation5 + $0xf0] sm:$0xff] %vm4699_vm9, %v4664_v56  ;;  %v5117_v8 = vmax.f32 %v5085_v33, 0.0  ;;  %v4666_v55 = vpop.permute.xlu1 %4665 }
 0x671   : > { %5148 = vst.msk [vmem:[%s8163_s13 + $0x40] sm:$0xff] %vm410_vm3, %v5116_v29  ;;  %5151 = vst.msk [vmem:[%s8163_s13 + $0x58] sm:$0xff] %vm410_vm3, %v5119_v45 }
 0x672   : > { %4731 = vst.msk [vmem:[#allocation5 + $0xf8] sm:$0xff] %vm4699_vm9, %v4666_v55  ;;  %v4760_v38 = vld [vmem:[#allocation5 + $0xe0] sm:$0xff] }
 0x673   : > { %5149 = vst.msk [vmem:[%s8163_s13 + $0x48] sm:$0xff] %vm410_vm3, %v5117_v8 }
 0x674   : > { %v4761_v2 = vld [vmem:[#allocation5 + $0xe8] sm:$0xff] }
 0x675   : > { %v4778_v44 = vpack.c.bf16 %v4761_v2, %v4760_v38 }
 0x677   : > { %v4762_v25 = vld [vmem:[#allocation5 + $0xf0] sm:$0xff]  ;;  %5567 = vmatprep.mubr.msk.bf16.mxu0 %vm4816_vm10, %v4778_v44 }
 0x679   : > { %v4763_v1 = vld [vmem:[#allocation5 + $0xf8] sm:$0xff] }
 0x67a   : > { %v4779_v3 = vpack.c.bf16 %v4763_v1, %v4762_v25 }
 0x67c   : > { %5568 = vmatmul.mubr.msk.bf16.gmra.mrb[44].mxu0 %vm4816_vm10, %v4779_v3 }
 0x690   : > { %v5553_v63 = vpop.f32.mrb[28].mxu0 }
 0x691   : > { %v5051_v23 = vmul.f32 %v5553_v63, %v8142_v5  ;;  %v4951_v34 = vpop.f32.mrb[29].mxu0 }
 0x692   : > { %v5049_v60 = vmul.f32 %v8142_v5, %v4951_v34  ;;  %v5554_v0 = vpop.f32.mrb[30].mxu0 }
 0x693   : > { %v5090_v26 = vadd.f32 %v8149_v57, %v5051_v23  ;;  %v5052_v52 = vmul.f32 %v5554_v0, %v8142_v5  ;;  %v4954_v12 = vpop.f32.mrb[31].mxu0 }
 0x694   : > { %v5088_v11 = vadd.f32 %v8149_v57, %v5049_v60  ;;  %v5050_v31 = vmul.f32 %v8142_v5, %v4954_v12 }
 0x695   : > { %v5122_v17 = vmax.f32 %v5090_v26, 0.0  ;;  %v5091_v36 = vadd.f32 %v8149_v57, %v5052_v52 }
 0x696   : > { %v5120_v32 = vmax.f32 %v5088_v11, 0.0  ;;  %v5089_v62 = vadd.f32 %v8149_v57, %v5050_v31 }
 0x697   : > { %5154 = vst.msk [vmem:[%s8163_s13 + $0x70] sm:$0xff] %vm410_vm3, %v5122_v17  ;;  %v5123_v19 = vmax.f32 %v5091_v36, 0.0 }
 0x698   : > { %5152 = vst.msk [vmem:[%s8163_s13 + $0x60] sm:$0xff] %vm410_vm3, %v5120_v32  ;;  %v5121_v6 = vmax.f32 %v5089_v62, 0.0 }
 0x699   : > { %5155 = vst.msk [vmem:[%s8163_s13 + $0x78] sm:$0xff] %vm410_vm3, %v5123_v19 }
 0x69a   : > { %5153 = vst.msk [vmem:[%s8163_s13 + $0x68] sm:$0xff] %vm410_vm3, %v5121_v6 }
 0x6be   : > { %v5557_v28 = vpop.f32.mrb[32].mxu0 }
 0x6bf   : > { %v5055_v20 = vmul.f32 %v5557_v28, %v8142_v5  ;;  %v4967_v18 = vpop.f32.mrb[33].mxu0 }
 0x6c0   : > { %v5053_v16 = vmul.f32 %v8142_v5, %v4967_v18  ;;  %v5558_v47 = vpop.f32.mrb[34].mxu0 }
 0x6c1   : > { %v5094_v24 = vadd.f32 %v8149_v57, %v5055_v20  ;;  %v5056_v42 = vmul.f32 %v5558_v47, %v8142_v5  ;;  %v4970_v9 = vpop.f32.mrb[35].mxu0 }
 0x6c2   : > { %v5092_v4 = vadd.f32 %v8149_v57, %v5053_v16  ;;  %v5054_v39 = vmul.f32 %v8142_v5, %v4970_v9 }
 0x6c3   : > { %v5126_v41 = vmax.f32 %v5094_v24, 0.0  ;;  %v5095_v48 = vadd.f32 %v8149_v57, %v5056_v42 }
 0x6c4   : > { %v5124_v58 = vmax.f32 %v5092_v4, 0.0  ;;  %v5093_v35 = vadd.f32 %v8149_v57, %v5054_v39 }
 0x6c5   : > { %5158 = vst.msk [vmem:[%s8163_s13 + $0x90] sm:$0xff] %vm410_vm3, %v5126_v41  ;;  %v5127_v46 = vmax.f32 %v5095_v48, 0.0 }
 0x6c6   : > { %5156 = vst.msk [vmem:[%s8163_s13 + $0x80] sm:$0xff] %vm410_vm3, %v5124_v58  ;;  %v5125_v50 = vmax.f32 %v5093_v35, 0.0 }
 0x6c7   : > { %5159 = vst.msk [vmem:[%s8163_s13 + $0x98] sm:$0xff] %vm410_vm3, %v5127_v46 }
 0x6c8   : > { %5157 = vst.msk [vmem:[%s8163_s13 + $0x88] sm:$0xff] %vm410_vm3, %v5125_v50 }
 0x6ee   : > { %v5561_v43 = vpop.f32.mrb[36].mxu0 }
 0x6ef   : > { %v5059_v49 = vmul.f32 %v5561_v43, %v8142_v5  ;;  %v4983_v61 = vpop.f32.mrb[37].mxu0 }
 0x6f0   : > { %v5057_v27 = vmul.f32 %v8142_v5, %v4983_v61  ;;  %v5562_v40 = vpop.f32.mrb[38].mxu0 }
 0x6f1   : > { %v5098_v7 = vadd.f32 %v8149_v57, %v5059_v49  ;;  %v5060_v30 = vmul.f32 %v5562_v40, %v8142_v5  ;;  %v4986_v14 = vpop.f32.mrb[39].mxu0 }
 0x6f2   : > { %v5096_v54 = vadd.f32 %v8149_v57, %v5057_v27  ;;  %v5058_v21 = vmul.f32 %v8142_v5, %v4986_v14 }
 0x6f3   : > { %v5130_v51 = vmax.f32 %v5098_v7, 0.0  ;;  %v5099_v13 = vadd.f32 %v8149_v57, %v5060_v30 }
 0x6f4   : > { %v5128_v10 = vmax.f32 %v5096_v54, 0.0  ;;  %v5097_v22 = vadd.f32 %v8149_v57, %v5058_v21 }
 0x6f5   : > { %5162 = vst.msk [vmem:[%s8163_s13 + $0xb0] sm:$0xff] %vm410_vm3, %v5130_v51  ;;  %v5131_v59 = vmax.f32 %v5099_v13, 0.0 }
 0x6f6   : > { %5160 = vst.msk [vmem:[%s8163_s13 + $0xa0] sm:$0xff] %vm410_vm3, %v5128_v10  ;;  %v5129_v37 = vmax.f32 %v5097_v22, 0.0 }
 0x6f7   : > { %5163 = vst.msk [vmem:[%s8163_s13 + $0xb8] sm:$0xff] %vm410_vm3, %v5131_v59 }
 0x6f8   : > { %5161 = vst.msk [vmem:[%s8163_s13 + $0xa8] sm:$0xff] %vm410_vm3, %v5129_v37 }
 0x71e   : > { %v5565_v15 = vpop.f32.mrb[40].mxu0 }
 0x71f   : > { %v5063_v53 = vmul.f32 %v5565_v15, %v8142_v5  ;;  %v4999_v29 = vpop.f32.mrb[41].mxu0 }
 0x720   : > { %v5061_v33 = vmul.f32 %v8142_v5, %v4999_v29  ;;  %v5566_v56 = vpop.f32.mrb[42].mxu0 }
 0x721   : > { %v5102_v45 = vadd.f32 %v8149_v57, %v5063_v53  ;;  %v5064_v8 = vmul.f32 %v5566_v56, %v8142_v5  ;;  %v5002_v55 = vpop.f32.mrb[43].mxu0 }
 0x722   : > { %v5100_v38 = vadd.f32 %v8149_v57, %v5061_v33  ;;  %v5062_v2 = vmul.f32 %v8142_v5, %v5002_v55 }
 0x723   : > { %v5134_v44 = vmax.f32 %v5102_v45, 0.0  ;;  %v5103_v25 = vadd.f32 %v8149_v57, %v5064_v8 }
 0x724   : > { %v5132_v1 = vmax.f32 %v5100_v38, 0.0  ;;  %v5101_v3 = vadd.f32 %v8149_v57, %v5062_v2 }
 0x725   : > { %5166 = vst.msk [vmem:[%s8163_s13 + $0xd0] sm:$0xff] %vm410_vm3, %v5134_v44  ;;  %v5135_v63 = vmax.f32 %v5103_v25, 0.0 }
 0x726   : > { %5164 = vst.msk [vmem:[%s8163_s13 + $0xc0] sm:$0xff] %vm410_vm3, %v5132_v1  ;;  %v5133_v23 = vmax.f32 %v5101_v3, 0.0 }
 0x727   : > { %5167 = vst.msk [vmem:[%s8163_s13 + $0xd8] sm:$0xff] %vm410_vm3, %v5135_v63 }
 0x728   : > { %5165 = vst.msk [vmem:[%s8163_s13 + $0xc8] sm:$0xff] %vm410_vm3, %v5133_v23 }
 0x74f   : > { %v5569_v34 = vpop.f32.mrb[44].mxu0 }
 0x750   : > { %v5067_v60 = vmul.f32 %v5569_v34, %v8142_v5  ;;  %v5015_v0 = vpop.f32.mrb[45].mxu0 }
 0x751   : > { %v5065_v26 = vmul.f32 %v8142_v5, %v5015_v0  ;;  %v5570_v52 = vpop.f32.mrb[46].mxu0 }
 0x752   : > { %v5106_v12 = vadd.f32 %v8149_v57, %v5067_v60  ;;  %v5068_v11 = vmul.f32 %v5570_v52, %v8142_v5  ;;  %v5018_v31 = vpop.f32.mrb[47].mxu0 }
 0x753   : > { %v5104_v17 = vadd.f32 %v8149_v57, %v5065_v26  ;;  %v5066_v36 = vmul.f32 %v8142_v5, %v5018_v31 }
 0x754   : > { %v5138_v32 = vmax.f32 %v5106_v12, 0.0  ;;  %v5107_v62 = vadd.f32 %v8149_v57, %v5068_v11 }
 0x755   : > { %v5136_v19 = vmax.f32 %v5104_v17, 0.0  ;;  %v5105_v6 = vadd.f32 %v8149_v57, %v5066_v36 }
 0x756   : > { %5170 = vst.msk [vmem:[%s8163_s13 + $0xf0] sm:$0xff] %vm410_vm3, %v5138_v32  ;;  %v5139_v28 = vmax.f32 %v5107_v62, 0.0 }
 0x757   : > { %5168 = vst.msk [vmem:[%s8163_s13 + $0xe0] sm:$0xff] %vm410_vm3, %v5136_v19  ;;  %v5137_v20 = vmax.f32 %v5105_v6, 0.0 }
 0x758   : > { %5171 = vst.msk [vmem:[%s8163_s13 + $0xf8] sm:$0xff] %vm410_vm3, %v5139_v28 }
 0x759   : > { %5169 = vst.msk [vmem:[%s8163_s13 + $0xe8] sm:$0xff] %vm410_vm3, %v5137_v20 }
 0x75a PF: > { %s19_s30 = sadd.s32 1, %s5638_s30  }
 0x75b   : > { %p16_p4 = scmp.ge.s32.totalorder %s19_s30, 4  }
 0x75d   :  { %18 = sbr.rel (!%p16_p4) target bundleno = 1 (0x1), region = 93 }

</bundles_post_ra>
